<compile_context>
chip_gen: v6e
topology: v6e:2x2x1
jax: 0.10.0
libtpu: 0.0.40
codegen_flags: <defaults>
</compile_context>

<pallas_src>
from functools import partial

import jax
import jax.numpy as jnp
import numpy as np
from jax.experimental import pallas as pl
from jax.experimental.pallas import tpu as pltpu


# --------------------------------------------------------------------------- #
# In-kernel helpers
# --------------------------------------------------------------------------- #
def _layernorm(h, gamma, beta, eps=1e-5):
    # PyTorch nn.LayerNorm over the last dim (biased variance, affine), in f32.
    mu = jnp.mean(h, axis=-1, keepdims=True)
    var = jnp.mean(jnp.square(h - mu), axis=-1, keepdims=True)
    return (h - mu) * jax.lax.rsqrt(var + eps) * gamma + beta


def _mha_fused(xq, xkv, wq, wk, wv, wo, n_heads, dim_attn, q_chunk):
    """Multi-head attention with head-fused projections.

    xq  : (Bt, Sq, D)  f32 activations (queries)
    xkv : (Bt, Skv, D) f32 activations (keys / values)
    wq, wk : (D, H*A)  compute-dtype weights (wq pre-scaled by 1/sqrt(A))
    wv     : (D, H*D)  compute-dtype weights
    wo     : (H*D, D)  compute-dtype combine weight, pre-permuted to the
                       concatenated-head layout.
    Returns (Bt*Sq, D) f32.
    """
    H, A = n_heads, dim_attn
    Bt, Sq, D = xq.shape
    Skv = xkv.shape[1]
    cd = wq.dtype                       # bf16 for MXU-native rate, or f32

    # K / V projections: one wide MXU matmul each, f32 accumulation.
    xkv_cd = xkv.reshape(Bt * Skv, D).astype(cd)
    k = jnp.dot(xkv_cd, wk, preferred_element_type=jnp.float32).reshape(Bt, Skv, H * A)
    v = jnp.dot(xkv_cd, wv, preferred_element_type=jnp.float32).reshape(Bt, Skv, H * D)

    # Per-head K/V slices, cast once to the compute dtype (outside the q loop).
    # TODO(synk): replace with a head-batched einsum (multi-batch dot_general)
    # and a pre-transposed K layout to avoid per-head lane slices / K transpose.
    kh = [k[:, :, h * A:(h + 1) * A].astype(cd) for h in range(H)]
    vh = [v[:, :, h * D:(h + 1) * D].astype(cd) for h in range(H)]
    woh = [wo[h * D:(h + 1) * D, :] for h in range(H)]   # sublane row slices

    # Q-dim chunking caps the (Bt, qc, Skv) f32 score block independent of Sq.
    n_chunks = Sq // q_chunk
    chunk_outs = []
    for c in range(n_chunks):                            # static -> unrolled
        xq_c = xq[:, c * q_chunk:(c + 1) * q_chunk, :]                 # (Bt, qc, D)
        q = jnp.dot(xq_c.reshape(Bt * q_chunk, D).astype(cd), wq,
                    preferred_element_type=jnp.float32)                # (Bt*qc, H*A)
        q = q.reshape(Bt, q_chunk, H * A)

        # Head combine is accumulated (o += o_h @ wo_h): no concatenate, no
        # H live head outputs.
        o = jnp.zeros((Bt * q_chunk, D), jnp.float32)
        for h in range(H):                               # static -> unrolled
            qh = q[:, :, h * A:(h + 1) * A].astype(cd)                 # (Bt, qc, A)
            s = jnp.einsum("bqa,bka->bqk", qh, kh[h],
                           preferred_element_type=jnp.float32)         # (Bt, qc, Skv)
            s = s - jnp.max(s, axis=-1, keepdims=True)
            p = jnp.exp(s)
            p = p * pl.reciprocal(jnp.sum(p, axis=-1, keepdims=True))  # exact EUP
            oh = jnp.einsum("bqk,bkd->bqd", p.astype(cd), vh[h],
                            preferred_element_type=jnp.float32)        # (Bt, qc, D)
            o = o + jnp.dot(oh.reshape(Bt * q_chunk, D).astype(cd), woh[h],
                            preferred_element_type=jnp.float32)
        chunk_outs.append(o.reshape(Bt, q_chunk, D))

    out = chunk_outs[0] if n_chunks == 1 else jnp.concatenate(chunk_outs, axis=1)
    return out.reshape(Bt * Sq, D)


# --------------------------------------------------------------------------- #
# Fused DecoderLayer kernel (one batch TILE per grid step)
# --------------------------------------------------------------------------- #
def decoder_layer_kernel(
    x_ref, enc_ref,
    wq1, wk1, wv1, wo1,          # self-attention block (head-fused weights)
    wq2, wk2, wv2, wo2,          # cross-attention block
    w_fc1, w_fc2,                # feed-forward weights (fc2 applied first!)
    vec_ref,                     # (8, D): b_fc1,b_fc2,g1,b1,g2,b2,g3,b3 (f32)
    out_ref,
    *, n_heads, dim_attn, q_chunk,
):
    Bt, S, D = x_ref.shape

    x3 = x_ref[...].astype(jnp.float32)           # (Bt, S, D)
    enc3 = enc_ref[...].astype(jnp.float32)       # (Bt, Skv, D)

    vec = vec_ref[...].astype(jnp.float32)
    b_fc1, b_fc2 = vec[0:1], vec[1:2]
    g1, be1 = vec[2:3], vec[3:4]
    g2, be2 = vec[4:5], vec[5:6]
    g3, be3 = vec[6:7], vec[7:8]

    x = x3.reshape(Bt * S, D)

    # a = attn1(x);  x = norm1(a + x)
    a = _mha_fused(x3, x3, wq1[...], wk1[...], wv1[...], wo1[...],
                   n_heads, dim_attn, q_chunk)
    x = _layernorm(a + x, g1, be1)

    # a = attn2(x, kv=enc);  x = norm2(a + x)
    a = _mha_fused(x.reshape(Bt, S, D), enc3,
                   wq2[...], wk2[...], wv2[...], wo2[...],
                   n_heads, dim_attn, q_chunk)
    x = _layernorm(a + x, g2, be2)

    # a = fc1(relu(fc2(x)));  x = norm3(x + a)   (bias / relu / LN in f32)
    wf1, wf2 = w_fc1[...], w_fc2[...]
    h = jnp.dot(x.astype(wf2.dtype), wf2, preferred_element_type=jnp.float32) + b_fc2
    h = jnp.maximum(h, 0.0)
    a = jnp.dot(h.astype(wf1.dtype), wf1, preferred_element_type=jnp.float32) + b_fc1
    x = _layernorm(x + a, g3, be3)

    out_ref[...] = x.reshape(Bt, S, D).astype(out_ref.dtype)


def decoder_layer(x, enc, kernel_params, *, n_heads, dim_attn,
                  batch_tile=None, q_chunk=None,
                  vmem_limit_bytes=48 * 1024 * 1024,
                  single_buffer_weights=True):
    """Fused DecoderLayer forward as a single Pallas kernel.

    Sizing guidance (per review):
      * batch_tile: batch rows per grid step. Default B//2 so there are >=2
        steps per TensorCore and the x/enc/out DMAs overlap compute. On v7x
        (2 TCs, 64 MiB VMEM EACH, weights duplicated into both cores' VMEM)
        use batch_tile <= B//4 and budget per core:
          2*(x tile + enc tile + out tile) + packed weights (single-buffered)
          + largest live attention intermediate  <  ~48-56 MiB.
      * q_chunk bounds the (batch_tile, q_chunk, Skv) f32 score block for long
        sequences (S ~ 2048); pick a multiple of 8 (ideally >=128).
      * vmem_limit_bytes raises the scoped-VMEM limit above the 16/32 MiB
        defaults (v5e / v6e-v7x); keep below the 64 MiB physical limit on v7x.
      * For full MXU utilization on v6e/v7x choose D, H*A, H*D as multiples of
        256 (128 on v5e) and batch_tile*S >= 512 rows per step; pack weights in
        bf16 (pack_params compute_dtype) so dots run at the MXU native rate.
    """
    B, S, D = x.shape
    _, Senc, _ = enc.shape

    if batch_tile is None:
        batch_tile = B // 2 if B % 2 == 0 else B
    assert B % batch_tile == 0, "batch_tile must divide batch"
    if q_chunk is None:
        q_chunk = S
    assert S % q_chunk == 0, "q_chunk must divide sequence length"

    grid = (B // batch_tile,)
    kernel = partial(decoder_layer_kernel, n_heads=n_heads, dim_attn=dim_attn,
                     q_chunk=q_chunk)

    def rep_spec(p):
        nd = p.ndim
        index_map = lambda b, _n=nd: (0,) * _n
        if single_buffer_weights:
            # Grid-invariant operand: single buffer (default double-buffering
            # would waste 2x the weight VMEM for zero benefit).
            return pl.BlockSpec(p.shape, index_map, pipeline_mode=pl.Buffered(1))
        return pl.BlockSpec(p.shape, index_map)

    in_specs = [
        pl.BlockSpec((batch_tile, S, D), lambda b: (b, 0, 0)),      # x tile
        pl.BlockSpec((batch_tile, Senc, D), lambda b: (b, 0, 0)),   # enc tile
    ] + [rep_spec(p) for p in kernel_params]                        # weights

    return pl.pallas_call(
        kernel,
        out_shape=jax.ShapeDtypeStruct((B, S, D), x.dtype),
        grid=grid,
        in_specs=in_specs,
        out_specs=pl.BlockSpec((batch_tile, S, D), lambda b: (b, 0, 0)),
        compiler_params=pltpu.CompilerParams(
            dimension_semantics=("parallel",),
            vmem_limit_bytes=vmem_limit_bytes),
    )(x, enc, *kernel_params)


def run_decoder_layer(x, enc, kernel_params, **kw):
    """Run the kernel; fall back to default-buffered weight specs if this jax
    build rejects pl.Buffered(1) single-buffering."""
    try:
        return jax.block_until_ready(
            decoder_layer(x, enc, kernel_params, single_buffer_weights=True, **kw))
    except Exception:
        # TODO(synk): remove fallback once pl.Buffered(1) is universally
        # accepted for grid-invariant operands.
        return jax.block_until_ready(
            decoder_layer(x, enc, kernel_params, single_buffer_weights=False, **kw))


# --------------------------------------------------------------------------- #
# PyTorch-layout parameters + packing into kernel layout (plain-JAX glue)
# --------------------------------------------------------------------------- #
def make_params(key, dim_val, dim_attn, n_heads):
    """Raw PyTorch-equivalent parameters (per-head weights, stored as W^T)."""
    D, A, H = dim_val, dim_attn, n_heads
    ks = iter(jax.random.split(key, 8 * H + 16))

    def w(shape, scale=0.1):
        return (scale * jax.random.normal(next(ks), shape)).astype(jnp.float32)

    def attn_block():
        return dict(
            wq=jnp.stack([w((D, A)) for _ in range(H)]),   # (H, D, A) = W^T / head
            wk=jnp.stack([w((D, A)) for _ in range(H)]),   # (H, D, A)
            wv=jnp.stack([w((D, D)) for _ in range(H)]),   # (H, D, D)
            W_comb=w((D, H * D)),                          # Linear(H*D, D, bias=False).weight
        )

    return dict(
        attn1=attn_block(), attn2=attn_block(),
        w_fc1=w((D, D)), b_fc1=w((D,)),
        w_fc2=w((D, D)), b_fc2=w((D,)),
        g1=jnp.ones((D,), jnp.float32), be1=jnp.zeros((D,), jnp.float32),
        g2=jnp.ones((D,), jnp.float32), be2=jnp.zeros((D,), jnp.float32),
        g3=jnp.ones((D,), jnp.float32), be3=jnp.zeros((D,), jnp.float32),
    )


def pack_params(params, *, n_heads, dim_attn, dim_val, compute_dtype=jnp.bfloat16):
    """Fuse heads into wide matmul weights (cast once to compute_dtype) and pack
    the eight small (D,) vectors into a single f32 (8, D) operand."""
    H, A, D = n_heads, dim_attn, dim_val
    scale = np.float32(1.0 / np.sqrt(dim_attn))

    def pack_attn(p):
        wq = jnp.concatenate([p["wq"][h] for h in range(H)], axis=1) * scale  # (D, H*A)
        wk = jnp.concatenate([p["wk"][h] for h in range(H)], axis=1)          # (D, H*A)
        wv = jnp.concatenate([p["wv"][h] for h in range(H)], axis=1)          # (D, H*D)
        # torch.stack(heads,-1).flatten(2) interleaves as index d*H+h; the
        # kernel uses concatenated heads (index h*D+d), so permute once:
        wo = p["W_comb"].T.reshape(D, H, D).transpose(1, 0, 2).reshape(H * D, D)
        return (wq.astype(compute_dtype), wk.astype(compute_dtype),
                wv.astype(compute_dtype), wo.astype(compute_dtype))

    wq1, wk1, wv1, wo1 = pack_attn(params["attn1"])
    wq2, wk2, wv2, wo2 = pack_attn(params["attn2"])

    vec = jnp.stack([params["b_fc1"], params["b_fc2"],
                     params["g1"], params["be1"],
                     params["g2"], params["be2"],
                     params["g3"], params["be3"]], axis=0).astype(jnp.float32)  # (8, D)

    return [wq1, wk1, wv1, wo1, wq2, wk2, wv2, wo2,
            params["w_fc1"].astype(compute_dtype),
            params["w_fc2"].astype(compute_dtype),
            vec]


# --------------------------------------------------------------------------- #
# Pure-JAX reference mirroring the PyTorch forward EXACTLY (raw weights,
# torch.stack(...,-1).flatten(2) head combine).
# --------------------------------------------------------------------------- #
def ref_decoder_layer(x, enc, params, *, n_heads, dim_attn):
    def layernorm(h, g, b, eps=1e-5):
        mu = jnp.mean(h, axis=-1, keepdims=True)
        var = jnp.mean(jnp.square(h - mu), axis=-1, keepdims=True)
        return (h - mu) / jnp.sqrt(var + eps) * g + b

    def mha(xq, xkv, p):
        heads = []
        for h in range(n_heads):
            q = xq @ p["wq"][h]
            k = xkv @ p["wk"][h]
            v = xkv @ p["wv"][h]
            s = jax.nn.softmax(
                jnp.einsum("bsa,bta->bst", q, k) / jnp.sqrt(jnp.float32(dim_attn)),
                axis=-1)
            heads.append(jnp.einsum("bst,btd->bsd", s, v))
        a = jnp.stack(heads, axis=-1)                       # torch.stack(dim=-1)
        a = a.reshape(a.shape[0], a.shape[1], -1)           # flatten(start_dim=2)
        return a @ p["W_comb"].T                            # Linear(H*D, D, bias=False)

    a = mha(x, x, params["attn1"])
    x = layernorm(a + x, params["g1"], params["be1"])
    a = mha(x, enc, params["attn2"])
    x = layernorm(a + x, params["g2"], params["be2"])
    a = jax.nn.relu(x @ params["w_fc2"] + params["b_fc2"]) @ params["w_fc1"] + params["b_fc1"]
    x = layernorm(x + a, params["g3"], params["be3"])
    return x


# --------------------------------------------------------------------------- #
if __name__ == "__main__":
    B, S, S_enc = 2, 16, 16
    dim_val, dim_attn, n_heads = 32, 16, 2

    key = jax.random.PRNGKey(0)
    k_x, k_enc, k_p = jax.random.split(key, 3)
    x = jax.random.normal(k_x, (B, S, dim_val), dtype=jnp.float32)
    enc = jax.random.normal(k_enc, (B, S_enc, dim_val), dtype=jnp.float32)

    params = make_params(k_p, dim_val, dim_attn, n_heads)

    # Reference at forced-f32 matmul precision (XLA default on TPU would use
    # single-pass bf16 dots, which muddies the comparison baseline).
    with jax.default_matmul_precision("float32"):
        ref = ref_decoder_layer(x, enc, params, n_heads=n_heads, dim_attn=dim_attn)
    ref = np.asarray(jax.block_until_ready(ref))

    # (1) f32-dot path, q dimension chunked (2 chunks of 8) — structural
    #     correctness gate for head fusion / permutation / chunking.
    kp_f32 = pack_params(params, n_heads=n_heads, dim_attn=dim_attn,
                         dim_val=dim_val, compute_dtype=jnp.float32)
    out_f32 = run_decoder_layer(x, enc, kp_f32, n_heads=n_heads,
                                dim_attn=dim_attn, q_chunk=8)
    np.testing.assert_allclose(np.asarray(out_f32), ref, rtol=1e-2, atol=1e-2)

    # (2) bf16-dot path (MXU-native rate), default chunking.  Tolerance covers
    #     bf16 weight/activation rounding; structural errors would be O(0.5).
    kp_bf16 = pack_params(params, n_heads=n_heads, dim_attn=dim_attn,
                          dim_val=dim_val, compute_dtype=jnp.bfloat16)
    out_bf16 = run_decoder_layer(x, enc, kp_bf16, n_heads=n_heads, dim_attn=dim_attn)
    np.testing.assert_allclose(np.asarray(out_bf16), ref, rtol=4e-2, atol=4e-2)

    print("KERNEL_OK")
</pallas_src>

<mosaic_0001>
module attributes {stable_mosaic.version = 11 : i64} {
  func.func @decoder_layer_kernel(%arg0: i32, %arg1: memref<1x16x32xf32, #tpu.memory_space<vmem>>, %arg2: memref<1x16x32xf32, #tpu.memory_space<vmem>>, %arg3: memref<32x32xf32, #tpu.memory_space<vmem>>, %arg4: memref<32x32xf32, #tpu.memory_space<vmem>>, %arg5: memref<32x64xf32, #tpu.memory_space<vmem>>, %arg6: memref<64x32xf32, #tpu.memory_space<vmem>>, %arg7: memref<32x32xf32, #tpu.memory_space<vmem>>, %arg8: memref<32x32xf32, #tpu.memory_space<vmem>>, %arg9: memref<32x64xf32, #tpu.memory_space<vmem>>, %arg10: memref<64x32xf32, #tpu.memory_space<vmem>>, %arg11: memref<32x32xf32, #tpu.memory_space<vmem>>, %arg12: memref<32x32xf32, #tpu.memory_space<vmem>>, %arg13: memref<8x32xf32, #tpu.memory_space<vmem>>, %arg14: memref<1x16x32xf32, #tpu.memory_space<vmem>>) attributes {dimension_semantics = [#tpu.dimension_semantics<parallel>], iteration_bounds = array<i64: 2>, scalar_prefetch = 0 : i64, scratch_operands = 0 : i64, tpu.core_type = #tpu.core_type<tc>, window_params = [{transform_indices = @transform_0, window_bounds = array<i64: 1, 16, 32>}, {transform_indices = @transform_1, window_bounds = array<i64: 1, 16, 32>}, {pipeline_mode = #tpu.pipeline_mode<synchronous>, transform_indices = @transform_2, window_bounds = array<i64: 32, 32>}, {pipeline_mode = #tpu.pipeline_mode<synchronous>, transform_indices = @transform_3, window_bounds = array<i64: 32, 32>}, {pipeline_mode = #tpu.pipeline_mode<synchronous>, transform_indices = @transform_4, window_bounds = array<i64: 32, 64>}, {pipeline_mode = #tpu.pipeline_mode<synchronous>, transform_indices = @transform_5, window_bounds = array<i64: 64, 32>}, {pipeline_mode = #tpu.pipeline_mode<synchronous>, transform_indices = @transform_6, window_bounds = array<i64: 32, 32>}, {pipeline_mode = #tpu.pipeline_mode<synchronous>, transform_indices = @transform_7, window_bounds = array<i64: 32, 32>}, {pipeline_mode = #tpu.pipeline_mode<synchronous>, transform_indices = @transform_8, window_bounds = array<i64: 32, 64>}, {pipeline_mode = #tpu.pipeline_mode<synchronous>, transform_indices = @transform_9, window_bounds = array<i64: 64, 32>}, {pipeline_mode = #tpu.pipeline_mode<synchronous>, transform_indices = @transform_10, window_bounds = array<i64: 32, 32>}, {pipeline_mode = #tpu.pipeline_mode<synchronous>, transform_indices = @transform_11, window_bounds = array<i64: 32, 32>}, {pipeline_mode = #tpu.pipeline_mode<synchronous>, transform_indices = @transform_12, window_bounds = array<i64: 8, 32>}, {transform_indices = @transform_13, window_bounds = array<i64: 1, 16, 32>}]} {
    %c0 = arith.constant 0 : index
    %c0_0 = arith.constant 0 : index
    %c0_1 = arith.constant 0 : index
    %0 = vector.load %arg1[%c0, %c0_0, %c0_1] : memref<1x16x32xf32, #tpu.memory_space<vmem>>, vector<1x16x32xf32>
    %c0_2 = arith.constant 0 : index
    %c0_3 = arith.constant 0 : index
    %c0_4 = arith.constant 0 : index
    %1 = vector.load %arg2[%c0_2, %c0_3, %c0_4] : memref<1x16x32xf32, #tpu.memory_space<vmem>>, vector<1x16x32xf32>
    %c0_5 = arith.constant 0 : index
    %c0_6 = arith.constant 0 : index
    %2 = vector.load %arg13[%c0_5, %c0_6] : memref<8x32xf32, #tpu.memory_space<vmem>>, vector<8x32xf32>
    %3 = vector.extract_strided_slice %2 {offsets = [0, 0], sizes = [1, 32], strides = [1, 1]} : vector<8x32xf32> to vector<1x32xf32>
    %4 = vector.extract_strided_slice %2 {offsets = [1, 0], sizes = [1, 32], strides = [1, 1]} : vector<8x32xf32> to vector<1x32xf32>
    %5 = vector.extract_strided_slice %2 {offsets = [2, 0], sizes = [1, 32], strides = [1, 1]} : vector<8x32xf32> to vector<1x32xf32>
    %6 = vector.extract_strided_slice %2 {offsets = [3, 0], sizes = [1, 32], strides = [1, 1]} : vector<8x32xf32> to vector<1x32xf32>
    %7 = vector.extract_strided_slice %2 {offsets = [4, 0], sizes = [1, 32], strides = [1, 1]} : vector<8x32xf32> to vector<1x32xf32>
    %8 = vector.extract_strided_slice %2 {offsets = [5, 0], sizes = [1, 32], strides = [1, 1]} : vector<8x32xf32> to vector<1x32xf32>
    %9 = vector.extract_strided_slice %2 {offsets = [6, 0], sizes = [1, 32], strides = [1, 1]} : vector<8x32xf32> to vector<1x32xf32>
    %10 = vector.extract_strided_slice %2 {offsets = [7, 0], sizes = [1, 32], strides = [1, 1]} : vector<8x32xf32> to vector<1x32xf32>
    %11 = vector.shape_cast %0 : vector<1x16x32xf32> to vector<16x32xf32>
    %c0_7 = arith.constant 0 : index
    %c0_8 = arith.constant 0 : index
    %12 = vector.load %arg3[%c0_7, %c0_8] : memref<32x32xf32, #tpu.memory_space<vmem>>, vector<32x32xf32>
    %c0_9 = arith.constant 0 : index
    %c0_10 = arith.constant 0 : index
    %13 = vector.load %arg4[%c0_9, %c0_10] : memref<32x32xf32, #tpu.memory_space<vmem>>, vector<32x32xf32>
    %c0_11 = arith.constant 0 : index
    %c0_12 = arith.constant 0 : index
    %14 = vector.load %arg5[%c0_11, %c0_12] : memref<32x64xf32, #tpu.memory_space<vmem>>, vector<32x64xf32>
    %c0_13 = arith.constant 0 : index
    %c0_14 = arith.constant 0 : index
    %15 = vector.load %arg6[%c0_13, %c0_14] : memref<64x32xf32, #tpu.memory_space<vmem>>, vector<64x32xf32>
    %16 = vector.shape_cast %0 : vector<1x16x32xf32> to vector<16x32xf32>
    %cst = arith.constant dense<0.000000e+00> : vector<16x32xf32>
    %17 = tpu.matmul %16, %13, %cst {dimension_numbers = #tpu.dot_dimension_numbers<[1], [0], [0], [1], [0, 0, 1, 1], [], []>} : vector<16x32xf32>, vector<32x32xf32>, vector<16x32xf32> -> vector<16x32xf32>
    %18 = vector.shape_cast %17 : vector<16x32xf32> to vector<1x16x32xf32>
    %cst_15 = arith.constant dense<0.000000e+00> : vector<16x64xf32>
    %19 = tpu.matmul %16, %14, %cst_15 {dimension_numbers = #tpu.dot_dimension_numbers<[1], [0], [0], [1], [0, 0, 1, 1], [], []>} : vector<16x32xf32>, vector<32x64xf32>, vector<16x64xf32> -> vector<16x64xf32>
    %20 = vector.shape_cast %19 : vector<16x64xf32> to vector<1x16x64xf32>
    %21 = vector.extract_strided_slice %18 {offsets = [0, 0, 0], sizes = [1, 16, 16], strides = [1, 1, 1]} : vector<1x16x32xf32> to vector<1x16x16xf32>
    %22 = vector.extract_strided_slice %18 {offsets = [0, 0, 16], sizes = [1, 16, 16], strides = [1, 1, 1]} : vector<1x16x32xf32> to vector<1x16x16xf32>
    %23 = vector.extract_strided_slice %20 {offsets = [0, 0, 0], sizes = [1, 16, 32], strides = [1, 1, 1]} : vector<1x16x64xf32> to vector<1x16x32xf32>
    %24 = vector.extract_strided_slice %20 {offsets = [0, 0, 32], sizes = [1, 16, 32], strides = [1, 1, 1]} : vector<1x16x64xf32> to vector<1x16x32xf32>
    %25 = vector.extract_strided_slice %15 {offsets = [0, 0], sizes = [32, 32], strides = [1, 1]} : vector<64x32xf32> to vector<32x32xf32>
    %26 = vector.extract_strided_slice %15 {offsets = [32, 0], sizes = [32, 32], strides = [1, 1]} : vector<64x32xf32> to vector<32x32xf32>
    %27 = vector.extract_strided_slice %0 {offsets = [0, 0, 0], sizes = [1, 8, 32], strides = [1, 1, 1]} : vector<1x16x32xf32> to vector<1x8x32xf32>
    %28 = vector.shape_cast %27 : vector<1x8x32xf32> to vector<8x32xf32>
    %cst_16 = arith.constant dense<0.000000e+00> : vector<8x32xf32>
    %29 = tpu.matmul %28, %12, %cst_16 {dimension_numbers = #tpu.dot_dimension_numbers<[1], [0], [0], [1], [0, 0, 1, 1], [], []>} : vector<8x32xf32>, vector<32x32xf32>, vector<8x32xf32> -> vector<8x32xf32>
    %30 = vector.shape_cast %29 : vector<8x32xf32> to vector<1x8x32xf32>
    %cst_17 = arith.constant 0.000000e+00 : f32
    %31 = vector.broadcast %cst_17 : f32 to vector<8x32xf32>
    %32 = vector.extract_strided_slice %30 {offsets = [0, 0, 0], sizes = [1, 8, 16], strides = [1, 1, 1]} : vector<1x8x32xf32> to vector<1x8x16xf32>
    "tpu.trace_start"() <{level = 10 : i32, message = "bqa,bka->bqk"}> : () -> ()
    %cst_18 = arith.constant dense<0.000000e+00> : vector<1x8x16xf32>
    %33 = tpu.matmul %32, %21, %cst_18 {dimension_numbers = #tpu.dot_dimension_numbers<[2], [2], [1], [1], [0, 0, 0, 1, 1, 1], [0], [0]>} : vector<1x8x16xf32>, vector<1x16x16xf32>, vector<1x8x16xf32> -> vector<1x8x16xf32>
    "tpu.trace_stop"() : () -> ()
    %cst_19 = arith.constant dense<0xFF800000> : vector<1x8xf32>
    %34 = vector.multi_reduction <maximumf>, %33, %cst_19 [2] : vector<1x8x16xf32> to vector<1x8xf32>
    %35 = vector.shape_cast %34 : vector<1x8xf32> to vector<1x8x1xf32>
    %36 = vector.broadcast %35 : vector<1x8x1xf32> to vector<1x8x16xf32>
    %37 = arith.subf %33, %36 : vector<1x8x16xf32>
    %38 = math.exp %37 : vector<1x8x16xf32>
    %cst_20 = arith.constant dense<0.000000e+00> : vector<1x8xf32>
    %39 = vector.multi_reduction <add>, %38, %cst_20 [2] : vector<1x8x16xf32> to vector<1x8xf32>
    %40 = vector.shape_cast %39 : vector<1x8xf32> to vector<1x8x1xf32>
    %41 = tpu.reciprocal %40 : vector<1x8x1xf32> -> vector<1x8x1xf32>
    %42 = vector.broadcast %41 : vector<1x8x1xf32> to vector<1x8x16xf32>
    %43 = arith.mulf %38, %42 : vector<1x8x16xf32>
    "tpu.trace_start"() <{level = 10 : i32, message = "bqk,bkd->bqd"}> : () -> ()
    %cst_21 = arith.constant dense<0.000000e+00> : vector<1x8x32xf32>
    %44 = tpu.matmul %43, %23, %cst_21 {dimension_numbers = #tpu.dot_dimension_numbers<[2], [1], [1], [2], [0, 0, 0, 1, 1, 2], [0], [0]>} : vector<1x8x16xf32>, vector<1x16x32xf32>, vector<1x8x32xf32> -> vector<1x8x32xf32>
    "tpu.trace_stop"() : () -> ()
    %45 = vector.shape_cast %44 : vector<1x8x32xf32> to vector<8x32xf32>
    %cst_22 = arith.constant dense<0.000000e+00> : vector<8x32xf32>
    %46 = tpu.matmul %45, %25, %cst_22 {dimension_numbers = #tpu.dot_dimension_numbers<[1], [0], [0], [1], [0, 0, 1, 1], [], []>} : vector<8x32xf32>, vector<32x32xf32>, vector<8x32xf32> -> vector<8x32xf32>
    %47 = arith.addf %31, %46 : vector<8x32xf32>
    %48 = vector.extract_strided_slice %30 {offsets = [0, 0, 16], sizes = [1, 8, 16], strides = [1, 1, 1]} : vector<1x8x32xf32> to vector<1x8x16xf32>
    "tpu.trace_start"() <{level = 10 : i32, message = "bqa,bka->bqk"}> : () -> ()
    %cst_23 = arith.constant dense<0.000000e+00> : vector<1x8x16xf32>
    %49 = tpu.matmul %48, %22, %cst_23 {dimension_numbers = #tpu.dot_dimension_numbers<[2], [2], [1], [1], [0, 0, 0, 1, 1, 1], [0], [0]>} : vector<1x8x16xf32>, vector<1x16x16xf32>, vector<1x8x16xf32> -> vector<1x8x16xf32>
    "tpu.trace_stop"() : () -> ()
    %cst_24 = arith.constant dense<0xFF800000> : vector<1x8xf32>
    %50 = vector.multi_reduction <maximumf>, %49, %cst_24 [2] : vector<1x8x16xf32> to vector<1x8xf32>
    %51 = vector.shape_cast %50 : vector<1x8xf32> to vector<1x8x1xf32>
    %52 = vector.broadcast %51 : vector<1x8x1xf32> to vector<1x8x16xf32>
    %53 = arith.subf %49, %52 : vector<1x8x16xf32>
    %54 = math.exp %53 : vector<1x8x16xf32>
    %cst_25 = arith.constant dense<0.000000e+00> : vector<1x8xf32>
    %55 = vector.multi_reduction <add>, %54, %cst_25 [2] : vector<1x8x16xf32> to vector<1x8xf32>
    %56 = vector.shape_cast %55 : vector<1x8xf32> to vector<1x8x1xf32>
    %57 = tpu.reciprocal %56 : vector<1x8x1xf32> -> vector<1x8x1xf32>
    %58 = vector.broadcast %57 : vector<1x8x1xf32> to vector<1x8x16xf32>
    %59 = arith.mulf %54, %58 : vector<1x8x16xf32>
    "tpu.trace_start"() <{level = 10 : i32, message = "bqk,bkd->bqd"}> : () -> ()
    %cst_26 = arith.constant dense<0.000000e+00> : vector<1x8x32xf32>
    %60 = tpu.matmul %59, %24, %cst_26 {dimension_numbers = #tpu.dot_dimension_numbers<[2], [1], [1], [2], [0, 0, 0, 1, 1, 2], [0], [0]>} : vector<1x8x16xf32>, vector<1x16x32xf32>, vector<1x8x32xf32> -> vector<1x8x32xf32>
    "tpu.trace_stop"() : () -> ()
    %61 = vector.shape_cast %60 : vector<1x8x32xf32> to vector<8x32xf32>
    %cst_27 = arith.constant dense<0.000000e+00> : vector<8x32xf32>
    %62 = tpu.matmul %61, %26, %cst_27 {dimension_numbers = #tpu.dot_dimension_numbers<[1], [0], [0], [1], [0, 0, 1, 1], [], []>} : vector<8x32xf32>, vector<32x32xf32>, vector<8x32xf32> -> vector<8x32xf32>
    %63 = arith.addf %47, %62 : vector<8x32xf32>
    %64 = vector.shape_cast %63 : vector<8x32xf32> to vector<1x8x32xf32>
    %65 = vector.extract_strided_slice %0 {offsets = [0, 8, 0], sizes = [1, 8, 32], strides = [1, 1, 1]} : vector<1x16x32xf32> to vector<1x8x32xf32>
    %66 = vector.shape_cast %65 : vector<1x8x32xf32> to vector<8x32xf32>
    %cst_28 = arith.constant dense<0.000000e+00> : vector<8x32xf32>
    %67 = tpu.matmul %66, %12, %cst_28 {dimension_numbers = #tpu.dot_dimension_numbers<[1], [0], [0], [1], [0, 0, 1, 1], [], []>} : vector<8x32xf32>, vector<32x32xf32>, vector<8x32xf32> -> vector<8x32xf32>
    %68 = vector.shape_cast %67 : vector<8x32xf32> to vector<1x8x32xf32>
    %cst_29 = arith.constant 0.000000e+00 : f32
    %69 = vector.broadcast %cst_29 : f32 to vector<8x32xf32>
    %70 = vector.extract_strided_slice %68 {offsets = [0, 0, 0], sizes = [1, 8, 16], strides = [1, 1, 1]} : vector<1x8x32xf32> to vector<1x8x16xf32>
    "tpu.trace_start"() <{level = 10 : i32, message = "bqa,bka->bqk"}> : () -> ()
    %cst_30 = arith.constant dense<0.000000e+00> : vector<1x8x16xf32>
    %71 = tpu.matmul %70, %21, %cst_30 {dimension_numbers = #tpu.dot_dimension_numbers<[2], [2], [1], [1], [0, 0, 0, 1, 1, 1], [0], [0]>} : vector<1x8x16xf32>, vector<1x16x16xf32>, vector<1x8x16xf32> -> vector<1x8x16xf32>
    "tpu.trace_stop"() : () -> ()
    %cst_31 = arith.constant dense<0xFF800000> : vector<1x8xf32>
    %72 = vector.multi_reduction <maximumf>, %71, %cst_31 [2] : vector<1x8x16xf32> to vector<1x8xf32>
    %73 = vector.shape_cast %72 : vector<1x8xf32> to vector<1x8x1xf32>
    %74 = vector.broadcast %73 : vector<1x8x1xf32> to vector<1x8x16xf32>
    %75 = arith.subf %71, %74 : vector<1x8x16xf32>
    %76 = math.exp %75 : vector<1x8x16xf32>
    %cst_32 = arith.constant dense<0.000000e+00> : vector<1x8xf32>
    %77 = vector.multi_reduction <add>, %76, %cst_32 [2] : vector<1x8x16xf32> to vector<1x8xf32>
    %78 = vector.shape_cast %77 : vector<1x8xf32> to vector<1x8x1xf32>
    %79 = tpu.reciprocal %78 : vector<1x8x1xf32> -> vector<1x8x1xf32>
    %80 = vector.broadcast %79 : vector<1x8x1xf32> to vector<1x8x16xf32>
    %81 = arith.mulf %76, %80 : vector<1x8x16xf32>
    "tpu.trace_start"() <{level = 10 : i32, message = "bqk,bkd->bqd"}> : () -> ()
    %cst_33 = arith.constant dense<0.000000e+00> : vector<1x8x32xf32>
    %82 = tpu.matmul %81, %23, %cst_33 {dimension_numbers = #tpu.dot_dimension_numbers<[2], [1], [1], [2], [0, 0, 0, 1, 1, 2], [0], [0]>} : vector<1x8x16xf32>, vector<1x16x32xf32>, vector<1x8x32xf32> -> vector<1x8x32xf32>
    "tpu.trace_stop"() : () -> ()
    %83 = vector.shape_cast %82 : vector<1x8x32xf32> to vector<8x32xf32>
    %cst_34 = arith.constant dense<0.000000e+00> : vector<8x32xf32>
    %84 = tpu.matmul %83, %25, %cst_34 {dimension_numbers = #tpu.dot_dimension_numbers<[1], [0], [0], [1], [0, 0, 1, 1], [], []>} : vector<8x32xf32>, vector<32x32xf32>, vector<8x32xf32> -> vector<8x32xf32>
    %85 = arith.addf %69, %84 : vector<8x32xf32>
    %86 = vector.extract_strided_slice %68 {offsets = [0, 0, 16], sizes = [1, 8, 16], strides = [1, 1, 1]} : vector<1x8x32xf32> to vector<1x8x16xf32>
    "tpu.trace_start"() <{level = 10 : i32, message = "bqa,bka->bqk"}> : () -> ()
    %cst_35 = arith.constant dense<0.000000e+00> : vector<1x8x16xf32>
    %87 = tpu.matmul %86, %22, %cst_35 {dimension_numbers = #tpu.dot_dimension_numbers<[2], [2], [1], [1], [0, 0, 0, 1, 1, 1], [0], [0]>} : vector<1x8x16xf32>, vector<1x16x16xf32>, vector<1x8x16xf32> -> vector<1x8x16xf32>
    "tpu.trace_stop"() : () -> ()
    %cst_36 = arith.constant dense<0xFF800000> : vector<1x8xf32>
    %88 = vector.multi_reduction <maximumf>, %87, %cst_36 [2] : vector<1x8x16xf32> to vector<1x8xf32>
    %89 = vector.shape_cast %88 : vector<1x8xf32> to vector<1x8x1xf32>
    %90 = vector.broadcast %89 : vector<1x8x1xf32> to vector<1x8x16xf32>
    %91 = arith.subf %87, %90 : vector<1x8x16xf32>
    %92 = math.exp %91 : vector<1x8x16xf32>
    %cst_37 = arith.constant dense<0.000000e+00> : vector<1x8xf32>
    %93 = vector.multi_reduction <add>, %92, %cst_37 [2] : vector<1x8x16xf32> to vector<1x8xf32>
    %94 = vector.shape_cast %93 : vector<1x8xf32> to vector<1x8x1xf32>
    %95 = tpu.reciprocal %94 : vector<1x8x1xf32> -> vector<1x8x1xf32>
    %96 = vector.broadcast %95 : vector<1x8x1xf32> to vector<1x8x16xf32>
    %97 = arith.mulf %92, %96 : vector<1x8x16xf32>
    "tpu.trace_start"() <{level = 10 : i32, message = "bqk,bkd->bqd"}> : () -> ()
    %cst_38 = arith.constant dense<0.000000e+00> : vector<1x8x32xf32>
    %98 = tpu.matmul %97, %24, %cst_38 {dimension_numbers = #tpu.dot_dimension_numbers<[2], [1], [1], [2], [0, 0, 0, 1, 1, 2], [0], [0]>} : vector<1x8x16xf32>, vector<1x16x32xf32>, vector<1x8x32xf32> -> vector<1x8x32xf32>
    "tpu.trace_stop"() : () -> ()
    %99 = vector.shape_cast %98 : vector<1x8x32xf32> to vector<8x32xf32>
    %cst_39 = arith.constant dense<0.000000e+00> : vector<8x32xf32>
    %100 = tpu.matmul %99, %26, %cst_39 {dimension_numbers = #tpu.dot_dimension_numbers<[1], [0], [0], [1], [0, 0, 1, 1], [], []>} : vector<8x32xf32>, vector<32x32xf32>, vector<8x32xf32> -> vector<8x32xf32>
    %101 = arith.addf %85, %100 : vector<8x32xf32>
    %102 = vector.shape_cast %101 : vector<8x32xf32> to vector<1x8x32xf32>
    %103 = tpu.concatenate %64, %102 in 1 : vector<1x8x32xf32>, vector<1x8x32xf32> -> vector<1x16x32xf32>
    %104 = vector.shape_cast %103 : vector<1x16x32xf32> to vector<16x32xf32>
    %105 = arith.addf %104, %11 : vector<16x32xf32>
    %cst_40 = arith.constant dense<0.000000e+00> : vector<16xf32>
    %106 = vector.multi_reduction <add>, %105, %cst_40 [1] : vector<16x32xf32> to vector<16xf32>
    %107 = vector.shape_cast %106 : vector<16xf32> to vector<16x1xf32>
    %cst_41 = arith.constant 3.200000e+01 : f32
    %108 = vector.broadcast %cst_41 : f32 to vector<16x1xf32>
    %109 = arith.divf %107, %108 : vector<16x1xf32>
    %110 = vector.broadcast %109 : vector<16x1xf32> to vector<16x32xf32>
    %111 = arith.subf %105, %110 : vector<16x32xf32>
    %112 = arith.mulf %111, %111 : vector<16x32xf32>
    %cst_42 = arith.constant dense<0.000000e+00> : vector<16xf32>
    %113 = vector.multi_reduction <add>, %112, %cst_42 [1] : vector<16x32xf32> to vector<16xf32>
    %114 = vector.shape_cast %113 : vector<16xf32> to vector<16x1xf32>
    %cst_43 = arith.constant 3.200000e+01 : f32
    %115 = vector.broadcast %cst_43 : f32 to vector<16x1xf32>
    %116 = arith.divf %114, %115 : vector<16x1xf32>
    %117 = vector.broadcast %109 : vector<16x1xf32> to vector<16x32xf32>
    %118 = arith.subf %105, %117 : vector<16x32xf32>
    %cst_44 = arith.constant 9.99999974E-6 : f32
    %119 = vector.broadcast %cst_44 : f32 to vector<16x1xf32>
    %120 = arith.addf %116, %119 : vector<16x1xf32>
    %121 = math.rsqrt %120 : vector<16x1xf32>
    %122 = vector.broadcast %121 : vector<16x1xf32> to vector<16x32xf32>
    %123 = arith.mulf %118, %122 : vector<16x32xf32>
    %124 = vector.broadcast %5 : vector<1x32xf32> to vector<16x32xf32>
    %125 = arith.mulf %123, %124 : vector<16x32xf32>
    %126 = vector.broadcast %6 : vector<1x32xf32> to vector<16x32xf32>
    %127 = arith.addf %125, %126 : vector<16x32xf32>
    %128 = vector.shape_cast %127 : vector<16x32xf32> to vector<1x16x32xf32>
    %c0_45 = arith.constant 0 : index
    %c0_46 = arith.constant 0 : index
    %129 = vector.load %arg7[%c0_45, %c0_46] : memref<32x32xf32, #tpu.memory_space<vmem>>, vector<32x32xf32>
    %c0_47 = arith.constant 0 : index
    %c0_48 = arith.constant 0 : index
    %130 = vector.load %arg8[%c0_47, %c0_48] : memref<32x32xf32, #tpu.memory_space<vmem>>, vector<32x32xf32>
    %c0_49 = arith.constant 0 : index
    %c0_50 = arith.constant 0 : index
    %131 = vector.load %arg9[%c0_49, %c0_50] : memref<32x64xf32, #tpu.memory_space<vmem>>, vector<32x64xf32>
    %c0_51 = arith.constant 0 : index
    %c0_52 = arith.constant 0 : index
    %132 = vector.load %arg10[%c0_51, %c0_52] : memref<64x32xf32, #tpu.memory_space<vmem>>, vector<64x32xf32>
    %133 = vector.shape_cast %1 : vector<1x16x32xf32> to vector<16x32xf32>
    %cst_53 = arith.constant dense<0.000000e+00> : vector<16x32xf32>
    %134 = tpu.matmul %133, %130, %cst_53 {dimension_numbers = #tpu.dot_dimension_numbers<[1], [0], [0], [1], [0, 0, 1, 1], [], []>} : vector<16x32xf32>, vector<32x32xf32>, vector<16x32xf32> -> vector<16x32xf32>
    %135 = vector.shape_cast %134 : vector<16x32xf32> to vector<1x16x32xf32>
    %cst_54 = arith.constant dense<0.000000e+00> : vector<16x64xf32>
    %136 = tpu.matmul %133, %131, %cst_54 {dimension_numbers = #tpu.dot_dimension_numbers<[1], [0], [0], [1], [0, 0, 1, 1], [], []>} : vector<16x32xf32>, vector<32x64xf32>, vector<16x64xf32> -> vector<16x64xf32>
    %137 = vector.shape_cast %136 : vector<16x64xf32> to vector<1x16x64xf32>
    %138 = vector.extract_strided_slice %135 {offsets = [0, 0, 0], sizes = [1, 16, 16], strides = [1, 1, 1]} : vector<1x16x32xf32> to vector<1x16x16xf32>
    %139 = vector.extract_strided_slice %135 {offsets = [0, 0, 16], sizes = [1, 16, 16], strides = [1, 1, 1]} : vector<1x16x32xf32> to vector<1x16x16xf32>
    %140 = vector.extract_strided_slice %137 {offsets = [0, 0, 0], sizes = [1, 16, 32], strides = [1, 1, 1]} : vector<1x16x64xf32> to vector<1x16x32xf32>
    %141 = vector.extract_strided_slice %137 {offsets = [0, 0, 32], sizes = [1, 16, 32], strides = [1, 1, 1]} : vector<1x16x64xf32> to vector<1x16x32xf32>
    %142 = vector.extract_strided_slice %132 {offsets = [0, 0], sizes = [32, 32], strides = [1, 1]} : vector<64x32xf32> to vector<32x32xf32>
    %143 = vector.extract_strided_slice %132 {offsets = [32, 0], sizes = [32, 32], strides = [1, 1]} : vector<64x32xf32> to vector<32x32xf32>
    %144 = vector.extract_strided_slice %128 {offsets = [0, 0, 0], sizes = [1, 8, 32], strides = [1, 1, 1]} : vector<1x16x32xf32> to vector<1x8x32xf32>
    %145 = vector.shape_cast %144 : vector<1x8x32xf32> to vector<8x32xf32>
    %cst_55 = arith.constant dense<0.000000e+00> : vector<8x32xf32>
    %146 = tpu.matmul %145, %129, %cst_55 {dimension_numbers = #tpu.dot_dimension_numbers<[1], [0], [0], [1], [0, 0, 1, 1], [], []>} : vector<8x32xf32>, vector<32x32xf32>, vector<8x32xf32> -> vector<8x32xf32>
    %147 = vector.shape_cast %146 : vector<8x32xf32> to vector<1x8x32xf32>
    %cst_56 = arith.constant 0.000000e+00 : f32
    %148 = vector.broadcast %cst_56 : f32 to vector<8x32xf32>
    %149 = vector.extract_strided_slice %147 {offsets = [0, 0, 0], sizes = [1, 8, 16], strides = [1, 1, 1]} : vector<1x8x32xf32> to vector<1x8x16xf32>
    "tpu.trace_start"() <{level = 10 : i32, message = "bqa,bka->bqk"}> : () -> ()
    %cst_57 = arith.constant dense<0.000000e+00> : vector<1x8x16xf32>
    %150 = tpu.matmul %149, %138, %cst_57 {dimension_numbers = #tpu.dot_dimension_numbers<[2], [2], [1], [1], [0, 0, 0, 1, 1, 1], [0], [0]>} : vector<1x8x16xf32>, vector<1x16x16xf32>, vector<1x8x16xf32> -> vector<1x8x16xf32>
    "tpu.trace_stop"() : () -> ()
    %cst_58 = arith.constant dense<0xFF800000> : vector<1x8xf32>
    %151 = vector.multi_reduction <maximumf>, %150, %cst_58 [2] : vector<1x8x16xf32> to vector<1x8xf32>
    %152 = vector.shape_cast %151 : vector<1x8xf32> to vector<1x8x1xf32>
    %153 = vector.broadcast %152 : vector<1x8x1xf32> to vector<1x8x16xf32>
    %154 = arith.subf %150, %153 : vector<1x8x16xf32>
    %155 = math.exp %154 : vector<1x8x16xf32>
    %cst_59 = arith.constant dense<0.000000e+00> : vector<1x8xf32>
    %156 = vector.multi_reduction <add>, %155, %cst_59 [2] : vector<1x8x16xf32> to vector<1x8xf32>
    %157 = vector.shape_cast %156 : vector<1x8xf32> to vector<1x8x1xf32>
    %158 = tpu.reciprocal %157 : vector<1x8x1xf32> -> vector<1x8x1xf32>
    %159 = vector.broadcast %158 : vector<1x8x1xf32> to vector<1x8x16xf32>
    %160 = arith.mulf %155, %159 : vector<1x8x16xf32>
    "tpu.trace_start"() <{level = 10 : i32, message = "bqk,bkd->bqd"}> : () -> ()
    %cst_60 = arith.constant dense<0.000000e+00> : vector<1x8x32xf32>
    %161 = tpu.matmul %160, %140, %cst_60 {dimension_numbers = #tpu.dot_dimension_numbers<[2], [1], [1], [2], [0, 0, 0, 1, 1, 2], [0], [0]>} : vector<1x8x16xf32>, vector<1x16x32xf32>, vector<1x8x32xf32> -> vector<1x8x32xf32>
    "tpu.trace_stop"() : () -> ()
    %162 = vector.shape_cast %161 : vector<1x8x32xf32> to vector<8x32xf32>
    %cst_61 = arith.constant dense<0.000000e+00> : vector<8x32xf32>
    %163 = tpu.matmul %162, %142, %cst_61 {dimension_numbers = #tpu.dot_dimension_numbers<[1], [0], [0], [1], [0, 0, 1, 1], [], []>} : vector<8x32xf32>, vector<32x32xf32>, vector<8x32xf32> -> vector<8x32xf32>
    %164 = arith.addf %148, %163 : vector<8x32xf32>
    %165 = vector.extract_strided_slice %147 {offsets = [0, 0, 16], sizes = [1, 8, 16], strides = [1, 1, 1]} : vector<1x8x32xf32> to vector<1x8x16xf32>
    "tpu.trace_start"() <{level = 10 : i32, message = "bqa,bka->bqk"}> : () -> ()
    %cst_62 = arith.constant dense<0.000000e+00> : vector<1x8x16xf32>
    %166 = tpu.matmul %165, %139, %cst_62 {dimension_numbers = #tpu.dot_dimension_numbers<[2], [2], [1], [1], [0, 0, 0, 1, 1, 1], [0], [0]>} : vector<1x8x16xf32>, vector<1x16x16xf32>, vector<1x8x16xf32> -> vector<1x8x16xf32>
    "tpu.trace_stop"() : () -> ()
    %cst_63 = arith.constant dense<0xFF800000> : vector<1x8xf32>
    %167 = vector.multi_reduction <maximumf>, %166, %cst_63 [2] : vector<1x8x16xf32> to vector<1x8xf32>
    %168 = vector.shape_cast %167 : vector<1x8xf32> to vector<1x8x1xf32>
    %169 = vector.broadcast %168 : vector<1x8x1xf32> to vector<1x8x16xf32>
    %170 = arith.subf %166, %169 : vector<1x8x16xf32>
    %171 = math.exp %170 : vector<1x8x16xf32>
    %cst_64 = arith.constant dense<0.000000e+00> : vector<1x8xf32>
    %172 = vector.multi_reduction <add>, %171, %cst_64 [2] : vector<1x8x16xf32> to vector<1x8xf32>
    %173 = vector.shape_cast %172 : vector<1x8xf32> to vector<1x8x1xf32>
    %174 = tpu.reciprocal %173 : vector<1x8x1xf32> -> vector<1x8x1xf32>
    %175 = vector.broadcast %174 : vector<1x8x1xf32> to vector<1x8x16xf32>
    %176 = arith.mulf %171, %175 : vector<1x8x16xf32>
    "tpu.trace_start"() <{level = 10 : i32, message = "bqk,bkd->bqd"}> : () -> ()
    %cst_65 = arith.constant dense<0.000000e+00> : vector<1x8x32xf32>
    %177 = tpu.matmul %176, %141, %cst_65 {dimension_numbers = #tpu.dot_dimension_numbers<[2], [1], [1], [2], [0, 0, 0, 1, 1, 2], [0], [0]>} : vector<1x8x16xf32>, vector<1x16x32xf32>, vector<1x8x32xf32> -> vector<1x8x32xf32>
    "tpu.trace_stop"() : () -> ()
    %178 = vector.shape_cast %177 : vector<1x8x32xf32> to vector<8x32xf32>
    %cst_66 = arith.constant dense<0.000000e+00> : vector<8x32xf32>
    %179 = tpu.matmul %178, %143, %cst_66 {dimension_numbers = #tpu.dot_dimension_numbers<[1], [0], [0], [1], [0, 0, 1, 1], [], []>} : vector<8x32xf32>, vector<32x32xf32>, vector<8x32xf32> -> vector<8x32xf32>
    %180 = arith.addf %164, %179 : vector<8x32xf32>
    %181 = vector.shape_cast %180 : vector<8x32xf32> to vector<1x8x32xf32>
    %182 = vector.extract_strided_slice %128 {offsets = [0, 8, 0], sizes = [1, 8, 32], strides = [1, 1, 1]} : vector<1x16x32xf32> to vector<1x8x32xf32>
    %183 = vector.shape_cast %182 : vector<1x8x32xf32> to vector<8x32xf32>
    %cst_67 = arith.constant dense<0.000000e+00> : vector<8x32xf32>
    %184 = tpu.matmul %183, %129, %cst_67 {dimension_numbers = #tpu.dot_dimension_numbers<[1], [0], [0], [1], [0, 0, 1, 1], [], []>} : vector<8x32xf32>, vector<32x32xf32>, vector<8x32xf32> -> vector<8x32xf32>
    %185 = vector.shape_cast %184 : vector<8x32xf32> to vector<1x8x32xf32>
    %cst_68 = arith.constant 0.000000e+00 : f32
    %186 = vector.broadcast %cst_68 : f32 to vector<8x32xf32>
    %187 = vector.extract_strided_slice %185 {offsets = [0, 0, 0], sizes = [1, 8, 16], strides = [1, 1, 1]} : vector<1x8x32xf32> to vector<1x8x16xf32>
    "tpu.trace_start"() <{level = 10 : i32, message = "bqa,bka->bqk"}> : () -> ()
    %cst_69 = arith.constant dense<0.000000e+00> : vector<1x8x16xf32>
    %188 = tpu.matmul %187, %138, %cst_69 {dimension_numbers = #tpu.dot_dimension_numbers<[2], [2], [1], [1], [0, 0, 0, 1, 1, 1], [0], [0]>} : vector<1x8x16xf32>, vector<1x16x16xf32>, vector<1x8x16xf32> -> vector<1x8x16xf32>
    "tpu.trace_stop"() : () -> ()
    %cst_70 = arith.constant dense<0xFF800000> : vector<1x8xf32>
    %189 = vector.multi_reduction <maximumf>, %188, %cst_70 [2] : vector<1x8x16xf32> to vector<1x8xf32>
    %190 = vector.shape_cast %189 : vector<1x8xf32> to vector<1x8x1xf32>
    %191 = vector.broadcast %190 : vector<1x8x1xf32> to vector<1x8x16xf32>
    %192 = arith.subf %188, %191 : vector<1x8x16xf32>
    %193 = math.exp %192 : vector<1x8x16xf32>
    %cst_71 = arith.constant dense<0.000000e+00> : vector<1x8xf32>
    %194 = vector.multi_reduction <add>, %193, %cst_71 [2] : vector<1x8x16xf32> to vector<1x8xf32>
    %195 = vector.shape_cast %194 : vector<1x8xf32> to vector<1x8x1xf32>
    %196 = tpu.reciprocal %195 : vector<1x8x1xf32> -> vector<1x8x1xf32>
    %197 = vector.broadcast %196 : vector<1x8x1xf32> to vector<1x8x16xf32>
    %198 = arith.mulf %193, %197 : vector<1x8x16xf32>
    "tpu.trace_start"() <{level = 10 : i32, message = "bqk,bkd->bqd"}> : () -> ()
    %cst_72 = arith.constant dense<0.000000e+00> : vector<1x8x32xf32>
    %199 = tpu.matmul %198, %140, %cst_72 {dimension_numbers = #tpu.dot_dimension_numbers<[2], [1], [1], [2], [0, 0, 0, 1, 1, 2], [0], [0]>} : vector<1x8x16xf32>, vector<1x16x32xf32>, vector<1x8x32xf32> -> vector<1x8x32xf32>
    "tpu.trace_stop"() : () -> ()
    %200 = vector.shape_cast %199 : vector<1x8x32xf32> to vector<8x32xf32>
    %cst_73 = arith.constant dense<0.000000e+00> : vector<8x32xf32>
    %201 = tpu.matmul %200, %142, %cst_73 {dimension_numbers = #tpu.dot_dimension_numbers<[1], [0], [0], [1], [0, 0, 1, 1], [], []>} : vector<8x32xf32>, vector<32x32xf32>, vector<8x32xf32> -> vector<8x32xf32>
    %202 = arith.addf %186, %201 : vector<8x32xf32>
    %203 = vector.extract_strided_slice %185 {offsets = [0, 0, 16], sizes = [1, 8, 16], strides = [1, 1, 1]} : vector<1x8x32xf32> to vector<1x8x16xf32>
    "tpu.trace_start"() <{level = 10 : i32, message = "bqa,bka->bqk"}> : () -> ()
    %cst_74 = arith.constant dense<0.000000e+00> : vector<1x8x16xf32>
    %204 = tpu.matmul %203, %139, %cst_74 {dimension_numbers = #tpu.dot_dimension_numbers<[2], [2], [1], [1], [0, 0, 0, 1, 1, 1], [0], [0]>} : vector<1x8x16xf32>, vector<1x16x16xf32>, vector<1x8x16xf32> -> vector<1x8x16xf32>
    "tpu.trace_stop"() : () -> ()
    %cst_75 = arith.constant dense<0xFF800000> : vector<1x8xf32>
    %205 = vector.multi_reduction <maximumf>, %204, %cst_75 [2] : vector<1x8x16xf32> to vector<1x8xf32>
    %206 = vector.shape_cast %205 : vector<1x8xf32> to vector<1x8x1xf32>
    %207 = vector.broadcast %206 : vector<1x8x1xf32> to vector<1x8x16xf32>
    %208 = arith.subf %204, %207 : vector<1x8x16xf32>
    %209 = math.exp %208 : vector<1x8x16xf32>
    %cst_76 = arith.constant dense<0.000000e+00> : vector<1x8xf32>
    %210 = vector.multi_reduction <add>, %209, %cst_76 [2] : vector<1x8x16xf32> to vector<1x8xf32>
    %211 = vector.shape_cast %210 : vector<1x8xf32> to vector<1x8x1xf32>
    %212 = tpu.reciprocal %211 : vector<1x8x1xf32> -> vector<1x8x1xf32>
    %213 = vector.broadcast %212 : vector<1x8x1xf32> to vector<1x8x16xf32>
    %214 = arith.mulf %209, %213 : vector<1x8x16xf32>
    "tpu.trace_start"() <{level = 10 : i32, message = "bqk,bkd->bqd"}> : () -> ()
    %cst_77 = arith.constant dense<0.000000e+00> : vector<1x8x32xf32>
    %215 = tpu.matmul %214, %141, %cst_77 {dimension_numbers = #tpu.dot_dimension_numbers<[2], [1], [1], [2], [0, 0, 0, 1, 1, 2], [0], [0]>} : vector<1x8x16xf32>, vector<1x16x32xf32>, vector<1x8x32xf32> -> vector<1x8x32xf32>
    "tpu.trace_stop"() : () -> ()
    %216 = vector.shape_cast %215 : vector<1x8x32xf32> to vector<8x32xf32>
    %cst_78 = arith.constant dense<0.000000e+00> : vector<8x32xf32>
    %217 = tpu.matmul %216, %143, %cst_78 {dimension_numbers = #tpu.dot_dimension_numbers<[1], [0], [0], [1], [0, 0, 1, 1], [], []>} : vector<8x32xf32>, vector<32x32xf32>, vector<8x32xf32> -> vector<8x32xf32>
    %218 = arith.addf %202, %217 : vector<8x32xf32>
    %219 = vector.shape_cast %218 : vector<8x32xf32> to vector<1x8x32xf32>
    %220 = tpu.concatenate %181, %219 in 1 : vector<1x8x32xf32>, vector<1x8x32xf32> -> vector<1x16x32xf32>
    %221 = vector.shape_cast %220 : vector<1x16x32xf32> to vector<16x32xf32>
    %222 = arith.addf %221, %127 : vector<16x32xf32>
    %cst_79 = arith.constant dense<0.000000e+00> : vector<16xf32>
    %223 = vector.multi_reduction <add>, %222, %cst_79 [1] : vector<16x32xf32> to vector<16xf32>
    %224 = vector.shape_cast %223 : vector<16xf32> to vector<16x1xf32>
    %cst_80 = arith.constant 3.200000e+01 : f32
    %225 = vector.broadcast %cst_80 : f32 to vector<16x1xf32>
    %226 = arith.divf %224, %225 : vector<16x1xf32>
    %227 = vector.broadcast %226 : vector<16x1xf32> to vector<16x32xf32>
    %228 = arith.subf %222, %227 : vector<16x32xf32>
    %229 = arith.mulf %228, %228 : vector<16x32xf32>
    %cst_81 = arith.constant dense<0.000000e+00> : vector<16xf32>
    %230 = vector.multi_reduction <add>, %229, %cst_81 [1] : vector<16x32xf32> to vector<16xf32>
    %231 = vector.shape_cast %230 : vector<16xf32> to vector<16x1xf32>
    %cst_82 = arith.constant 3.200000e+01 : f32
    %232 = vector.broadcast %cst_82 : f32 to vector<16x1xf32>
    %233 = arith.divf %231, %232 : vector<16x1xf32>
    %234 = vector.broadcast %226 : vector<16x1xf32> to vector<16x32xf32>
    %235 = arith.subf %222, %234 : vector<16x32xf32>
    %cst_83 = arith.constant 9.99999974E-6 : f32
    %236 = vector.broadcast %cst_83 : f32 to vector<16x1xf32>
    %237 = arith.addf %233, %236 : vector<16x1xf32>
    %238 = math.rsqrt %237 : vector<16x1xf32>
    %239 = vector.broadcast %238 : vector<16x1xf32> to vector<16x32xf32>
    %240 = arith.mulf %235, %239 : vector<16x32xf32>
    %241 = vector.broadcast %7 : vector<1x32xf32> to vector<16x32xf32>
    %242 = arith.mulf %240, %241 : vector<16x32xf32>
    %243 = vector.broadcast %8 : vector<1x32xf32> to vector<16x32xf32>
    %244 = arith.addf %242, %243 : vector<16x32xf32>
    %c0_84 = arith.constant 0 : index
    %c0_85 = arith.constant 0 : index
    %245 = vector.load %arg11[%c0_84, %c0_85] : memref<32x32xf32, #tpu.memory_space<vmem>>, vector<32x32xf32>
    %c0_86 = arith.constant 0 : index
    %c0_87 = arith.constant 0 : index
    %246 = vector.load %arg12[%c0_86, %c0_87] : memref<32x32xf32, #tpu.memory_space<vmem>>, vector<32x32xf32>
    %cst_88 = arith.constant dense<0.000000e+00> : vector<16x32xf32>
    %247 = tpu.matmul %244, %246, %cst_88 {dimension_numbers = #tpu.dot_dimension_numbers<[1], [0], [0], [1], [0, 0, 1, 1], [], []>} : vector<16x32xf32>, vector<32x32xf32>, vector<16x32xf32> -> vector<16x32xf32>
    %248 = vector.broadcast %4 : vector<1x32xf32> to vector<16x32xf32>
    %249 = arith.addf %247, %248 : vector<16x32xf32>
    %cst_89 = arith.constant 0.000000e+00 : f32
    %250 = vector.broadcast %cst_89 : f32 to vector<16x32xf32>
    %251 = arith.maximumf %249, %250 : vector<16x32xf32>
    %cst_90 = arith.constant dense<0.000000e+00> : vector<16x32xf32>
    %252 = tpu.matmul %251, %245, %cst_90 {dimension_numbers = #tpu.dot_dimension_numbers<[1], [0], [0], [1], [0, 0, 1, 1], [], []>} : vector<16x32xf32>, vector<32x32xf32>, vector<16x32xf32> -> vector<16x32xf32>
    %253 = vector.broadcast %3 : vector<1x32xf32> to vector<16x32xf32>
    %254 = arith.addf %252, %253 : vector<16x32xf32>
    %255 = arith.addf %244, %254 : vector<16x32xf32>
    %cst_91 = arith.constant dense<0.000000e+00> : vector<16xf32>
    %256 = vector.multi_reduction <add>, %255, %cst_91 [1] : vector<16x32xf32> to vector<16xf32>
    %257 = vector.shape_cast %256 : vector<16xf32> to vector<16x1xf32>
    %cst_92 = arith.constant 3.200000e+01 : f32
    %258 = vector.broadcast %cst_92 : f32 to vector<16x1xf32>
    %259 = arith.divf %257, %258 : vector<16x1xf32>
    %260 = vector.broadcast %259 : vector<16x1xf32> to vector<16x32xf32>
    %261 = arith.subf %255, %260 : vector<16x32xf32>
    %262 = arith.mulf %261, %261 : vector<16x32xf32>
    %cst_93 = arith.constant dense<0.000000e+00> : vector<16xf32>
    %263 = vector.multi_reduction <add>, %262, %cst_93 [1] : vector<16x32xf32> to vector<16xf32>
    %264 = vector.shape_cast %263 : vector<16xf32> to vector<16x1xf32>
    %cst_94 = arith.constant 3.200000e+01 : f32
    %265 = vector.broadcast %cst_94 : f32 to vector<16x1xf32>
    %266 = arith.divf %264, %265 : vector<16x1xf32>
    %267 = vector.broadcast %259 : vector<16x1xf32> to vector<16x32xf32>
    %268 = arith.subf %255, %267 : vector<16x32xf32>
    %cst_95 = arith.constant 9.99999974E-6 : f32
    %269 = vector.broadcast %cst_95 : f32 to vector<16x1xf32>
    %270 = arith.addf %266, %269 : vector<16x1xf32>
    %271 = math.rsqrt %270 : vector<16x1xf32>
    %272 = vector.broadcast %271 : vector<16x1xf32> to vector<16x32xf32>
    %273 = arith.mulf %268, %272 : vector<16x32xf32>
    %274 = vector.broadcast %9 : vector<1x32xf32> to vector<16x32xf32>
    %275 = arith.mulf %273, %274 : vector<16x32xf32>
    %276 = vector.broadcast %10 : vector<1x32xf32> to vector<16x32xf32>
    %277 = arith.addf %275, %276 : vector<16x32xf32>
    %278 = vector.shape_cast %277 : vector<16x32xf32> to vector<1x16x32xf32>
    %c0_96 = arith.constant 0 : index
    %c0_97 = arith.constant 0 : index
    %c0_98 = arith.constant 0 : index
    %279 = vector.load %arg14[%c0_96, %c0_97, %c0_98] : memref<1x16x32xf32, #tpu.memory_space<vmem>>, vector<1x16x32xf32>
    tpu.vector_store %arg14[%c0_96, %c0_97, %c0_98], %278 {strides = array<i32>} : memref<1x16x32xf32, #tpu.memory_space<vmem>>, vector<1x16x32xf32>,
    return
  }
  func.func @transform_0(%arg0: i32) -> (i32, i32, i32) {
    %c0_i32 = arith.constant 0 : i32
    %c0_i32_0 = arith.constant 0 : i32
    %c0_i32_1 = arith.constant 0 : i32
    return %arg0, %c0_i32, %c0_i32_0 : i32, i32, i32
  }
  func.func @transform_1(%arg0: i32) -> (i32, i32, i32) {
    %c0_i32 = arith.constant 0 : i32
    %c0_i32_0 = arith.constant 0 : i32
    %c0_i32_1 = arith.constant 0 : i32
    return %arg0, %c0_i32, %c0_i32_0 : i32, i32, i32
  }
  func.func @transform_2(%arg0: i32) -> (i32, i32) {
    %c0_i32 = arith.constant 0 : i32
    %c0_i32_0 = arith.constant 0 : i32
    %c0_i32_1 = arith.constant 0 : i32
    return %c0_i32, %c0_i32_0 : i32, i32
  }
  func.func @transform_3(%arg0: i32) -> (i32, i32) {
    %c0_i32 = arith.constant 0 : i32
    %c0_i32_0 = arith.constant 0 : i32
    %c0_i32_1 = arith.constant 0 : i32
    return %c0_i32, %c0_i32_0 : i32, i32
  }
  func.func @transform_4(%arg0: i32) -> (i32, i32) {
    %c0_i32 = arith.constant 0 : i32
    %c0_i32_0 = arith.constant 0 : i32
    %c0_i32_1 = arith.constant 0 : i32
    return %c0_i32, %c0_i32_0 : i32, i32
  }
  func.func @transform_5(%arg0: i32) -> (i32, i32) {
    %c0_i32 = arith.constant 0 : i32
    %c0_i32_0 = arith.constant 0 : i32
    %c0_i32_1 = arith.constant 0 : i32
    return %c0_i32, %c0_i32_0 : i32, i32
  }
  func.func @transform_6(%arg0: i32) -> (i32, i32) {
    %c0_i32 = arith.constant 0 : i32
    %c0_i32_0 = arith.constant 0 : i32
    %c0_i32_1 = arith.constant 0 : i32
    return %c0_i32, %c0_i32_0 : i32, i32
  }
  func.func @transform_7(%arg0: i32) -> (i32, i32) {
    %c0_i32 = arith.constant 0 : i32
    %c0_i32_0 = arith.constant 0 : i32
    %c0_i32_1 = arith.constant 0 : i32
    return %c0_i32, %c0_i32_0 : i32, i32
  }
  func.func @transform_8(%arg0: i32) -> (i32, i32) {
    %c0_i32 = arith.constant 0 : i32
    %c0_i32_0 = arith.constant 0 : i32
    %c0_i32_1 = arith.constant 0 : i32
    return %c0_i32, %c0_i32_0 : i32, i32
  }
  func.func @transform_9(%arg0: i32) -> (i32, i32) {
    %c0_i32 = arith.constant 0 : i32
    %c0_i32_0 = arith.constant 0 : i32
    %c0_i32_1 = arith.constant 0 : i32
    return %c0_i32, %c0_i32_0 : i32, i32
  }
  func.func @transform_10(%arg0: i32) -> (i32, i32) {
    %c0_i32 = arith.constant 0 : i32
    %c0_i32_0 = arith.constant 0 : i32
    %c0_i32_1 = arith.constant 0 : i32
    return %c0_i32, %c0_i32_0 : i32, i32
  }
  func.func @transform_11(%arg0: i32) -> (i32, i32) {
    %c0_i32 = arith.constant 0 : i32
    %c0_i32_0 = arith.constant 0 : i32
    %c0_i32_1 = arith.constant 0 : i32
    return %c0_i32, %c0_i32_0 : i32, i32
  }
  func.func @transform_12(%arg0: i32) -> (i32, i32) {
    %c0_i32 = arith.constant 0 : i32
    %c0_i32_0 = arith.constant 0 : i32
    %c0_i32_1 = arith.constant 0 : i32
    return %c0_i32, %c0_i32_0 : i32, i32
  }
  func.func @transform_13(%arg0: i32) -> (i32, i32, i32) {
    %c0_i32 = arith.constant 0 : i32
    %c0_i32_0 = arith.constant 0 : i32
    %c0_i32_1 = arith.constant 0 : i32
    return %arg0, %c0_i32, %c0_i32_0 : i32, i32, i32
  }
}

module attributes {stable_mosaic.version = 11 : i64} {
  func.func @decoder_layer_kernel(%arg0: i32, %arg1: memref<1x16x32xf32, #tpu.memory_space<vmem>>, %arg2: memref<1x16x32xf32, #tpu.memory_space<vmem>>, %arg3: memref<32x32xf32, #tpu.memory_space<vmem>>, %arg4: memref<32x32xf32, #tpu.memory_space<vmem>>, %arg5: memref<32x64xf32, #tpu.memory_space<vmem>>, %arg6: memref<64x32xf32, #tpu.memory_space<vmem>>, %arg7: memref<32x32xf32, #tpu.memory_space<vmem>>, %arg8: memref<32x32xf32, #tpu.memory_space<vmem>>, %arg9: memref<32x64xf32, #tpu.memory_space<vmem>>, %arg10: memref<64x32xf32, #tpu.memory_space<vmem>>, %arg11: memref<32x32xf32, #tpu.memory_space<vmem>>, %arg12: memref<32x32xf32, #tpu.memory_space<vmem>>, %arg13: memref<8x32xf32, #tpu.memory_space<vmem>>, %arg14: memref<1x16x32xf32, #tpu.memory_space<vmem>>) attributes {dimension_semantics = [#tpu.dimension_semantics<parallel>], iteration_bounds = array<i64: 2>, scalar_prefetch = 0 : i64, scratch_operands = 0 : i64, tpu.core_type = #tpu.core_type<tc>, window_params = [{transform_indices = @transform_0, window_bounds = array<i64: 1, 16, 32>}, {transform_indices = @transform_1, window_bounds = array<i64: 1, 16, 32>}, {pipeline_mode = #tpu.pipeline_mode<synchronous>, transform_indices = @transform_2, window_bounds = array<i64: 32, 32>}, {pipeline_mode = #tpu.pipeline_mode<synchronous>, transform_indices = @transform_3, window_bounds = array<i64: 32, 32>}, {pipeline_mode = #tpu.pipeline_mode<synchronous>, transform_indices = @transform_4, window_bounds = array<i64: 32, 64>}, {pipeline_mode = #tpu.pipeline_mode<synchronous>, transform_indices = @transform_5, window_bounds = array<i64: 64, 32>}, {pipeline_mode = #tpu.pipeline_mode<synchronous>, transform_indices = @transform_6, window_bounds = array<i64: 32, 32>}, {pipeline_mode = #tpu.pipeline_mode<synchronous>, transform_indices = @transform_7, window_bounds = array<i64: 32, 32>}, {pipeline_mode = #tpu.pipeline_mode<synchronous>, transform_indices = @transform_8, window_bounds = array<i64: 32, 64>}, {pipeline_mode = #tpu.pipeline_mode<synchronous>, transform_indices = @transform_9, window_bounds = array<i64: 64, 32>}, {pipeline_mode = #tpu.pipeline_mode<synchronous>, transform_indices = @transform_10, window_bounds = array<i64: 32, 32>}, {pipeline_mode = #tpu.pipeline_mode<synchronous>, transform_indices = @transform_11, window_bounds = array<i64: 32, 32>}, {pipeline_mode = #tpu.pipeline_mode<synchronous>, transform_indices = @transform_12, window_bounds = array<i64: 8, 32>}, {transform_indices = @transform_13, window_bounds = array<i64: 1, 16, 32>}]} {
    %c0 = arith.constant 0 : index
    %c0_0 = arith.constant 0 : index
    %c0_1 = arith.constant 0 : index
    %0 = vector.load %arg1[%c0, %c0_0, %c0_1] : memref<1x16x32xf32, #tpu.memory_space<vmem>>, vector<1x16x32xf32>
    %c0_2 = arith.constant 0 : index
    %c0_3 = arith.constant 0 : index
    %c0_4 = arith.constant 0 : index
    %1 = vector.load %arg2[%c0_2, %c0_3, %c0_4] : memref<1x16x32xf32, #tpu.memory_space<vmem>>, vector<1x16x32xf32>
    %c0_5 = arith.constant 0 : index
    %c0_6 = arith.constant 0 : index
    %2 = vector.load %arg13[%c0_5, %c0_6] : memref<8x32xf32, #tpu.memory_space<vmem>>, vector<8x32xf32>
    %3 = vector.extract_strided_slice %2 {offsets = [0, 0], sizes = [1, 32], strides = [1, 1]} : vector<8x32xf32> to vector<1x32xf32>
    %4 = vector.extract_strided_slice %2 {offsets = [1, 0], sizes = [1, 32], strides = [1, 1]} : vector<8x32xf32> to vector<1x32xf32>
    %5 = vector.extract_strided_slice %2 {offsets = [2, 0], sizes = [1, 32], strides = [1, 1]} : vector<8x32xf32> to vector<1x32xf32>
    %6 = vector.extract_strided_slice %2 {offsets = [3, 0], sizes = [1, 32], strides = [1, 1]} : vector<8x32xf32> to vector<1x32xf32>
    %7 = vector.extract_strided_slice %2 {offsets = [4, 0], sizes = [1, 32], strides = [1, 1]} : vector<8x32xf32> to vector<1x32xf32>
    %8 = vector.extract_strided_slice %2 {offsets = [5, 0], sizes = [1, 32], strides = [1, 1]} : vector<8x32xf32> to vector<1x32xf32>
    %9 = vector.extract_strided_slice %2 {offsets = [6, 0], sizes = [1, 32], strides = [1, 1]} : vector<8x32xf32> to vector<1x32xf32>
    %10 = vector.extract_strided_slice %2 {offsets = [7, 0], sizes = [1, 32], strides = [1, 1]} : vector<8x32xf32> to vector<1x32xf32>
    %11 = vector.shape_cast %0 : vector<1x16x32xf32> to vector<16x32xf32>
    %c0_7 = arith.constant 0 : index
    %c0_8 = arith.constant 0 : index
    %12 = vector.load %arg3[%c0_7, %c0_8] : memref<32x32xf32, #tpu.memory_space<vmem>>, vector<32x32xf32>
    %c0_9 = arith.constant 0 : index
    %c0_10 = arith.constant 0 : index
    %13 = vector.load %arg4[%c0_9, %c0_10] : memref<32x32xf32, #tpu.memory_space<vmem>>, vector<32x32xf32>
    %c0_11 = arith.constant 0 : index
    %c0_12 = arith.constant 0 : index
    %14 = vector.load %arg5[%c0_11, %c0_12] : memref<32x64xf32, #tpu.memory_space<vmem>>, vector<32x64xf32>
    %c0_13 = arith.constant 0 : index
    %c0_14 = arith.constant 0 : index
    %15 = vector.load %arg6[%c0_13, %c0_14] : memref<64x32xf32, #tpu.memory_space<vmem>>, vector<64x32xf32>
    %16 = vector.shape_cast %0 : vector<1x16x32xf32> to vector<16x32xf32>
    %cst = arith.constant dense<0.000000e+00> : vector<16x32xf32>
    %17 = tpu.matmul %16, %13, %cst {dimension_numbers = #tpu.dot_dimension_numbers<[1], [0], [0], [1], [0, 0, 1, 1], [], []>} : vector<16x32xf32>, vector<32x32xf32>, vector<16x32xf32> -> vector<16x32xf32>
    %18 = vector.shape_cast %17 : vector<16x32xf32> to vector<1x16x32xf32>
    %cst_15 = arith.constant dense<0.000000e+00> : vector<16x64xf32>
    %19 = tpu.matmul %16, %14, %cst_15 {dimension_numbers = #tpu.dot_dimension_numbers<[1], [0], [0], [1], [0, 0, 1, 1], [], []>} : vector<16x32xf32>, vector<32x64xf32>, vector<16x64xf32> -> vector<16x64xf32>
    %20 = vector.shape_cast %19 : vector<16x64xf32> to vector<1x16x64xf32>
    %21 = vector.extract_strided_slice %18 {offsets = [0, 0, 0], sizes = [1, 16, 16], strides = [1, 1, 1]} : vector<1x16x32xf32> to vector<1x16x16xf32>
    %22 = vector.extract_strided_slice %18 {offsets = [0, 0, 16], sizes = [1, 16, 16], strides = [1, 1, 1]} : vector<1x16x32xf32> to vector<1x16x16xf32>
    %23 = vector.extract_strided_slice %20 {offsets = [0, 0, 0], sizes = [1, 16, 32], strides = [1, 1, 1]} : vector<1x16x64xf32> to vector<1x16x32xf32>
    %24 = vector.extract_strided_slice %20 {offsets = [0, 0, 32], sizes = [1, 16, 32], strides = [1, 1, 1]} : vector<1x16x64xf32> to vector<1x16x32xf32>
    %25 = vector.extract_strided_slice %15 {offsets = [0, 0], sizes = [32, 32], strides = [1, 1]} : vector<64x32xf32> to vector<32x32xf32>
    %26 = vector.extract_strided_slice %15 {offsets = [32, 0], sizes = [32, 32], strides = [1, 1]} : vector<64x32xf32> to vector<32x32xf32>
    %27 = vector.extract_strided_slice %0 {offsets = [0, 0, 0], sizes = [1, 8, 32], strides = [1, 1, 1]} : vector<1x16x32xf32> to vector<1x8x32xf32>
    %28 = vector.shape_cast %27 : vector<1x8x32xf32> to vector<8x32xf32>
    %cst_16 = arith.constant dense<0.000000e+00> : vector<8x32xf32>
    %29 = tpu.matmul %28, %12, %cst_16 {dimension_numbers = #tpu.dot_dimension_numbers<[1], [0], [0], [1], [0, 0, 1, 1], [], []>} : vector<8x32xf32>, vector<32x32xf32>, vector<8x32xf32> -> vector<8x32xf32>
    %30 = vector.shape_cast %29 : vector<8x32xf32> to vector<1x8x32xf32>
    %cst_17 = arith.constant 0.000000e+00 : f32
    %31 = vector.broadcast %cst_17 : f32 to vector<8x32xf32>
    %32 = vector.extract_strided_slice %30 {offsets = [0, 0, 0], sizes = [1, 8, 16], strides = [1, 1, 1]} : vector<1x8x32xf32> to vector<1x8x16xf32>
    "tpu.trace_start"() <{level = 10 : i32, message = "bqa,bka->bqk"}> : () -> ()
    %cst_18 = arith.constant dense<0.000000e+00> : vector<1x8x16xf32>
    %33 = tpu.matmul %32, %21, %cst_18 {dimension_numbers = #tpu.dot_dimension_numbers<[2], [2], [1], [1], [0, 0, 0, 1, 1, 1], [0], [0]>} : vector<1x8x16xf32>, vector<1x16x16xf32>, vector<1x8x16xf32> -> vector<1x8x16xf32>
    "tpu.trace_stop"() : () -> ()
    %cst_19 = arith.constant dense<0xFF800000> : vector<1x8xf32>
    %34 = vector.multi_reduction <maximumf>, %33, %cst_19 [2] : vector<1x8x16xf32> to vector<1x8xf32>
    %35 = vector.shape_cast %34 : vector<1x8xf32> to vector<1x8x1xf32>
    %36 = vector.broadcast %35 : vector<1x8x1xf32> to vector<1x8x16xf32>
    %37 = arith.subf %33, %36 : vector<1x8x16xf32>
    %38 = math.exp %37 : vector<1x8x16xf32>
    %cst_20 = arith.constant dense<0.000000e+00> : vector<1x8xf32>
    %39 = vector.multi_reduction <add>, %38, %cst_20 [2] : vector<1x8x16xf32> to vector<1x8xf32>
    %40 = vector.shape_cast %39 : vector<1x8xf32> to vector<1x8x1xf32>
    %41 = tpu.reciprocal %40 : vector<1x8x1xf32> -> vector<1x8x1xf32>
    %42 = vector.broadcast %41 : vector<1x8x1xf32> to vector<1x8x16xf32>
    %43 = arith.mulf %38, %42 : vector<1x8x16xf32>
    "tpu.trace_start"() <{level = 10 : i32, message = "bqk,bkd->bqd"}> : () -> ()
    %cst_21 = arith.constant dense<0.000000e+00> : vector<1x8x32xf32>
    %44 = tpu.matmul %43, %23, %cst_21 {dimension_numbers = #tpu.dot_dimension_numbers<[2], [1], [1], [2], [0, 0, 0, 1, 1, 2], [0], [0]>} : vector<1x8x16xf32>, vector<1x16x32xf32>, vector<1x8x32xf32> -> vector<1x8x32xf32>
    "tpu.trace_stop"() : () -> ()
    %45 = vector.shape_cast %44 : vector<1x8x32xf32> to vector<8x32xf32>
    %cst_22 = arith.constant dense<0.000000e+00> : vector<8x32xf32>
    %46 = tpu.matmul %45, %25, %cst_22 {dimension_numbers = #tpu.dot_dimension_numbers<[1], [0], [0], [1], [0, 0, 1, 1], [], []>} : vector<8x32xf32>, vector<32x32xf32>, vector<8x32xf32> -> vector<8x32xf32>
    %47 = arith.addf %31, %46 : vector<8x32xf32>
    %48 = vector.extract_strided_slice %30 {offsets = [0, 0, 16], sizes = [1, 8, 16], strides = [1, 1, 1]} : vector<1x8x32xf32> to vector<1x8x16xf32>
    "tpu.trace_start"() <{level = 10 : i32, message = "bqa,bka->bqk"}> : () -> ()
    %cst_23 = arith.constant dense<0.000000e+00> : vector<1x8x16xf32>
    %49 = tpu.matmul %48, %22, %cst_23 {dimension_numbers = #tpu.dot_dimension_numbers<[2], [2], [1], [1], [0, 0, 0, 1, 1, 1], [0], [0]>} : vector<1x8x16xf32>, vector<1x16x16xf32>, vector<1x8x16xf32> -> vector<1x8x16xf32>
    "tpu.trace_stop"() : () -> ()
    %cst_24 = arith.constant dense<0xFF800000> : vector<1x8xf32>
    %50 = vector.multi_reduction <maximumf>, %49, %cst_24 [2] : vector<1x8x16xf32> to vector<1x8xf32>
    %51 = vector.shape_cast %50 : vector<1x8xf32> to vector<1x8x1xf32>
    %52 = vector.broadcast %51 : vector<1x8x1xf32> to vector<1x8x16xf32>
    %53 = arith.subf %49, %52 : vector<1x8x16xf32>
    %54 = math.exp %53 : vector<1x8x16xf32>
    %cst_25 = arith.constant dense<0.000000e+00> : vector<1x8xf32>
    %55 = vector.multi_reduction <add>, %54, %cst_25 [2] : vector<1x8x16xf32> to vector<1x8xf32>
    %56 = vector.shape_cast %55 : vector<1x8xf32> to vector<1x8x1xf32>
    %57 = tpu.reciprocal %56 : vector<1x8x1xf32> -> vector<1x8x1xf32>
    %58 = vector.broadcast %57 : vector<1x8x1xf32> to vector<1x8x16xf32>
    %59 = arith.mulf %54, %58 : vector<1x8x16xf32>
    "tpu.trace_start"() <{level = 10 : i32, message = "bqk,bkd->bqd"}> : () -> ()
    %cst_26 = arith.constant dense<0.000000e+00> : vector<1x8x32xf32>
    %60 = tpu.matmul %59, %24, %cst_26 {dimension_numbers = #tpu.dot_dimension_numbers<[2], [1], [1], [2], [0, 0, 0, 1, 1, 2], [0], [0]>} : vector<1x8x16xf32>, vector<1x16x32xf32>, vector<1x8x32xf32> -> vector<1x8x32xf32>
    "tpu.trace_stop"() : () -> ()
    %61 = vector.shape_cast %60 : vector<1x8x32xf32> to vector<8x32xf32>
    %cst_27 = arith.constant dense<0.000000e+00> : vector<8x32xf32>
    %62 = tpu.matmul %61, %26, %cst_27 {dimension_numbers = #tpu.dot_dimension_numbers<[1], [0], [0], [1], [0, 0, 1, 1], [], []>} : vector<8x32xf32>, vector<32x32xf32>, vector<8x32xf32> -> vector<8x32xf32>
    %63 = arith.addf %47, %62 : vector<8x32xf32>
    %64 = vector.shape_cast %63 : vector<8x32xf32> to vector<1x8x32xf32>
    %65 = vector.extract_strided_slice %0 {offsets = [0, 8, 0], sizes = [1, 8, 32], strides = [1, 1, 1]} : vector<1x16x32xf32> to vector<1x8x32xf32>
    %66 = vector.shape_cast %65 : vector<1x8x32xf32> to vector<8x32xf32>
    %cst_28 = arith.constant dense<0.000000e+00> : vector<8x32xf32>
    %67 = tpu.matmul %66, %12, %cst_28 {dimension_numbers = #tpu.dot_dimension_numbers<[1], [0], [0], [1], [0, 0, 1, 1], [], []>} : vector<8x32xf32>, vector<32x32xf32>, vector<8x32xf32> -> vector<8x32xf32>
    %68 = vector.shape_cast %67 : vector<8x32xf32> to vector<1x8x32xf32>
    %cst_29 = arith.constant 0.000000e+00 : f32
    %69 = vector.broadcast %cst_29 : f32 to vector<8x32xf32>
    %70 = vector.extract_strided_slice %68 {offsets = [0, 0, 0], sizes = [1, 8, 16], strides = [1, 1, 1]} : vector<1x8x32xf32> to vector<1x8x16xf32>
    "tpu.trace_start"() <{level = 10 : i32, message = "bqa,bka->bqk"}> : () -> ()
    %cst_30 = arith.constant dense<0.000000e+00> : vector<1x8x16xf32>
    %71 = tpu.matmul %70, %21, %cst_30 {dimension_numbers = #tpu.dot_dimension_numbers<[2], [2], [1], [1], [0, 0, 0, 1, 1, 1], [0], [0]>} : vector<1x8x16xf32>, vector<1x16x16xf32>, vector<1x8x16xf32> -> vector<1x8x16xf32>
    "tpu.trace_stop"() : () -> ()
    %cst_31 = arith.constant dense<0xFF800000> : vector<1x8xf32>
    %72 = vector.multi_reduction <maximumf>, %71, %cst_31 [2] : vector<1x8x16xf32> to vector<1x8xf32>
    %73 = vector.shape_cast %72 : vector<1x8xf32> to vector<1x8x1xf32>
    %74 = vector.broadcast %73 : vector<1x8x1xf32> to vector<1x8x16xf32>
    %75 = arith.subf %71, %74 : vector<1x8x16xf32>
    %76 = math.exp %75 : vector<1x8x16xf32>
    %cst_32 = arith.constant dense<0.000000e+00> : vector<1x8xf32>
    %77 = vector.multi_reduction <add>, %76, %cst_32 [2] : vector<1x8x16xf32> to vector<1x8xf32>
    %78 = vector.shape_cast %77 : vector<1x8xf32> to vector<1x8x1xf32>
    %79 = tpu.reciprocal %78 : vector<1x8x1xf32> -> vector<1x8x1xf32>
    %80 = vector.broadcast %79 : vector<1x8x1xf32> to vector<1x8x16xf32>
    %81 = arith.mulf %76, %80 : vector<1x8x16xf32>
    "tpu.trace_start"() <{level = 10 : i32, message = "bqk,bkd->bqd"}> : () -> ()
    %cst_33 = arith.constant dense<0.000000e+00> : vector<1x8x32xf32>
    %82 = tpu.matmul %81, %23, %cst_33 {dimension_numbers = #tpu.dot_dimension_numbers<[2], [1], [1], [2], [0, 0, 0, 1, 1, 2], [0], [0]>} : vector<1x8x16xf32>, vector<1x16x32xf32>, vector<1x8x32xf32> -> vector<1x8x32xf32>
    "tpu.trace_stop"() : () -> ()
    %83 = vector.shape_cast %82 : vector<1x8x32xf32> to vector<8x32xf32>
    %cst_34 = arith.constant dense<0.000000e+00> : vector<8x32xf32>
    %84 = tpu.matmul %83, %25, %cst_34 {dimension_numbers = #tpu.dot_dimension_numbers<[1], [0], [0], [1], [0, 0, 1, 1], [], []>} : vector<8x32xf32>, vector<32x32xf32>, vector<8x32xf32> -> vector<8x32xf32>
    %85 = arith.addf %69, %84 : vector<8x32xf32>
    %86 = vector.extract_strided_slice %68 {offsets = [0, 0, 16], sizes = [1, 8, 16], strides = [1, 1, 1]} : vector<1x8x32xf32> to vector<1x8x16xf32>
    "tpu.trace_start"() <{level = 10 : i32, message = "bqa,bka->bqk"}> : () -> ()
    %cst_35 = arith.constant dense<0.000000e+00> : vector<1x8x16xf32>
    %87 = tpu.matmul %86, %22, %cst_35 {dimension_numbers = #tpu.dot_dimension_numbers<[2], [2], [1], [1], [0, 0, 0, 1, 1, 1], [0], [0]>} : vector<1x8x16xf32>, vector<1x16x16xf32>, vector<1x8x16xf32> -> vector<1x8x16xf32>
    "tpu.trace_stop"() : () -> ()
    %cst_36 = arith.constant dense<0xFF800000> : vector<1x8xf32>
    %88 = vector.multi_reduction <maximumf>, %87, %cst_36 [2] : vector<1x8x16xf32> to vector<1x8xf32>
    %89 = vector.shape_cast %88 : vector<1x8xf32> to vector<1x8x1xf32>
    %90 = vector.broadcast %89 : vector<1x8x1xf32> to vector<1x8x16xf32>
    %91 = arith.subf %87, %90 : vector<1x8x16xf32>
    %92 = math.exp %91 : vector<1x8x16xf32>
    %cst_37 = arith.constant dense<0.000000e+00> : vector<1x8xf32>
    %93 = vector.multi_reduction <add>, %92, %cst_37 [2] : vector<1x8x16xf32> to vector<1x8xf32>
    %94 = vector.shape_cast %93 : vector<1x8xf32> to vector<1x8x1xf32>
    %95 = tpu.reciprocal %94 : vector<1x8x1xf32> -> vector<1x8x1xf32>
    %96 = vector.broadcast %95 : vector<1x8x1xf32> to vector<1x8x16xf32>
    %97 = arith.mulf %92, %96 : vector<1x8x16xf32>
    "tpu.trace_start"() <{level = 10 : i32, message = "bqk,bkd->bqd"}> : () -> ()
    %cst_38 = arith.constant dense<0.000000e+00> : vector<1x8x32xf32>
    %98 = tpu.matmul %97, %24, %cst_38 {dimension_numbers = #tpu.dot_dimension_numbers<[2], [1], [1], [2], [0, 0, 0, 1, 1, 2], [0], [0]>} : vector<1x8x16xf32>, vector<1x16x32xf32>, vector<1x8x32xf32> -> vector<1x8x32xf32>
    "tpu.trace_stop"() : () -> ()
    %99 = vector.shape_cast %98 : vector<1x8x32xf32> to vector<8x32xf32>
    %cst_39 = arith.constant dense<0.000000e+00> : vector<8x32xf32>
    %100 = tpu.matmul %99, %26, %cst_39 {dimension_numbers = #tpu.dot_dimension_numbers<[1], [0], [0], [1], [0, 0, 1, 1], [], []>} : vector<8x32xf32>, vector<32x32xf32>, vector<8x32xf32> -> vector<8x32xf32>
    %101 = arith.addf %85, %100 : vector<8x32xf32>
    %102 = vector.shape_cast %101 : vector<8x32xf32> to vector<1x8x32xf32>
    %103 = tpu.concatenate %64, %102 in 1 : vector<1x8x32xf32>, vector<1x8x32xf32> -> vector<1x16x32xf32>
    %104 = vector.shape_cast %103 : vector<1x16x32xf32> to vector<16x32xf32>
    %105 = arith.addf %104, %11 : vector<16x32xf32>
    %cst_40 = arith.constant dense<0.000000e+00> : vector<16xf32>
    %106 = vector.multi_reduction <add>, %105, %cst_40 [1] : vector<16x32xf32> to vector<16xf32>
    %107 = vector.shape_cast %106 : vector<16xf32> to vector<16x1xf32>
    %cst_41 = arith.constant 3.200000e+01 : f32
    %108 = vector.broadcast %cst_41 : f32 to vector<16x1xf32>
    %109 = arith.divf %107, %108 : vector<16x1xf32>
    %110 = vector.broadcast %109 : vector<16x1xf32> to vector<16x32xf32>
    %111 = arith.subf %105, %110 : vector<16x32xf32>
    %112 = arith.mulf %111, %111 : vector<16x32xf32>
    %cst_42 = arith.constant dense<0.000000e+00> : vector<16xf32>
    %113 = vector.multi_reduction <add>, %112, %cst_42 [1] : vector<16x32xf32> to vector<16xf32>
    %114 = vector.shape_cast %113 : vector<16xf32> to vector<16x1xf32>
    %cst_43 = arith.constant 3.200000e+01 : f32
    %115 = vector.broadcast %cst_43 : f32 to vector<16x1xf32>
    %116 = arith.divf %114, %115 : vector<16x1xf32>
    %117 = vector.broadcast %109 : vector<16x1xf32> to vector<16x32xf32>
    %118 = arith.subf %105, %117 : vector<16x32xf32>
    %cst_44 = arith.constant 9.99999974E-6 : f32
    %119 = vector.broadcast %cst_44 : f32 to vector<16x1xf32>
    %120 = arith.addf %116, %119 : vector<16x1xf32>
    %121 = math.rsqrt %120 : vector<16x1xf32>
    %122 = vector.broadcast %121 : vector<16x1xf32> to vector<16x32xf32>
    %123 = arith.mulf %118, %122 : vector<16x32xf32>
    %124 = vector.broadcast %5 : vector<1x32xf32> to vector<16x32xf32>
    %125 = arith.mulf %123, %124 : vector<16x32xf32>
    %126 = vector.broadcast %6 : vector<1x32xf32> to vector<16x32xf32>
    %127 = arith.addf %125, %126 : vector<16x32xf32>
    %128 = vector.shape_cast %127 : vector<16x32xf32> to vector<1x16x32xf32>
    %c0_45 = arith.constant 0 : index
    %c0_46 = arith.constant 0 : index
    %129 = vector.load %arg7[%c0_45, %c0_46] : memref<32x32xf32, #tpu.memory_space<vmem>>, vector<32x32xf32>
    %c0_47 = arith.constant 0 : index
    %c0_48 = arith.constant 0 : index
    %130 = vector.load %arg8[%c0_47, %c0_48] : memref<32x32xf32, #tpu.memory_space<vmem>>, vector<32x32xf32>
    %c0_49 = arith.constant 0 : index
    %c0_50 = arith.constant 0 : index
    %131 = vector.load %arg9[%c0_49, %c0_50] : memref<32x64xf32, #tpu.memory_space<vmem>>, vector<32x64xf32>
    %c0_51 = arith.constant 0 : index
    %c0_52 = arith.constant 0 : index
    %132 = vector.load %arg10[%c0_51, %c0_52] : memref<64x32xf32, #tpu.memory_space<vmem>>, vector<64x32xf32>
    %133 = vector.shape_cast %1 : vector<1x16x32xf32> to vector<16x32xf32>
    %cst_53 = arith.constant dense<0.000000e+00> : vector<16x32xf32>
    %134 = tpu.matmul %133, %130, %cst_53 {dimension_numbers = #tpu.dot_dimension_numbers<[1], [0], [0], [1], [0, 0, 1, 1], [], []>} : vector<16x32xf32>, vector<32x32xf32>, vector<16x32xf32> -> vector<16x32xf32>
    %135 = vector.shape_cast %134 : vector<16x32xf32> to vector<1x16x32xf32>
    %cst_54 = arith.constant dense<0.000000e+00> : vector<16x64xf32>
    %136 = tpu.matmul %133, %131, %cst_54 {dimension_numbers = #tpu.dot_dimension_numbers<[1], [0], [0], [1], [0, 0, 1, 1], [], []>} : vector<16x32xf32>, vector<32x64xf32>, vector<16x64xf32> -> vector<16x64xf32>
    %137 = vector.shape_cast %136 : vector<16x64xf32> to vector<1x16x64xf32>
    %138 = vector.extract_strided_slice %135 {offsets = [0, 0, 0], sizes = [1, 16, 16], strides = [1, 1, 1]} : vector<1x16x32xf32> to vector<1x16x16xf32>
    %139 = vector.extract_strided_slice %135 {offsets = [0, 0, 16], sizes = [1, 16, 16], strides = [1, 1, 1]} : vector<1x16x32xf32> to vector<1x16x16xf32>
    %140 = vector.extract_strided_slice %137 {offsets = [0, 0, 0], sizes = [1, 16, 32], strides = [1, 1, 1]} : vector<1x16x64xf32> to vector<1x16x32xf32>
    %141 = vector.extract_strided_slice %137 {offsets = [0, 0, 32], sizes = [1, 16, 32], strides = [1, 1, 1]} : vector<1x16x64xf32> to vector<1x16x32xf32>
    %142 = vector.extract_strided_slice %132 {offsets = [0, 0], sizes = [32, 32], strides = [1, 1]} : vector<64x32xf32> to vector<32x32xf32>
    %143 = vector.extract_strided_slice %132 {offsets = [32, 0], sizes = [32, 32], strides = [1, 1]} : vector<64x32xf32> to vector<32x32xf32>
    %144 = vector.extract_strided_slice %128 {offsets = [0, 0, 0], sizes = [1, 8, 32], strides = [1, 1, 1]} : vector<1x16x32xf32> to vector<1x8x32xf32>
    %145 = vector.shape_cast %144 : vector<1x8x32xf32> to vector<8x32xf32>
    %cst_55 = arith.constant dense<0.000000e+00> : vector<8x32xf32>
    %146 = tpu.matmul %145, %129, %cst_55 {dimension_numbers = #tpu.dot_dimension_numbers<[1], [0], [0], [1], [0, 0, 1, 1], [], []>} : vector<8x32xf32>, vector<32x32xf32>, vector<8x32xf32> -> vector<8x32xf32>
    %147 = vector.shape_cast %146 : vector<8x32xf32> to vector<1x8x32xf32>
    %cst_56 = arith.constant 0.000000e+00 : f32
    %148 = vector.broadcast %cst_56 : f32 to vector<8x32xf32>
    %149 = vector.extract_strided_slice %147 {offsets = [0, 0, 0], sizes = [1, 8, 16], strides = [1, 1, 1]} : vector<1x8x32xf32> to vector<1x8x16xf32>
    "tpu.trace_start"() <{level = 10 : i32, message = "bqa,bka->bqk"}> : () -> ()
    %cst_57 = arith.constant dense<0.000000e+00> : vector<1x8x16xf32>
    %150 = tpu.matmul %149, %138, %cst_57 {dimension_numbers = #tpu.dot_dimension_numbers<[2], [2], [1], [1], [0, 0, 0, 1, 1, 1], [0], [0]>} : vector<1x8x16xf32>, vector<1x16x16xf32>, vector<1x8x16xf32> -> vector<1x8x16xf32>
    "tpu.trace_stop"() : () -> ()
    %cst_58 = arith.constant dense<0xFF800000> : vector<1x8xf32>
    %151 = vector.multi_reduction <maximumf>, %150, %cst_58 [2] : vector<1x8x16xf32> to vector<1x8xf32>
    %152 = vector.shape_cast %151 : vector<1x8xf32> to vector<1x8x1xf32>
    %153 = vector.broadcast %152 : vector<1x8x1xf32> to vector<1x8x16xf32>
    %154 = arith.subf %150, %153 : vector<1x8x16xf32>
    %155 = math.exp %154 : vector<1x8x16xf32>
    %cst_59 = arith.constant dense<0.000000e+00> : vector<1x8xf32>
    %156 = vector.multi_reduction <add>, %155, %cst_59 [2] : vector<1x8x16xf32> to vector<1x8xf32>
    %157 = vector.shape_cast %156 : vector<1x8xf32> to vector<1x8x1xf32>
    %158 = tpu.reciprocal %157 : vector<1x8x1xf32> -> vector<1x8x1xf32>
    %159 = vector.broadcast %158 : vector<1x8x1xf32> to vector<1x8x16xf32>
    %160 = arith.mulf %155, %159 : vector<1x8x16xf32>
    "tpu.trace_start"() <{level = 10 : i32, message = "bqk,bkd->bqd"}> : () -> ()
    %cst_60 = arith.constant dense<0.000000e+00> : vector<1x8x32xf32>
    %161 = tpu.matmul %160, %140, %cst_60 {dimension_numbers = #tpu.dot_dimension_numbers<[2], [1], [1], [2], [0, 0, 0, 1, 1, 2], [0], [0]>} : vector<1x8x16xf32>, vector<1x16x32xf32>, vector<1x8x32xf32> -> vector<1x8x32xf32>
    "tpu.trace_stop"() : () -> ()
    %162 = vector.shape_cast %161 : vector<1x8x32xf32> to vector<8x32xf32>
    %cst_61 = arith.constant dense<0.000000e+00> : vector<8x32xf32>
    %163 = tpu.matmul %162, %142, %cst_61 {dimension_numbers = #tpu.dot_dimension_numbers<[1], [0], [0], [1], [0, 0, 1, 1], [], []>} : vector<8x32xf32>, vector<32x32xf32>, vector<8x32xf32> -> vector<8x32xf32>
    %164 = arith.addf %148, %163 : vector<8x32xf32>
    %165 = vector.extract_strided_slice %147 {offsets = [0, 0, 16], sizes = [1, 8, 16], strides = [1, 1, 1]} : vector<1x8x32xf32> to vector<1x8x16xf32>
    "tpu.trace_start"() <{level = 10 : i32, message = "bqa,bka->bqk"}> : () -> ()
    %cst_62 = arith.constant dense<0.000000e+00> : vector<1x8x16xf32>
    %166 = tpu.matmul %165, %139, %cst_62 {dimension_numbers = #tpu.dot_dimension_numbers<[2], [2], [1], [1], [0, 0, 0, 1, 1, 1], [0], [0]>} : vector<1x8x16xf32>, vector<1x16x16xf32>, vector<1x8x16xf32> -> vector<1x8x16xf32>
    "tpu.trace_stop"() : () -> ()
    %cst_63 = arith.constant dense<0xFF800000> : vector<1x8xf32>
    %167 = vector.multi_reduction <maximumf>, %166, %cst_63 [2] : vector<1x8x16xf32> to vector<1x8xf32>
    %168 = vector.shape_cast %167 : vector<1x8xf32> to vector<1x8x1xf32>
    %169 = vector.broadcast %168 : vector<1x8x1xf32> to vector<1x8x16xf32>
    %170 = arith.subf %166, %169 : vector<1x8x16xf32>
    %171 = math.exp %170 : vector<1x8x16xf32>
    %cst_64 = arith.constant dense<0.000000e+00> : vector<1x8xf32>
    %172 = vector.multi_reduction <add>, %171, %cst_64 [2] : vector<1x8x16xf32> to vector<1x8xf32>
    %173 = vector.shape_cast %172 : vector<1x8xf32> to vector<1x8x1xf32>
    %174 = tpu.reciprocal %173 : vector<1x8x1xf32> -> vector<1x8x1xf32>
    %175 = vector.broadcast %174 : vector<1x8x1xf32> to vector<1x8x16xf32>
    %176 = arith.mulf %171, %175 : vector<1x8x16xf32>
    "tpu.trace_start"() <{level = 10 : i32, message = "bqk,bkd->bqd"}> : () -> ()
    %cst_65 = arith.constant dense<0.000000e+00> : vector<1x8x32xf32>
    %177 = tpu.matmul %176, %141, %cst_65 {dimension_numbers = #tpu.dot_dimension_numbers<[2], [1], [1], [2], [0, 0, 0, 1, 1, 2], [0], [0]>} : vector<1x8x16xf32>, vector<1x16x32xf32>, vector<1x8x32xf32> -> vector<1x8x32xf32>
    "tpu.trace_stop"() : () -> ()
    %178 = vector.shape_cast %177 : vector<1x8x32xf32> to vector<8x32xf32>
    %cst_66 = arith.constant dense<0.000000e+00> : vector<8x32xf32>
    %179 = tpu.matmul %178, %143, %cst_66 {dimension_numbers = #tpu.dot_dimension_numbers<[1], [0], [0], [1], [0, 0, 1, 1], [], []>} : vector<8x32xf32>, vector<32x32xf32>, vector<8x32xf32> -> vector<8x32xf32>
    %180 = arith.addf %164, %179 : vector<8x32xf32>
    %181 = vector.shape_cast %180 : vector<8x32xf32> to vector<1x8x32xf32>
    %182 = vector.extract_strided_slice %128 {offsets = [0, 8, 0], sizes = [1, 8, 32], strides = [1, 1, 1]} : vector<1x16x32xf32> to vector<1x8x32xf32>
    %183 = vector.shape_cast %182 : vector<1x8x32xf32> to vector<8x32xf32>
    %cst_67 = arith.constant dense<0.000000e+00> : vector<8x32xf32>
    %184 = tpu.matmul %183, %129, %cst_67 {dimension_numbers = #tpu.dot_dimension_numbers<[1], [0], [0], [1], [0, 0, 1, 1], [], []>} : vector<8x32xf32>, vector<32x32xf32>, vector<8x32xf32> -> vector<8x32xf32>
    %185 = vector.shape_cast %184 : vector<8x32xf32> to vector<1x8x32xf32>
    %cst_68 = arith.constant 0.000000e+00 : f32
    %186 = vector.broadcast %cst_68 : f32 to vector<8x32xf32>
    %187 = vector.extract_strided_slice %185 {offsets = [0, 0, 0], sizes = [1, 8, 16], strides = [1, 1, 1]} : vector<1x8x32xf32> to vector<1x8x16xf32>
    "tpu.trace_start"() <{level = 10 : i32, message = "bqa,bka->bqk"}> : () -> ()
    %cst_69 = arith.constant dense<0.000000e+00> : vector<1x8x16xf32>
    %188 = tpu.matmul %187, %138, %cst_69 {dimension_numbers = #tpu.dot_dimension_numbers<[2], [2], [1], [1], [0, 0, 0, 1, 1, 1], [0], [0]>} : vector<1x8x16xf32>, vector<1x16x16xf32>, vector<1x8x16xf32> -> vector<1x8x16xf32>
    "tpu.trace_stop"() : () -> ()
    %cst_70 = arith.constant dense<0xFF800000> : vector<1x8xf32>
    %189 = vector.multi_reduction <maximumf>, %188, %cst_70 [2] : vector<1x8x16xf32> to vector<1x8xf32>
    %190 = vector.shape_cast %189 : vector<1x8xf32> to vector<1x8x1xf32>
    %191 = vector.broadcast %190 : vector<1x8x1xf32> to vector<1x8x16xf32>
    %192 = arith.subf %188, %191 : vector<1x8x16xf32>
    %193 = math.exp %192 : vector<1x8x16xf32>
    %cst_71 = arith.constant dense<0.000000e+00> : vector<1x8xf32>
    %194 = vector.multi_reduction <add>, %193, %cst_71 [2] : vector<1x8x16xf32> to vector<1x8xf32>
    %195 = vector.shape_cast %194 : vector<1x8xf32> to vector<1x8x1xf32>
    %196 = tpu.reciprocal %195 : vector<1x8x1xf32> -> vector<1x8x1xf32>
    %197 = vector.broadcast %196 : vector<1x8x1xf32> to vector<1x8x16xf32>
    %198 = arith.mulf %193, %197 : vector<1x8x16xf32>
    "tpu.trace_start"() <{level = 10 : i32, message = "bqk,bkd->bqd"}> : () -> ()
    %cst_72 = arith.constant dense<0.000000e+00> : vector<1x8x32xf32>
    %199 = tpu.matmul %198, %140, %cst_72 {dimension_numbers = #tpu.dot_dimension_numbers<[2], [1], [1], [2], [0, 0, 0, 1, 1, 2], [0], [0]>} : vector<1x8x16xf32>, vector<1x16x32xf32>, vector<1x8x32xf32> -> vector<1x8x32xf32>
    "tpu.trace_stop"() : () -> ()
    %200 = vector.shape_cast %199 : vector<1x8x32xf32> to vector<8x32xf32>
    %cst_73 = arith.constant dense<0.000000e+00> : vector<8x32xf32>
    %201 = tpu.matmul %200, %142, %cst_73 {dimension_numbers = #tpu.dot_dimension_numbers<[1], [0], [0], [1], [0, 0, 1, 1], [], []>} : vector<8x32xf32>, vector<32x32xf32>, vector<8x32xf32> -> vector<8x32xf32>
    %202 = arith.addf %186, %201 : vector<8x32xf32>
    %203 = vector.extract_strided_slice %185 {offsets = [0, 0, 16], sizes = [1, 8, 16], strides = [1, 1, 1]} : vector<1x8x32xf32> to vector<1x8x16xf32>
    "tpu.trace_start"() <{level = 10 : i32, message = "bqa,bka->bqk"}> : () -> ()
    %cst_74 = arith.constant dense<0.000000e+00> : vector<1x8x16xf32>
    %204 = tpu.matmul %203, %139, %cst_74 {dimension_numbers = #tpu.dot_dimension_numbers<[2], [2], [1], [1], [0, 0, 0, 1, 1, 1], [0], [0]>} : vector<1x8x16xf32>, vector<1x16x16xf32>, vector<1x8x16xf32> -> vector<1x8x16xf32>
    "tpu.trace_stop"() : () -> ()
    %cst_75 = arith.constant dense<0xFF800000> : vector<1x8xf32>
    %205 = vector.multi_reduction <maximumf>, %204, %cst_75 [2] : vector<1x8x16xf32> to vector<1x8xf32>
    %206 = vector.shape_cast %205 : vector<1x8xf32> to vector<1x8x1xf32>
    %207 = vector.broadcast %206 : vector<1x8x1xf32> to vector<1x8x16xf32>
    %208 = arith.subf %204, %207 : vector<1x8x16xf32>
    %209 = math.exp %208 : vector<1x8x16xf32>
    %cst_76 = arith.constant dense<0.000000e+00> : vector<1x8xf32>
    %210 = vector.multi_reduction <add>, %209, %cst_76 [2] : vector<1x8x16xf32> to vector<1x8xf32>
    %211 = vector.shape_cast %210 : vector<1x8xf32> to vector<1x8x1xf32>
    %212 = tpu.reciprocal %211 : vector<1x8x1xf32> -> vector<1x8x1xf32>
    %213 = vector.broadcast %212 : vector<1x8x1xf32> to vector<1x8x16xf32>
    %214 = arith.mulf %209, %213 : vector<1x8x16xf32>
    "tpu.trace_start"() <{level = 10 : i32, message = "bqk,bkd->bqd"}> : () -> ()
    %cst_77 = arith.constant dense<0.000000e+00> : vector<1x8x32xf32>
    %215 = tpu.matmul %214, %141, %cst_77 {dimension_numbers = #tpu.dot_dimension_numbers<[2], [1], [1], [2], [0, 0, 0, 1, 1, 2], [0], [0]>} : vector<1x8x16xf32>, vector<1x16x32xf32>, vector<1x8x32xf32> -> vector<1x8x32xf32>
    "tpu.trace_stop"() : () -> ()
    %216 = vector.shape_cast %215 : vector<1x8x32xf32> to vector<8x32xf32>
    %cst_78 = arith.constant dense<0.000000e+00> : vector<8x32xf32>
    %217 = tpu.matmul %216, %143, %cst_78 {dimension_numbers = #tpu.dot_dimension_numbers<[1], [0], [0], [1], [0, 0, 1, 1], [], []>} : vector<8x32xf32>, vector<32x32xf32>, vector<8x32xf32> -> vector<8x32xf32>
    %218 = arith.addf %202, %217 : vector<8x32xf32>
    %219 = vector.shape_cast %218 : vector<8x32xf32> to vector<1x8x32xf32>
    %220 = tpu.concatenate %181, %219 in 1 : vector<1x8x32xf32>, vector<1x8x32xf32> -> vector<1x16x32xf32>
    %221 = vector.shape_cast %220 : vector<1x16x32xf32> to vector<16x32xf32>
    %222 = arith.addf %221, %127 : vector<16x32xf32>
    %cst_79 = arith.constant dense<0.000000e+00> : vector<16xf32>
    %223 = vector.multi_reduction <add>, %222, %cst_79 [1] : vector<16x32xf32> to vector<16xf32>
    %224 = vector.shape_cast %223 : vector<16xf32> to vector<16x1xf32>
    %cst_80 = arith.constant 3.200000e+01 : f32
    %225 = vector.broadcast %cst_80 : f32 to vector<16x1xf32>
    %226 = arith.divf %224, %225 : vector<16x1xf32>
    %227 = vector.broadcast %226 : vector<16x1xf32> to vector<16x32xf32>
    %228 = arith.subf %222, %227 : vector<16x32xf32>
    %229 = arith.mulf %228, %228 : vector<16x32xf32>
    %cst_81 = arith.constant dense<0.000000e+00> : vector<16xf32>
    %230 = vector.multi_reduction <add>, %229, %cst_81 [1] : vector<16x32xf32> to vector<16xf32>
    %231 = vector.shape_cast %230 : vector<16xf32> to vector<16x1xf32>
    %cst_82 = arith.constant 3.200000e+01 : f32
    %232 = vector.broadcast %cst_82 : f32 to vector<16x1xf32>
    %233 = arith.divf %231, %232 : vector<16x1xf32>
    %234 = vector.broadcast %226 : vector<16x1xf32> to vector<16x32xf32>
    %235 = arith.subf %222, %234 : vector<16x32xf32>
    %cst_83 = arith.constant 9.99999974E-6 : f32
    %236 = vector.broadcast %cst_83 : f32 to vector<16x1xf32>
    %237 = arith.addf %233, %236 : vector<16x1xf32>
    %238 = math.rsqrt %237 : vector<16x1xf32>
    %239 = vector.broadcast %238 : vector<16x1xf32> to vector<16x32xf32>
    %240 = arith.mulf %235, %239 : vector<16x32xf32>
    %241 = vector.broadcast %7 : vector<1x32xf32> to vector<16x32xf32>
    %242 = arith.mulf %240, %241 : vector<16x32xf32>
    %243 = vector.broadcast %8 : vector<1x32xf32> to vector<16x32xf32>
    %244 = arith.addf %242, %243 : vector<16x32xf32>
    %c0_84 = arith.constant 0 : index
    %c0_85 = arith.constant 0 : index
    %245 = vector.load %arg11[%c0_84, %c0_85] : memref<32x32xf32, #tpu.memory_space<vmem>>, vector<32x32xf32>
    %c0_86 = arith.constant 0 : index
    %c0_87 = arith.constant 0 : index
    %246 = vector.load %arg12[%c0_86, %c0_87] : memref<32x32xf32, #tpu.memory_space<vmem>>, vector<32x32xf32>
    %cst_88 = arith.constant dense<0.000000e+00> : vector<16x32xf32>
    %247 = tpu.matmul %244, %246, %cst_88 {dimension_numbers = #tpu.dot_dimension_numbers<[1], [0], [0], [1], [0, 0, 1, 1], [], []>} : vector<16x32xf32>, vector<32x32xf32>, vector<16x32xf32> -> vector<16x32xf32>
    %248 = vector.broadcast %4 : vector<1x32xf32> to vector<16x32xf32>
    %249 = arith.addf %247, %248 : vector<16x32xf32>
    %cst_89 = arith.constant 0.000000e+00 : f32
    %250 = vector.broadcast %cst_89 : f32 to vector<16x32xf32>
    %251 = arith.maximumf %249, %250 : vector<16x32xf32>
    %cst_90 = arith.constant dense<0.000000e+00> : vector<16x32xf32>
    %252 = tpu.matmul %251, %245, %cst_90 {dimension_numbers = #tpu.dot_dimension_numbers<[1], [0], [0], [1], [0, 0, 1, 1], [], []>} : vector<16x32xf32>, vector<32x32xf32>, vector<16x32xf32> -> vector<16x32xf32>
    %253 = vector.broadcast %3 : vector<1x32xf32> to vector<16x32xf32>
    %254 = arith.addf %252, %253 : vector<16x32xf32>
    %255 = arith.addf %244, %254 : vector<16x32xf32>
    %cst_91 = arith.constant dense<0.000000e+00> : vector<16xf32>
    %256 = vector.multi_reduction <add>, %255, %cst_91 [1] : vector<16x32xf32> to vector<16xf32>
    %257 = vector.shape_cast %256 : vector<16xf32> to vector<16x1xf32>
    %cst_92 = arith.constant 3.200000e+01 : f32
    %258 = vector.broadcast %cst_92 : f32 to vector<16x1xf32>
    %259 = arith.divf %257, %258 : vector<16x1xf32>
    %260 = vector.broadcast %259 : vector<16x1xf32> to vector<16x32xf32>
    %261 = arith.subf %255, %260 : vector<16x32xf32>
    %262 = arith.mulf %261, %261 : vector<16x32xf32>
    %cst_93 = arith.constant dense<0.000000e+00> : vector<16xf32>
    %263 = vector.multi_reduction <add>, %262, %cst_93 [1] : vector<16x32xf32> to vector<16xf32>
    %264 = vector.shape_cast %263 : vector<16xf32> to vector<16x1xf32>
    %cst_94 = arith.constant 3.200000e+01 : f32
    %265 = vector.broadcast %cst_94 : f32 to vector<16x1xf32>
    %266 = arith.divf %264, %265 : vector<16x1xf32>
    %267 = vector.broadcast %259 : vector<16x1xf32> to vector<16x32xf32>
    %268 = arith.subf %255, %267 : vector<16x32xf32>
    %cst_95 = arith.constant 9.99999974E-6 : f32
    %269 = vector.broadcast %cst_95 : f32 to vector<16x1xf32>
    %270 = arith.addf %266, %269 : vector<16x1xf32>
    %271 = math.rsqrt %270 : vector<16x1xf32>
    %272 = vector.broadcast %271 : vector<16x1xf32> to vector<16x32xf32>
    %273 = arith.mulf %268, %272 : vector<16x32xf32>
    %274 = vector.broadcast %9 : vector<1x32xf32> to vector<16x32xf32>
    %275 = arith.mulf %273, %274 : vector<16x32xf32>
    %276 = vector.broadcast %10 : vector<1x32xf32> to vector<16x32xf32>
    %277 = arith.addf %275, %276 : vector<16x32xf32>
    %278 = vector.shape_cast %277 : vector<16x32xf32> to vector<1x16x32xf32>
    %c0_96 = arith.constant 0 : index
    %c0_97 = arith.constant 0 : index
    %c0_98 = arith.constant 0 : index
    %279 = vector.load %arg14[%c0_96, %c0_97, %c0_98] : memref<1x16x32xf32, #tpu.memory_space<vmem>>, vector<1x16x32xf32>
    tpu.vector_store %arg14[%c0_96, %c0_97, %c0_98], %278 {strides = array<i32>} : memref<1x16x32xf32, #tpu.memory_space<vmem>>, vector<1x16x32xf32>,
    return
  }
  func.func @transform_0(%arg0: i32) -> (i32, i32, i32) {
    %c0_i32 = arith.constant 0 : i32
    %c0_i32_0 = arith.constant 0 : i32
    %c0_i32_1 = arith.constant 0 : i32
    return %arg0, %c0_i32, %c0_i32_0 : i32, i32, i32
  }
  func.func @transform_1(%arg0: i32) -> (i32, i32, i32) {
    %c0_i32 = arith.constant 0 : i32
    %c0_i32_0 = arith.constant 0 : i32
    %c0_i32_1 = arith.constant 0 : i32
    return %arg0, %c0_i32, %c0_i32_0 : i32, i32, i32
  }
  func.func @transform_2(%arg0: i32) -> (i32, i32) {
    %c0_i32 = arith.constant 0 : i32
    %c0_i32_0 = arith.constant 0 : i32
    %c0_i32_1 = arith.constant 0 : i32
    return %c0_i32, %c0_i32_0 : i32, i32
  }
  func.func @transform_3(%arg0: i32) -> (i32, i32) {
    %c0_i32 = arith.constant 0 : i32
    %c0_i32_0 = arith.constant 0 : i32
    %c0_i32_1 = arith.constant 0 : i32
    return %c0_i32, %c0_i32_0 : i32, i32
  }
  func.func @transform_4(%arg0: i32) -> (i32, i32) {
    %c0_i32 = arith.constant 0 : i32
    %c0_i32_0 = arith.constant 0 : i32
    %c0_i32_1 = arith.constant 0 : i32
    return %c0_i32, %c0_i32_0 : i32, i32
  }
  func.func @transform_5(%arg0: i32) -> (i32, i32) {
    %c0_i32 = arith.constant 0 : i32
    %c0_i32_0 = arith.constant 0 : i32
    %c0_i32_1 = arith.constant 0 : i32
    return %c0_i32, %c0_i32_0 : i32, i32
  }
  func.func @transform_6(%arg0: i32) -> (i32, i32) {
    %c0_i32 = arith.constant 0 : i32
    %c0_i32_0 = arith.constant 0 : i32
    %c0_i32_1 = arith.constant 0 : i32
    return %c0_i32, %c0_i32_0 : i32, i32
  }
  func.func @transform_7(%arg0: i32) -> (i32, i32) {
    %c0_i32 = arith.constant 0 : i32
    %c0_i32_0 = arith.constant 0 : i32
    %c0_i32_1 = arith.constant 0 : i32
    return %c0_i32, %c0_i32_0 : i32, i32
  }
  func.func @transform_8(%arg0: i32) -> (i32, i32) {
    %c0_i32 = arith.constant 0 : i32
    %c0_i32_0 = arith.constant 0 : i32
    %c0_i32_1 = arith.constant 0 : i32
    return %c0_i32, %c0_i32_0 : i32, i32
  }
  func.func @transform_9(%arg0: i32) -> (i32, i32) {
    %c0_i32 = arith.constant 0 : i32
    %c0_i32_0 = arith.constant 0 : i32
    %c0_i32_1 = arith.constant 0 : i32
    return %c0_i32, %c0_i32_0 : i32, i32
  }
  func.func @transform_10(%arg0: i32) -> (i32, i32) {
    %c0_i32 = arith.constant 0 : i32
    %c0_i32_0 = arith.constant 0 : i32
    %c0_i32_1 = arith.constant 0 : i32
    return %c0_i32, %c0_i32_0 : i32, i32
  }
  func.func @transform_11(%arg0: i32) -> (i32, i32) {
    %c0_i32 = arith.constant 0 : i32
    %c0_i32_0 = arith.constant 0 : i32
    %c0_i32_1 = arith.constant 0 : i32
    return %c0_i32, %c0_i32_0 : i32, i32
  }
  func.func @transform_12(%arg0: i32) -> (i32, i32) {
    %c0_i32 = arith.constant 0 : i32
    %c0_i32_0 = arith.constant 0 : i32
    %c0_i32_1 = arith.constant 0 : i32
    return %c0_i32, %c0_i32_0 : i32, i32
  }
  func.func @transform_13(%arg0: i32) -> (i32, i32, i32) {
    %c0_i32 = arith.constant 0 : i32
    %c0_i32_0 = arith.constant 0 : i32
    %c0_i32_1 = arith.constant 0 : i32
    return %arg0, %c0_i32, %c0_i32_0 : i32, i32, i32
  }
}

</mosaic_0001>

<bundles_post_ra>
// kernel: tpu_custom_call.1
= control target key start
LH: loop header
LB: loop body
LE: loop exit
PB: predicated region body
PF: predicated region fallthrough
CT: control target
= control target key end

     0   :  { %s5220_s0 = inlined_call_operand.vmem [shape: f32[2,16,32], index: 0, kind: input, shape index: {}]   ;;  %s5221_s1 = inlined_call_operand.vmem [shape: f32[2,16,32], index: 1, kind: input, shape index: {}]   ;;  %s5222_s2 = inlined_call_operand.vmem [shape: f32[32,32], index: 2, kind: input, shape index: {}]   ;;  %s5223_s3 = inlined_call_operand.vmem [shape: f32[32,32], index: 3, kind: input, shape index: {}]   ;;  %s5224_s4 = inlined_call_operand.vmem [shape: f32[32,64], index: 4, kind: input, shape index: {}]   ;;  %s5225_s5 = inlined_call_operand.vmem [shape: f32[64,32], index: 5, kind: input, shape index: {}]   ;;  %s5226_s6 = inlined_call_operand.hbm [shape: f32[32,32], index: 6, kind: input, shape index: {}]   ;;  %s5227_s7 = inlined_call_operand.hbm [shape: f32[32,32], index: 7, kind: input, shape index: {}]   ;;  %s5228_s8 = inlined_call_operand.hbm [shape: f32[32,64], index: 8, kind: input, shape index: {}]   ;;  %s5229_s9 = inlined_call_operand.vmem [shape: f32[64,32], index: 9, kind: input, shape index: {}]   ;;  %s5230_s10 = inlined_call_operand.hbm [shape: f32[32,32], index: 10, kind: input, shape index: {}]   ;;  %s5231_s11 = inlined_call_operand.hbm [shape: f32[32,32], index: 11, kind: input, shape index: {}]   ;;  %s5232_s12 = inlined_call_operand.vmem [shape: f32[8,32], index: 12, kind: input, shape index: {}]   ;;  %s5233_s13 = inlined_call_operand.hbm [shape: f32[2,16,32], index: 13, kind: output, shape index: {}]  }
   0x1   :  { %5240 = sst [smem:[#allocation21_spill]] %s5227_s7 }
   0x2   :  { %18 = vsyncpa [#allocation3], 0 }
   0x3   :  { %19 = vsyncpa [#allocation6], 0 }
   0x4   :  { %20 = vsyncpa [#allocation9], 0 }
   0x5   :  { %21 = vsyncpa [#allocation4], 0 }
   0x6   :  { %23 = vsyncpa [#allocation4 + $0x1], 0  ;;  %s4473_s25 = smov 0   ;;  %s4475_s26 = smov 0  }
   0x7   :  { %s4477_s27 = smov 0   ;;  %s4479_s28 = smov 0  }
   0x8 LB: > { %5241 = sst [smem:[#allocation16_spill]] %s4375_s25  ;;  %s4494_s29 = sadd.s32 4294967295, %s4387_s28   ;;  %s4387_s28 = sphi %s4479_s28, %s5260_s28   ;;  %s4383_s27 = sphi %s4477_s27, %s5262_s27   ;;  %s4379_s26 = sphi %s4475_s26, %s5264_s26   ;;  %s4375_s25 = sphi %s4473_s25, %s5263_s25  }
   0x9   : > { %5242 = sst [smem:[#allocation17_spill]] %s4383_s27  ;;  %s3506_s30 = sadd.s32 4294967294, %s4387_s28  }
   0xa   : > { %s4498_s14 = sadd.s32 1, %s4387_s28   ;;  %s319_s15 = sadd.s32 1, %s4383_s27 }
   0xb   : > { %5243 = sst [smem:[#allocation18_spill]] %s4498_s14  ;;  %s316_s16 = ssub.s32 %s4387_s28, %s4498_s14 }
   0xc   : > { %p329_p0 = scmp.ne.s32.totalorder %s4383_s27, %s4379_s26  ;;  %p317_p1 = scmp.eq.s32.totalorder %s316_s16, 0 }
   0xd   : > { %p330_p2 = scmp.eq.s32.totalorder %s4494_s29, 1  ;;  %p335_p3 = scmp.ne.s32.totalorder %s4379_s26, %s4375_s25 }
   0xe   : > { %p336_p4 = scmp.eq.s32.totalorder %s3506_s30, 1  ;;  %p3507_p7 = scmp.ge.s32.totalorder %s4387_s28, 1 }
   0xf   : > { %s4509_s17 = scalar_select %p317_p1, %s4383_s27, %s319_s15  }
  0x10   : > { %p4511_p5 = por %p330_p2, %p329_p0  ;;  %p4515_p6 = por %p336_p4, %p335_p3 }
  0x11   : > { %5244 = sst [smem:[#allocation19_spill]] %s4509_s17  ;;  %p343_p8 = scmp.lt.s32.totalorder %s4387_s28, 3 }
  0x12   : > { %s5246_s19 = scalar_select %p4515_p6, 1, 0 }
  0x13   : > { %p5239_p9 = scmp.eq.s32.totalorder %s4494_s29, 0  ;;  %p4522_p10 = pnand %p3507_p7, %p343_p8 }
  0x14   : > { %5247 = sst [smem:[#allocation20_spill]] %s5246_s19  ;;  %s4389_s21 = smov [#allocation5]  }
  0x15   : > { %p4065_p11 = pneg %p4522_p10  ;;  %s380_s22 = sshll.u32 %s4389_s21, 4  ;;  %s381_s22 = int_to_ptr.vmem [resolvable:$true] %s380_s22 }
  0x16   : > { %s4390_s24 = smov [#allocation8]   ;;  %s4391_s15 = smov [#allocation2]  }
  0x17   : > { %p4530_p12 = pnand %p5239_p9, %p4065_p11  ;;  %s409_s30 = sshll.u32 %s4390_s24, 4  ;;  %s410_s30 = int_to_ptr.vmem [resolvable:$true] %s409_s30 }
  0x18   : > { %s367_s16 = sshll.u32 %s4391_s15, 4  ;;  %s4196_s27 = scalar_lea.vmem %s381_s22, 512  ;;  %s368_s16 = int_to_ptr.vmem [resolvable:$true] %s367_s16 }
  0x19   : > { %p4536_p13 = pneg %p4530_p12  ;;  %p4197_p0 = scmp.ne.s32.totalorder %s381_s22, %s4196_s27 }
  0x1a   : > { %p4204_p3 = scmp.lt.s32.totalorder %s381_s22, %s381_s22  ;;  %p4205_p4 = scmp.lt.s32.totalorder %s4196_s27, %s4196_s27 }
  0x1b   : > { %p4199_p1 = pnand %p4197_p0, %p4536_p13 }
  0x1c   : > { %p4206_p7 = por %p4205_p4, %p4204_p3 }
  0x1d   : > { %p4200_p2 = pneg %p4199_p1 }
  0x1f   : > { %p4207_p8 = pnand %p4206_p7, %p4200_p2 }
  0x21   : > { %4210 = shalt.err (!%p4207_p8)
}
  0x22   : > { %s4392_s21 = smov 128   ;;  %s4393_s24 = smov 8  }
  0x23   : > { %s5251_s7 = sld [smem:[#allocation21_spill]]  ;;  %s4222_s19 = scalar_lea.vmem %s410_s30, 512 }
  0x24   : > { %p4223_p11 = scmp.ne.s32.totalorder %s410_s30, %s4222_s19  ;;  %p4230_p3 = scmp.lt.s32.totalorder %s410_s30, %s410_s30 }
  0x25   : > { %p4231_p2 = scmp.lt.s32.totalorder %s4222_s19, %s4222_s19 }
  0x26   : > { %p4225_p0 = pnand %p4223_p11, %p4536_p13 }
  0x27   : > { %p4232_p4 = por %p4231_p2, %p4230_p3 }
  0x28   : > { %p4226_p1 = pneg %p4225_p0 }
  0x29   : > { %4071 = dma.hbm_to_vmem [thread:$0]  (!%p4530_p12), %s5251_s7, 512, %s381_s22, [#allocation6], %s4392_s21, %s4392_s21, %s4393_s24  }
  0x2a   : > { %p4233_p7 = pnand %p4232_p4, %p4226_p1 }
  0x2c   : > { %4236 = shalt.err (!%p4233_p7)
}
  0x2d   : > { %4077 = dma.hbm_to_vmem [thread:$0]  (!%p4530_p12), %s5230_s10, 512, %s410_s30, [#allocation9], %s4392_s21, %s4392_s21, %s4393_s24  }
  0x2e   : > { %s4248_s14 = scalar_lea.vmem %s368_s16, 512  ;;  %p4256_p9 = scmp.lt.s32.totalorder %s368_s16, %s368_s16 }
  0x2f   : > { %p4249_p8 = scmp.ne.s32.totalorder %s368_s16, %s4248_s14  ;;  %p4257_p3 = scmp.lt.s32.totalorder %s4248_s14, %s4248_s14 }
  0x31   : > { %p4251_p11 = pnand %p4249_p8, %p4536_p13  ;;  %p4258_p1 = por %p4257_p3, %p4256_p9 }
  0x33   : > { %p4252_p0 = pneg %p4251_p11 }
  0x35   : > { %p4259_p2 = pnand %p4258_p1, %p4252_p0 }
  0x37   : > { %4262 = shalt.err (!%p4259_p2)
}
  0x38   : > { %4068 = dma.hbm_to_vmem [thread:$0]  (!%p4530_p12), %s5226_s6, 512, %s368_s16, [#allocation3], %s4392_s21, %s4392_s21, %s4393_s24  }
  0x39   : > { %s4394_s22 = smov [#allocation7]   ;;  %s4395_s15 = smov [#allocation10]  }
  0x3a   : > { %s393_s30 = sshll.u32 %s4394_s22, 4  ;;  %s422_s27 = sshll.u32 %s4395_s15, 4  ;;  %s394_s30 = int_to_ptr.vmem [resolvable:$true] %s393_s30  ;;  %s423_s27 = int_to_ptr.vmem [resolvable:$true] %s422_s27 }
  0x3b   : > { %s4274_s7 = scalar_lea.vmem %s394_s30, 512  ;;  %p4282_p8 = scmp.lt.s32.totalorder %s394_s30, %s394_s30 }
  0x3c   : > { %p4275_p4 = scmp.ne.s32.totalorder %s394_s30, %s4274_s7  ;;  %p4283_p11 = scmp.lt.s32.totalorder %s4274_s7, %s4274_s7 }
  0x3e   : > { %p4277_p9 = pnand %p4275_p4, %p4536_p13  ;;  %p4284_p0 = por %p4283_p11, %p4282_p8 }
  0x40   : > { %p4278_p7 = pneg %p4277_p9 }
  0x42   : > { %p4285_p3 = pnand %p4284_p0, %p4278_p7 }
  0x44   : > { %4288 = shalt.err (!%p4285_p3)
}
  0x45   : > { %4074 = dma.hbm_to_vmem [thread:$0]  (!%p4530_p12), %s5228_s8, 512, %s394_s30, [#allocation6], %s4392_s21, %s4392_s21, %s4393_s24  }
  0x46   : > { %s4300_s19 = scalar_lea.vmem %s423_s27, 512  ;;  %p4308_p9 = scmp.lt.s32.totalorder %s423_s27, %s423_s27 }
  0x47   : > { %p4301_p1 = scmp.ne.s32.totalorder %s423_s27, %s4300_s19  ;;  %p4309_p8 = scmp.lt.s32.totalorder %s4300_s19, %s4300_s19 }
  0x49   : > { %p4303_p2 = pnand %p4301_p1, %p4536_p13  ;;  %p4310_p7 = por %p4309_p8, %p4308_p9 }
  0x4b   : > { %p4304_p4 = pneg %p4303_p2 }
  0x4d   : > { %p4311_p11 = pnand %p4310_p7, %p4304_p4 }
  0x4f   : > { %4314 = shalt.err (!%p4311_p11)
}
  0x50   : > { %4080 = dma.hbm_to_vmem [thread:$0]  (!%p4530_p12), %s5231_s11, 512, %s423_s27, [#allocation9], %s4392_s21, %s4392_s21, %s4393_s24  }
  0x51   : > { %457 = sbr.rel (%p4522_p10) target bundleno = 5403 (0x151b), region = 72  ;;  %p5252_p13 = scmp.eq.s32.totalorder (!%p4522_p10), %s4494_s29, 0 }
  0x56   : > { %4358 = dma.done.wait (%p5252_p13), [#allocation3], 512   ;;  %p5253_p0 = pmov %p5252_p13 }
  0x58   : > { %4360 = vsyncadd (%p5253_p0), [#allocation3], 4294966784  ;;  %p5254_p3 = pmov %p5253_p0 }
  0x59   : > { %p5255_p1 = pmov %p5253_p0 }
  0x5a   : > { %4362 = dma.done.wait (%p5254_p3), [#allocation6], 1024  }
  0x5b   : > { %4364 = vsyncadd (%p5255_p1), [#allocation6], 4294966272  ;;  %p5256_p2 = pmov %p5253_p0 }
  0x5c   : > { %p5257_p12 = pmov %p5253_p0 }
  0x5d   : > { %4366 = dma.done.wait (%p5256_p2), [#allocation9], 1024  }
  0x5e   : > { %4368 = vsyncadd (%p5257_p12), [#allocation9], 4294966272  ;;  %p522_p10 = scmp.lt.s32.totalorder %s4494_s29, 1  ;;  %vm557_vm0 = vcmask 261120   ;;  %v544_v0 = vld [vmem:[%s5223_s3 + $0x18] sm:$0xff]  ;;  %v543_v1 = vld [vmem:[%s5223_s3 + $0x10] sm:$0xff] }
  0x5f   : > { %3733 = vmatprep.subr.mxu0 %v544_v0  ;;  %v542_v3 = vld [vmem:[%s5223_s3 + $0x8] sm:$0xff]  ;;  %v548_v4 = vld [vmem:[%s5224_s4 + $0x18] sm:$0xff]  ;;  %v547_v5 = vld [vmem:[%s5224_s4 + $0x10] sm:$0xff]  ;;  %v4396_v10 = vmov 0.0   ;;  %vm4397_vm1 = vmmov 0   ;;  %vm784_vm2 = vcmask 130048  }
  0x60   : > { %s4606_s17 = scalar_select %p522_p10, %s4494_s29, 1  ;;  %3734 = vmatpush3.msra.mxu0 %v544_v0  ;;  %v541_v6 = vld [vmem:[%s5223_s3] sm:$0xff]  ;;  %3744 = vmatprep.subr.mxu1 %v548_v4  ;;  %v546_v7 = vld [vmem:[%s5224_s4 + $0x8] sm:$0xff]  ;;  %v4646_v9 = vld [vmem:[%s5222_s2 + $0x18] sm:$0xff] }
  0x61   : > { %3735 = vmatprep.subr.mxu0 %v543_v1  ;;  %3745 = vmatpush3.msra.mxu1 %v548_v4  ;;  %v4654_v11 = vld [vmem:[%s5222_s2 + $0x10] sm:$0xff]  ;;  %v545_v12 = vld [vmem:[%s5224_s4] sm:$0xff]  ;;  %v4666_v13 = vld [vmem:[%s5222_s2 + $0x8] sm:$0xff]  ;;  %s4398_s30 = smov 112   ;;  %s4399_s15 = smov 96  }
  0x62   : > { %s3586_s20 = sshll.u32 %s4606_s17, 4  ;;  %3736 = vmatpush3.msra.mxu0 %v543_v1  ;;  %3746 = vmatprep.subr.mxu1 %v547_v5  ;;  %v4673_v14 = vld [vmem:[%s5222_s2] sm:$0xff]  ;;  %v4738_v41 = vld [vmem:[%s5225_s5 + $0x18] sm:$0xff]  ;;  %v4743_v42 = vld [vmem:[%s5225_s5 + $0x10] sm:$0xff]  ;;  %s3588_s14 = sshll.u32 %s4494_s29, 8 }
  0x63   : > { %s526_s24 = scalar_lea.vmem %s5220_s0, %s3586_s20  ;;  %3737 = vmatprep.subr.mxu0 %v542_v3  ;;  %3747 = vmatpush3.msra.mxu1 %v547_v5  ;;  %v4750_v43 = vld [vmem:[%s5225_s5 + $0x8] sm:$0xff]  ;;  %v4757_v44 = vld [vmem:[%s5225_s5] sm:$0xff]  ;;  %v4777_v52 = vld [vmem:[%s5225_s5 + $0x38] sm:$0xff]  ;;  %s531_s21 = scalar_lea.vmem %s5221_s1, %s3586_s20 }
  0x64   : > { %v4620_v2 = vld [vmem:[%s526_s24] sm:$0xff]  ;;  %3738 = vmatpush3.msra.mxu0 %v542_v3  ;;  %v4641_v8 = vld [vmem:[%s526_s24 + $0x8] sm:$0xff]  ;;  %3748 = vmatprep.subr.mxu1 %v546_v7  ;;  %v4783_v53 = vld [vmem:[%s5225_s5 + $0x30] sm:$0xff]  ;;  %s5175_s23 = scalar_lea.hbm %s5233_s13, %s3588_s14  ;;  %s4400_s17 = smov [#allocation11]  }
  0x65   : > { %3741 = vmatprep.mubr.msk.f32.mxu0 %vm557_vm0, %v4620_v2  ;;  %3752 = vmatprep.mubr.msk.f32.mxu1 %vm557_vm0, %v4620_v2  ;;  %v4792_v54 = vld [vmem:[%s5225_s5 + $0x28] sm:$0xff]  ;;  %v4799_v55 = vld [vmem:[%s5225_s5 + $0x20] sm:$0xff]  ;;  %s4319_s20 = sshll.u32 %s4400_s17, 4  ;;  %s4320_s20 = int_to_ptr.vmem [resolvable:$false] %s4319_s20 }
  0x66   : > { %3739 = vmatprep.subr.mxu0 %v541_v6  ;;  %3749 = vmatpush3.msra.mxu1 %v546_v7 }
  0x67   : > { %3740 = vmatpush3.msra.mxu0 %v541_v6  ;;  %3750 = vmatprep.subr.mxu1 %v545_v12 }
  0x68   : > { %3742 = vmatmul.mubr.msk.f32.vlgmr.msra.gmra.mxu0 %vm557_vm0, %v4641_v8  ;;  %3755 = vmatprep.subr.mxu0 %v4396_v10 }
  0x69   : > { %3756 = vmatpush3.msra.mxu0 %v4646_v9  ;;  %3763 = vmatprep.mubr.msk.f32.mxu0 %vm4397_vm1, %v4396_v10 }
  0x6a   : > { %3757 = vmatprep.subr.mxu0 %v4396_v10  ;;  %3751 = vmatpush3.msra.mxu1 %v545_v12 }
  0x6b   : > { %3758 = vmatpush3.msra.mxu0 %v4654_v11  ;;  %3766 = vmatprep.subr.mxu1 %v4396_v10 }
  0x6c   : > { %3759 = vmatprep.subr.mxu0 %v4396_v10  ;;  %3753 = vmatmul.mubr.msk.f32.vlgmr.msra.gmra.mxu1 %vm557_vm0, %v4641_v8 }
  0x6d   : > { %3760 = vmatpush3.msra.mxu0 %v4666_v13  ;;  %3770 = vmatprep.mubr.msk.f32.mxu1 %vm4397_vm1, %v4396_v10 }
  0x6e   : > { %3761 = vmatprep.subr.mxu0 %v4396_v10 }
  0x6f   : > { %3762 = vmatpush3.msra.mxu0 %v4673_v14 }
  0x70   : > { %3764 = vmatmul.mubr.msk.f32.vlgmr.msra.gmra.mxu0 %vm557_vm0, %v4620_v2  ;;  %3773 = vmatprep.subr.mxu0 %v4396_v10 }
  0x71   : > { %3777 = vmatprep.mubr.msk.f32.mxu0 %vm4397_vm1, %v4396_v10 }
 0x128   : > { %v4688_v15 = vpop.f32.mrf.mxu0 }
 0x129   : > { %952 = vrot.lane.b32.xlu0 %v4688_v15, %s4398_s30  ;;  %3767 = vmatpush3.xpose.msk.msra.mxu1 %vm784_vm2, %v4688_v15 }
 0x12a   : > { %3768 = vmatprep.subr.mxu1 %v4396_v10  ;;  %v4695_v16 = vpop.f32.mrf.mxu0 }
 0x12c   : > { %v4702_v17 = vpop.f32.mrf.mxu1 }
 0x12d   : > { %950 = vrot.lane.b32.xlu0 %v4695_v16, %s4398_s30  ;;  %3769 = vmatpush3.xpose.msk.msra.mxu1 %vm784_vm2, %v4695_v16 }
 0x12e   : > { %3780 = vmatprep.subr.mxu1 %v4396_v10  ;;  %3774 = vmatpush3.msra.mxu0 %v4702_v17  ;;  %v4708_v19 = vpop.f32.mrf.mxu1 }
 0x12f   : > { %3775 = vmatprep.subr.mxu0 %v4396_v10 }
 0x130   : > { %v780_v18 = vpop.f32.mrf.mxu0  ;;  %3776 = vmatpush3.msra.mxu0 %v4708_v19 }
 0x131   : > { %948 = vrot.lane.b32.xlu1 %v780_v18, %s4398_s30  ;;  %3771 = vmatmul.mubr.msk.f32.vlgmr.msra.gmra.mxu1 %vm784_vm2, %v780_v18 }
 0x132   : > { %v3765_v20 = vpop.f32.mrf.mxu0  ;;  %3784 = vmatprep.mubr.msk.f32.mxu1 %vm4397_vm1, %v4396_v10  ;;  %3787 = vmatprep.subr.mxu0 %v4396_v10 }
 0x19b   : > { %v4714_v21 = vpop.permute.xlu0 %952 }
 0x19c   : > { %3781 = vmatpush3.xpose.msk.msra.mxu1 %vm784_vm2, %v4714_v21 }
 0x19d   : > { %3782 = vmatprep.subr.mxu1 %v4396_v10 }
 0x19f   : > { %v4719_v22 = vpop.permute.xlu0 %950 }
 0x1a0   : > { %3783 = vmatpush3.xpose.msk.msra.mxu1 %vm784_vm2, %v4719_v22 }
 0x1a1   : > { %3805 = vmatprep.subr.mxu1 %v4396_v10 }
 0x1a3   : > { %v949_v23 = vpop.permute.xlu1 %948 }
 0x1a4   : > { %3785 = vmatmul.mubr.msk.f32.vlgmr.msra.gmra.mxu1 %vm784_vm2, %v949_v23 }
 0x1a5   : > { %3813 = vmatprep.mubr.msk.f32.mxu1 %vm4397_vm1, %v4396_v10  ;;  %3806 = vmatpush3.msra.mxu1 %v4738_v41 }
 0x1a6   : > { %3807 = vmatprep.subr.mxu1 %v4396_v10 }
 0x1a7   : > { %3808 = vmatpush3.msra.mxu1 %v4743_v42 }
 0x1a8   : > { %3809 = vmatprep.subr.mxu1 %v4396_v10 }
 0x1a9   : > { %3810 = vmatpush3.msra.mxu1 %v4750_v43 }
 0x1aa   : > { %3811 = vmatprep.subr.mxu1 %v4396_v10 }
 0x1ab   : > { %3812 = vmatpush3.msra.mxu1 %v4757_v44 }
 0x1ac   : > { %3827 = vmatprep.subr.mxu1 %v4396_v10 }
 0x1f1   : > { %v860_v24 = vpop.f32.mrf.mxu1 }
 0x1f2   : > { %v864_v25 = vsel %vm784_vm2, %v860_v24, -inf }
 0x1f3   : > { %865 = vmax.xlane.f32.xlu1 %v864_v25  ;;  %v3772_v26 = vpop.f32.mrf.mxu1 }
 0x264   : > { %v1026_v27 = vpop.f32.mrf.mxu1 }
 0x265   : > { %v1030_v28 = vsel %vm784_vm2, %v1026_v27, -inf }
 0x266   : > { %1031 = vmax.xlane.f32.xlu0 %v1030_v28  ;;  %v3786_v29 = vpop.f32.mrf.mxu1 }
 0x27c   : > { %v866_v30 = vpop.xlane.xlu1 %865 }
 0x27d   : > { %v867_v31 = vsub.f32 %v860_v24, %v866_v30 }
 0x27f   : > { %v868_v32 = vmul.f32 1.442695, %v867_v31 }
 0x281   : > { %4141 = vpow2.f32 %v868_v32 }
 0x28e   : > { %v4142_v33 = vpop.eup %4141 }
 0x28f   : > { %v870_v34 = vsel %vm784_vm2, %v4142_v33, 0.0 }
 0x290   : > { %871 = vadd.xlane.f32.xlu0 %v870_v34 }
 0x2a6   : > { %1045 = vrot.lane.b32.xlu0 %v4702_v17, %s4399_s15 }
 0x2ef   : > { %v1032_v35 = vpop.xlane.xlu0 %1031 }
 0x2f0   : > { %v1033_v36 = vsub.f32 %v1026_v27, %v1032_v35  ;;  %v1847_v35 = vld [vmem:[#allocation5 + $0x18] sm:$0xff] }
 0x2f2   : > { %v1034_v37 = vmul.f32 1.442695, %v1033_v36 }
 0x2f4   : > { %4143 = vpow2.f32 %v1034_v37  ;;  %v534_v37 = vld [vmem:[%s531_s21] sm:$0xff] }
 0x301   : > { %v4144_v38 = vpop.eup %4143 }
 0x302   : > { %v1036_v39 = vsel %vm784_vm2, %v4144_v38, 0.0 }
 0x303   : > { %1037 = vadd.xlane.f32.xlu1 %v1036_v39  ;;  %v1851_v39 = vld [vmem:[#allocation7 + $0x18] sm:$0xff] }
 0x314   : > { %1043 = vrot.lane.b32.xlu1 %v4708_v19, %s4399_s15 }
 0x319   : > { %v872_v40 = vpop.xlane.xlu0 %871 }
 0x31a   : > { %4145 = vrcp.f32 %v872_v40 }
 0x31d   : > { %v4763_v47 = vpop.permute.xlu0 %1045 }
 0x327   : > { %v4146_v45 = vpop.eup %4145 }
 0x328   : > { %v874_v46 = vmul.f32 %v4146_v45, %v4142_v33 }
 0x32a   : > { %3778 = vmatmul.mubr.msk.f32.vlgmr.msra.gmra.mxu0 %vm784_vm2, %v874_v46  ;;  %v1846_v46 = vld [vmem:[#allocation5 + $0x10] sm:$0xff] }
 0x32b   : > { %3788 = vmatpush3.msra.mxu0 %v4763_v47  ;;  %3791 = vmatprep.mubr.msk.f32.mxu0 %vm4397_vm1, %v4396_v10 }
 0x32c   : > { %3789 = vmatprep.subr.mxu0 %v4396_v10 }
 0x38c   : > { %v1038_v48 = vpop.xlane.xlu1 %1037 }
 0x38d   : > { %4147 = vrcp.f32 %v1038_v48  ;;  %v1845_v48 = vld [vmem:[#allocation5 + $0x8] sm:$0xff] }
 0x390   : > { %v4770_v49 = vpop.permute.xlu1 %1043 }
 0x391   : > { %3790 = vmatpush3.msra.mxu0 %v4770_v49 }
 0x392   : > { %3794 = vmatprep.subr.mxu0 %v4396_v10 }
 0x39a   : > { %v4148_v50 = vpop.eup %4147 }
 0x39b   : > { %v1040_v51 = vmul.f32 %v4148_v50, %v4144_v38 }
 0x39d   : > { %3792 = vmatmul.mubr.msk.f32.vlgmr.msra.gmra.mxu0 %vm784_vm2, %v1040_v51  ;;  %v1844_v51 = vld [vmem:[#allocation5] sm:$0xff] }
 0x39e   : > { %3795 = vmatpush3.msra.mxu0 %v4777_v52  ;;  %3802 = vmatprep.mubr.msk.f32.mxu0 %vm4397_vm1, %v4396_v10 }
 0x39f   : > { %3796 = vmatprep.subr.mxu0 %v4396_v10 }
 0x3a0   : > { %3797 = vmatpush3.msra.mxu0 %v4783_v53 }
 0x3a1   : > { %3798 = vmatprep.subr.mxu0 %v4396_v10 }
 0x3a2   : > { %3799 = vmatpush3.msra.mxu0 %v4792_v54 }
 0x3a3   : > { %3800 = vmatprep.subr.mxu0 %v4396_v10 }
 0x3a4   : > { %3801 = vmatpush3.msra.mxu0 %v4799_v55 }
 0x3a5   : > { %3816 = vmatprep.subr.mxu0 %v4396_v10 }
 0x3ea   : > { %v944_v56 = vpop.f32.mrf.mxu0 }
 0x3eb   : > { %3814 = vmatmul.mubr.msk.f32.vlgmr.msra.gmra.mxu1 %vm557_vm0, %v944_v56 }
 0x3ec   : > { %3828 = vmatpush3.xpose.msk.msra.mxu1 %vm784_vm2, %v4688_v15  ;;  %v3779_v57 = vpop.f32.mrf.mxu0  ;;  %3831 = vmatprep.mubr.msk.f32.mxu1 %vm4397_vm1, %v4396_v10 }
 0x3ed   : > { %3829 = vmatprep.subr.mxu1 %v4396_v10 }
 0x3f0   : > { %3830 = vmatpush3.xpose.msk.msra.mxu1 %vm784_vm2, %v4695_v16 }
 0x3f1   : > { %3841 = vmatprep.subr.mxu1 %v4396_v10 }
 0x45d   : > { %v1118_v58 = vpop.f32.mrf.mxu0 }
 0x45e   : > { %3803 = vmatmul.mubr.msk.f32.vlgmr.msra.gmra.mxu0 %vm557_vm0, %v1118_v58  ;;  %v4907_v58 = vld [vmem:[#allocation2 + $0x10] sm:$0xff] }
 0x45f   : > { %3817 = vmatpush3.msra.mxu0 %v4646_v9  ;;  %v3793_v59 = vpop.f32.mrf.mxu0  ;;  %3824 = vmatprep.mubr.msk.f32.mxu0 %vm4397_vm1, %v4396_v10 }
 0x460   : > { %3818 = vmatprep.subr.mxu0 %v4396_v10  ;;  %v4913_v59 = vld [vmem:[#allocation2 + $0x8] sm:$0xff] }
 0x461   : > { %3819 = vmatpush3.msra.mxu0 %v4654_v11 }
 0x462   : > { %3820 = vmatprep.subr.mxu0 %v4396_v10 }
 0x463   : > { %3821 = vmatpush3.msra.mxu0 %v4666_v13 }
 0x464   : > { %3822 = vmatprep.subr.mxu0 %v4396_v10 }
 0x465   : > { %3823 = vmatpush3.msra.mxu0 %v4673_v14 }
 0x466   : > { %3825 = vmatmul.mubr.msk.f32.vlgmr.msra.gmra.mxu0 %vm557_vm0, %v4641_v8  ;;  %3834 = vmatprep.subr.mxu0 %v4396_v10 }
 0x467   : > { %3835 = vmatpush3.msra.mxu0 %v4702_v17  ;;  %3838 = vmatprep.mubr.msk.f32.mxu0 %vm4397_vm1, %v4396_v10 }
 0x468   : > { %3836 = vmatprep.subr.mxu0 %v4396_v10 }
 0x469   : > { %3837 = vmatpush3.msra.mxu0 %v4708_v19 }
 0x46a   : > { %3848 = vmatprep.subr.mxu0 %v4396_v10 }
 0x4ab   : > { %v1264_v60 = vpop.f32.mrf.mxu1 }
 0x4ad   : > { %v3815_v61 = vpop.f32.mrf.mxu1 }
 0x51e   : > { %v1191_v62 = vpop.f32.mrf.mxu0 }
 0x51f   : > { %v1265_v7 = vadd.f32 %v1264_v60, %v1191_v62  ;;  %v4921_v62 = vld [vmem:[#allocation2] sm:$0xff] }
 0x520   : > { %v3804_v63 = vpop.f32.mrf.mxu0 }
 0x521   : > { %v1799_v12 = vadd.f32 %v1265_v7, %v4620_v2 }
 0x523   : > { %v1801_v14 = vsel %vm557_vm0, %v1799_v12, 0.0 }
 0x526   : > { %v1334_v0 = vpop.f32.mrf.mxu0 }
 0x527   : > { %1495 = vrot.lane.b32.xlu1 %v1334_v0, %s4398_s30  ;;  %3832 = vmatmul.mubr.msk.f32.vlgmr.msra.gmra.mxu1 %vm784_vm2, %v1334_v0  ;;  %v1850_v0 = vld [vmem:[#allocation7 + $0x10] sm:$0xff] }
 0x528   : > { %3842 = vmatpush3.xpose.msk.msra.mxu1 %vm784_vm2, %v4714_v21  ;;  %v3826_v1 = vpop.f32.mrf.mxu0  ;;  %3845 = vmatprep.mubr.msk.f32.mxu1 %vm4397_vm1, %v4396_v10 }
 0x529   : > { %3843 = vmatprep.subr.mxu1 %v4396_v10  ;;  %v1849_v1 = vld [vmem:[#allocation7 + $0x8] sm:$0xff] }
 0x52c   : > { %3844 = vmatpush3.xpose.msk.msra.mxu1 %vm784_vm2, %v4719_v22 }
 0x52d   : > { %3866 = vmatprep.subr.mxu1 %v4396_v10 }
 0x599   : > { %v1496_v3 = vpop.permute.xlu1 %1495 }
 0x59a   : > { %3846 = vmatmul.mubr.msk.f32.vlgmr.msra.gmra.mxu1 %vm784_vm2, %v1496_v3  ;;  %v1848_v3 = vld [vmem:[#allocation7] sm:$0xff] }
 0x59b   : > { %3867 = vmatpush3.msra.mxu1 %v4738_v41  ;;  %3874 = vmatprep.mubr.msk.f32.mxu1 %vm4397_vm1, %v4396_v10 }
 0x59c   : > { %3868 = vmatprep.subr.mxu1 %v4396_v10 }
 0x59d   : > { %3869 = vmatpush3.msra.mxu1 %v4743_v42 }
 0x59e   : > { %3870 = vmatprep.subr.mxu1 %v4396_v10 }
 0x59f   : > { %3871 = vmatpush3.msra.mxu1 %v4750_v43  ;;  %v1828_v43 = vlaneseq }
 0x5a0   : > { %3872 = vmatprep.subr.mxu1 %v4396_v10 }
 0x5a1   : > { %3873 = vmatpush3.msra.mxu1 %v4757_v44  ;;  %v4888_v44 = vshrl.u32 %v1828_v43, 7  ;;  %v5022_v43 = vld [vmem:[%s5229_s9] sm:$0xff] }
 0x5a2   : > { %3888 = vmatprep.subr.mxu1 %v1851_v39 }
 0x5a3   : > { %v1836_v57 = vsub.s32 3, %v4888_v44 }
 0x5e7   : > { %v1407_v4 = vpop.f32.mrf.mxu1 }
 0x5e8   : > { %v1411_v5 = vsel %vm784_vm2, %v1407_v4, -inf }
 0x5e9   : > { %1412 = vmax.xlane.f32.xlu0 %v1411_v5  ;;  %v3833_v6 = vpop.f32.mrf.mxu1 }
 0x65a   : > { %v1565_v9 = vpop.f32.mrf.mxu1 }
 0x65b   : > { %v1569_v11 = vsel %vm784_vm2, %v1565_v9, -inf }
 0x65c   : > { %1570 = vmax.xlane.f32.xlu1 %v1569_v11  ;;  %v3847_v13 = vpop.f32.mrf.mxu1 }
 0x660   : > { %1802 = vadd.xlane.f32.xlu1 %v1801_v14 }
 0x672   : > { %v1413_v15 = vpop.xlane.xlu0 %1412 }
 0x673   : > { %v1414_v16 = vsub.f32 %v1407_v4, %v1413_v15 }
 0x675   : > { %v1415_v17 = vmul.f32 1.442695, %v1414_v16 }
 0x677   : > { %4149 = vpow2.f32 %v1415_v17 }
 0x684   : > { %v4150_v18 = vpop.eup %4149 }
 0x685   : > { %v1417_v19 = vsel %vm784_vm2, %v4150_v18, 0.0 }
 0x686   : > { %1418 = vadd.xlane.f32.xlu0 %v1417_v19 }
 0x6e5   : > { %v1571_v20 = vpop.xlane.xlu1 %1570 }
 0x6e6   : > { %v1572_v21 = vsub.f32 %v1565_v9, %v1571_v20 }
 0x6e8   : > { %v1573_v22 = vmul.f32 1.442695, %v1572_v21 }
 0x6e9   : > { %v1803_v23 = vpop.xlane.xlu1 %1802 }
 0x6ea   : > { %4151 = vpow2.f32 %v1573_v22  ;;  %v1808_v24 = vmul.f32 0.03125, %v1803_v23 }
 0x6ec   : > { %v4858_v2 = vsub.f32 %v1799_v12, %v1808_v24 }
 0x6ee   : > { %v1812_v27 = vmul.f32 %v4858_v2, %v4858_v2 }
 0x6f0   : > { %v1814_v28 = vsel %vm557_vm0, %v1812_v27, 0.0 }
 0x6f7   : > { %v4152_v25 = vpop.eup %4151 }
 0x6f8   : > { %v1575_v26 = vsel %vm784_vm2, %v4152_v25, 0.0 }
 0x6f9   : > { %1576 = vadd.xlane.f32.xlu0 %v1575_v26 }
 0x6fd   : > { %1815 = vadd.xlane.f32.xlu0 %v1814_v28 }
 0x70f   : > { %v1419_v29 = vpop.xlane.xlu0 %1418 }
 0x710   : > { %4153 = vrcp.f32 %v1419_v29 }
 0x71d   : > { %v4154_v30 = vpop.eup %4153 }
 0x71e   : > { %v1421_v31 = vmul.f32 %v4154_v30, %v4150_v18 }
 0x720   : > { %3839 = vmatmul.mubr.msk.f32.vlgmr.msra.gmra.mxu0 %vm784_vm2, %v1421_v31 }
 0x721   : > { %3849 = vmatpush3.msra.mxu0 %v4763_v47  ;;  %3852 = vmatprep.mubr.msk.f32.mxu0 %vm4397_vm1, %v4396_v10 }
 0x722   : > { %3850 = vmatprep.subr.mxu0 %v4396_v10 }
 0x723   : > { %3851 = vmatpush3.msra.mxu0 %v4770_v49  ;;  %v1830_v49 = vsub.s32 2, %v4888_v44 }
 0x724   : > { %3855 = vmatprep.subr.mxu0 %v4396_v10 }
 0x782   : > { %v1577_v32 = vpop.xlane.xlu0 %1576 }
 0x783   : > { %4155 = vrcp.f32 %v1577_v32 }
 0x786   : > { %v1816_v40 = vpop.xlane.xlu0 %1815 }
 0x787   : > { %v1820_v41 = vmul.f32 0.03125, %v1816_v40 }
 0x789   : > { %v1822_v42 = vadd.f32 1e-05, %v1820_v41  ;;  %v5003_v41 = vld [vmem:[%s5229_s9 + $0x18] sm:$0xff] }
 0x78b   : > { %4157 = vrsqrt.f32 %v1822_v42  ;;  %v5008_v42 = vld [vmem:[%s5229_s9 + $0x10] sm:$0xff] }
 0x790   : > { %v4156_v33 = vpop.eup %4155 }
 0x791   : > { %v1579_v34 = vmul.f32 %v4156_v33, %v4152_v25 }
 0x793   : > { %3853 = vmatmul.mubr.msk.f32.vlgmr.msra.gmra.mxu0 %vm784_vm2, %v1579_v34 }
 0x794   : > { %3856 = vmatpush3.msra.mxu0 %v4777_v52  ;;  %3863 = vmatprep.mubr.msk.f32.mxu0 %vm4397_vm1, %v4396_v10  ;;  %v4896_v52 = vld [vmem:[%s5232_s12] sm:$0xff] }
 0x795   : > { %3857 = vmatprep.subr.mxu0 %v4396_v10  ;;  %v4902_v56 = vrot.slane %v4896_v52, %v1830_v49  ;;  %v4917_v61 = vrot.slane %v4896_v52, %v1836_v57  ;;  %v5039_v57 = vld [vmem:[%s5229_s9 + $0x38] sm:$0xff] }
 0x796   : > { %3858 = vmatpush3.msra.mxu0 %v4783_v53  ;;  %v535_v53 = vld [vmem:[%s531_s21 + $0x8] sm:$0xff] }
 0x797   : > { %3859 = vmatprep.subr.mxu0 %v4396_v10 }
 0x798   : > { %3860 = vmatpush3.msra.mxu0 %v4792_v54  ;;  %v4158_v50 = vpop.eup %4157 }
 0x799   : > { %3861 = vmatprep.subr.mxu0 %v4396_v10  ;;  %v1826_v54 = vmul.f32 %v4158_v50, %v4858_v2 }
 0x79a   : > { %3862 = vmatpush3.msra.mxu0 %v4799_v55  ;;  %v4899_v55 = vld [vmem:[#allocation2 + $0x18] sm:$0xff] }
 0x79b   : > { %3877 = vmatprep.subr.mxu0 %v1847_v35  ;;  %v1832_v60 = vmul.f32 %v4902_v56, %v1826_v54 }
 0x79d   : > { %v4926_v63 = vadd.f32 %v4917_v61, %v1832_v60  ;;  %v5046_v60 = vld [vmem:[%s5229_s9 + $0x30] sm:$0xff] }
 0x7e0   : > { %v1491_v36 = vpop.f32.mrf.mxu0 }
 0x7e1   : > { %3875 = vmatmul.mubr.msk.f32.vlgmr.msra.gmra.mxu1 %vm557_vm0, %v1491_v36 }
 0x7e2   : > { %v3840_v38 = vpop.f32.mrf.mxu0  ;;  %3896 = vmatprep.mubr.msk.f32.mxu1 %vm557_vm0, %v534_v37  ;;  %3889 = vmatpush3.msra.mxu1 %v1851_v39 }
 0x7e3   : > { %3890 = vmatprep.subr.mxu1 %v1850_v0 }
 0x7e4   : > { %3891 = vmatpush3.msra.mxu1 %v1850_v0  ;;  %v5053_v0 = vld [vmem:[%s5229_s9 + $0x28] sm:$0xff] }
 0x7e5   : > { %3892 = vmatprep.subr.mxu1 %v1849_v1 }
 0x7e6   : > { %3893 = vmatpush3.msra.mxu1 %v1849_v1  ;;  %v5060_v1 = vld [vmem:[%s5229_s9 + $0x20] sm:$0xff] }
 0x7e7   : > { %3894 = vmatprep.subr.mxu1 %v1848_v3 }
 0x7e8   : > { %3895 = vmatpush3.msra.mxu1 %v1848_v3 }
 0x7e9   : > { %3910 = vmatprep.subr.mxu1 %v4396_v10  ;;  %3897 = vmatmul.mubr.msk.f32.vlgmr.msra.gmra.mxu1 %vm557_vm0, %v535_v53 }
 0x7ea   : > { %3914 = vmatprep.mubr.msk.f32.mxu1 %vm4397_vm1, %v4396_v10 }
 0x853   : > { %v1649_v45 = vpop.f32.mrf.mxu0 }
 0x854   : > { %3864 = vmatmul.mubr.msk.f32.vlgmr.msra.gmra.mxu0 %vm557_vm0, %v1649_v45 }
 0x855   : > { %3878 = vmatpush3.msra.mxu0 %v1847_v35  ;;  %v3854_v47 = vpop.f32.mrf.mxu0  ;;  %3885 = vmatprep.mubr.msk.f32.mxu0 %vm557_vm0, %v534_v37 }
 0x856   : > { %3879 = vmatprep.subr.mxu0 %v1846_v46 }
 0x857   : > { %3880 = vmatpush3.msra.mxu0 %v1846_v46 }
 0x858   : > { %3881 = vmatprep.subr.mxu0 %v1845_v48 }
 0x859   : > { %3882 = vmatpush3.msra.mxu0 %v1845_v48 }
 0x85a   : > { %3883 = vmatprep.subr.mxu0 %v1844_v51 }
 0x85b   : > { %3884 = vmatpush3.msra.mxu0 %v1844_v51 }
 0x85c   : > { %3886 = vmatmul.mubr.msk.f32.vlgmr.msra.gmra.mxu0 %vm557_vm0, %v535_v53  ;;  %3899 = vmatprep.subr.mxu0 %v4396_v10 }
 0x85d   : > { %3900 = vmatpush3.msra.mxu0 %v4899_v55  ;;  %3907 = vmatprep.mubr.msk.f32.mxu0 %vm4397_vm1, %v4396_v10 }
 0x85e   : > { %3901 = vmatprep.subr.mxu0 %v4396_v10 }
 0x85f   : > { %3902 = vmatpush3.msra.mxu0 %v4907_v58 }
 0x860   : > { %3903 = vmatprep.subr.mxu0 %v4396_v10 }
 0x861   : > { %3904 = vmatpush3.msra.mxu0 %v4913_v59 }
 0x862   : > { %3905 = vmatprep.subr.mxu0 %v4396_v10 }
 0x863   : > { %3906 = vmatpush3.msra.mxu0 %v4921_v62 }
 0x864   : > { %3908 = vmatmul.mubr.msk.f32.vlgmr.msra.gmra.mxu0 %vm557_vm0, %v4926_v63  ;;  %3917 = vmatprep.subr.mxu0 %v4396_v10 }
 0x865   : > { %3921 = vmatprep.mubr.msk.f32.mxu0 %vm4397_vm1, %v4396_v10 }
 0x8a1   : > { %v4938_v4 = vpop.f32.mrf.mxu1 }
 0x8a3   : > { %v3876_v5 = vpop.f32.mrf.mxu1 }
 0x8a9   : > { %v4960_v14 = vpop.f32.mrf.mxu1 }
 0x8aa   : > { %3918 = vmatpush3.msra.mxu0 %v4960_v14 }
 0x8ab   : > { %v4963_v15 = vpop.f32.mrf.mxu1  ;;  %3919 = vmatprep.subr.mxu0 %v4396_v10 }
 0x8ac   : > { %3920 = vmatpush3.msra.mxu0 %v4963_v15 }
 0x8ad   : > { %3931 = vmatprep.subr.mxu0 %v4396_v10 }
 0x914   : > { %v4940_v6 = vpop.f32.mrf.mxu0 }
 0x915   : > { %v1796_v38 = vadd.f32 %v4938_v4, %v4940_v6 }
 0x916   : > { %v3865_v7 = vpop.f32.mrf.mxu0 }
 0x917   : > { %v1800_v39 = vadd.f32 %v1796_v38, %v4641_v8  ;;  %v5015_v8 = vld [vmem:[%s5229_s9 + $0x8] sm:$0xff] }
 0x919   : > { %v1804_v40 = vsel %vm557_vm0, %v1800_v39, 0.0 }
 0x91c   : > { %v4942_v9 = vpop.f32.mrf.mxu0 }
 0x91d   : > { %2256 = vrot.lane.b32.xlu1 %v4942_v9, %s4398_s30  ;;  %3911 = vmatpush3.xpose.msk.msra.mxu1 %vm784_vm2, %v4942_v9 }
 0x91e   : > { %v4948_v11 = vpop.f32.mrf.mxu0  ;;  %3912 = vmatprep.subr.mxu1 %v4396_v10 }
 0x91f   : > { %2254 = vrot.lane.b32.xlu0 %v4948_v11, %s4398_s30 }
 0x921   : > { %3913 = vmatpush3.xpose.msk.msra.mxu1 %vm784_vm2, %v4948_v11 }
 0x922   : > { %3924 = vmatprep.subr.mxu1 %v4396_v10 }
 0x924   : > { %v2085_v12 = vpop.f32.mrf.mxu0 }
 0x925   : > { %2252 = vrot.lane.b32.xlu1 %v2085_v12, %s4398_s30  ;;  %3915 = vmatmul.mubr.msk.f32.vlgmr.msra.gmra.mxu1 %vm784_vm2, %v2085_v12 }
 0x926   : > { %v3909_v13 = vpop.f32.mrf.mxu0  ;;  %3928 = vmatprep.mubr.msk.f32.mxu1 %vm4397_vm1, %v4396_v10 }
 0x98f   : > { %v4968_v16 = vpop.permute.xlu1 %2256 }
 0x990   : > { %3925 = vmatpush3.xpose.msk.msra.mxu1 %vm784_vm2, %v4968_v16 }
 0x991   : > { %3926 = vmatprep.subr.mxu1 %v4396_v10  ;;  %v4973_v17 = vpop.permute.xlu0 %2254 }
 0x994   : > { %3927 = vmatpush3.xpose.msk.msra.mxu1 %vm784_vm2, %v4973_v17 }
 0x995   : > { %3949 = vmatprep.subr.mxu1 %v4396_v10 }
 0x997   : > { %v2253_v18 = vpop.permute.xlu1 %2252 }
 0x998   : > { %3929 = vmatmul.mubr.msk.f32.vlgmr.msra.gmra.mxu1 %vm784_vm2, %v2253_v18 }
 0x999   : > { %3957 = vmatprep.mubr.msk.f32.mxu1 %vm4397_vm1, %v4396_v10  ;;  %3950 = vmatpush3.msra.mxu1 %v5003_v41 }
 0x99a   : > { %3951 = vmatprep.subr.mxu1 %v4396_v10 }
 0x99b   : > { %3952 = vmatpush3.msra.mxu1 %v5008_v42 }
 0x99c   : > { %3953 = vmatprep.subr.mxu1 %v4396_v10 }
 0x99d   : > { %3954 = vmatpush3.msra.mxu1 %v5015_v8 }
 0x99e   : > { %3955 = vmatprep.subr.mxu1 %v4396_v10 }
 0x99f   : > { %3956 = vmatpush3.msra.mxu1 %v5022_v43 }
 0x9a0   : > { %3971 = vmatprep.subr.mxu1 %v4396_v10 }
 0x9e5   : > { %v2164_v19 = vpop.f32.mrf.mxu1 }
 0x9e6   : > { %v2168_v20 = vsel %vm784_vm2, %v2164_v19, -inf }
 0x9e7   : > { %2169 = vmax.xlane.f32.xlu1 %v2168_v20  ;;  %v3916_v21 = vpop.f32.mrf.mxu1 }
 0xa58   : > { %v2330_v22 = vpop.f32.mrf.mxu1 }
 0xa59   : > { %v2334_v23 = vsel %vm784_vm2, %v2330_v22, -inf }
 0xa5a   : > { %2335 = vmax.xlane.f32.xlu0 %v2334_v23  ;;  %v3930_v24 = vpop.f32.mrf.mxu1 }
 0xa70   : > { %v2170_v2 = vpop.xlane.xlu1 %2169 }
 0xa71   : > { %v2171_v25 = vsub.f32 %v2164_v19, %v2170_v2 }
 0xa73   : > { %v2172_v26 = vmul.f32 1.442695, %v2171_v25 }
 0xa75   : > { %4159 = vpow2.f32 %v2172_v26 }
 0xa82   : > { %v4160_v27 = vpop.eup %4159 }
 0xa83   : > { %v2174_v28 = vsel %vm784_vm2, %v4160_v27, 0.0 }
 0xa84   : > { %2175 = vadd.xlane.f32.xlu0 %v2174_v28 }
 0xa9a   : > { %2349 = vrot.lane.b32.xlu0 %v4960_v14, %s4399_s15 }
 0xae3   : > { %v2336_v29 = vpop.xlane.xlu0 %2335 }
 0xae4   : > { %v2337_v30 = vsub.f32 %v2330_v22, %v2336_v29 }
 0xae6   : > { %v2338_v31 = vmul.f32 1.442695, %v2337_v30 }
 0xae8   : > { %4161 = vpow2.f32 %v2338_v31 }
 0xaf5   : > { %v4162_v32 = vpop.eup %4161 }
 0xaf6   : > { %v2340_v33 = vsel %vm784_vm2, %v4162_v32, 0.0 }
 0xaf7   : > { %2341 = vadd.xlane.f32.xlu1 %v2340_v33 }
 0xb08   : > { %2347 = vrot.lane.b32.xlu1 %v4963_v15, %s4399_s15  ;;  %s4321_s15 = scalar_lea.vmem %s4320_s20, 512 }
 0xb0d   : > { %v2176_v34 = vpop.xlane.xlu0 %2175 }
 0xb0e   : > { %4163 = vrcp.f32 %v2176_v34 }
 0xb11   : > { %v4989_v37 = vpop.permute.xlu0 %2349 }
 0xb1b   : > { %v4164_v35 = vpop.eup %4163 }
 0xb1c   : > { %v2178_v36 = vmul.f32 %v4164_v35, %v4160_v27 }
 0xb1e   : > { %3922 = vmatmul.mubr.msk.f32.vlgmr.msra.gmra.mxu0 %vm784_vm2, %v2178_v36 }
 0xb1f   : > { %3932 = vmatpush3.msra.mxu0 %v4989_v37  ;;  %3935 = vmatprep.mubr.msk.f32.mxu0 %vm4397_vm1, %v4396_v10 }
 0xb20   : > { %3933 = vmatprep.subr.mxu0 %v4396_v10 }
 0xb2c   : > { %1805 = vadd.xlane.f32.xlu1 %v1804_v40 }
 0xb80   : > { %v2342_v45 = vpop.xlane.xlu1 %2341 }
 0xb81   : > { %4165 = vrcp.f32 %v2342_v45 }
 0xb84   : > { %v5028_v46 = vpop.permute.xlu1 %2347 }
 0xb85   : > { %3934 = vmatpush3.msra.mxu0 %v5028_v46 }
 0xb86   : > { %3938 = vmatprep.subr.mxu0 %v4396_v10 }
 0xb8e   : > { %v4166_v47 = vpop.eup %4165 }
 0xb8f   : > { %v2344_v48 = vmul.f32 %v4166_v47, %v4162_v32 }
 0xb91   : > { %3936 = vmatmul.mubr.msk.f32.vlgmr.msra.gmra.mxu0 %vm784_vm2, %v2344_v48 }
 0xb92   : > { %3946 = vmatprep.mubr.msk.f32.mxu0 %vm4397_vm1, %v4396_v10  ;;  %3939 = vmatpush3.msra.mxu0 %v5039_v57 }
 0xb93   : > { %3940 = vmatprep.subr.mxu0 %v4396_v10 }
 0xb94   : > { %3941 = vmatpush3.msra.mxu0 %v5046_v60 }
 0xb95   : > { %3942 = vmatprep.subr.mxu0 %v4396_v10 }
 0xb96   : > { %3943 = vmatpush3.msra.mxu0 %v5053_v0 }
 0xb97   : > { %3944 = vmatprep.subr.mxu0 %v4396_v10 }
 0xb98   : > { %3945 = vmatpush3.msra.mxu0 %v5060_v1 }
 0xb99   : > { %3960 = vmatprep.subr.mxu0 %v4396_v10 }
 0xbb5   : > { %v1806_v49 = vpop.xlane.xlu1 %1805 }
 0xbb6   : > { %v1809_v50 = vmul.f32 0.03125, %v1806_v49 }
 0xbb8   : > { %v1811_v51 = vsub.f32 %v1800_v39, %v1809_v50  ;;  %v3136_v50 = vsub.s32 4, %v4888_v44 }
 0xbba   : > { %v1813_v53 = vmul.f32 %v1811_v51, %v1811_v51 }
 0xbbc   : > { %v1817_v54 = vsel %vm557_vm0, %v1813_v53, 0.0 }
 0xbbd   : > { %1818 = vadd.xlane.f32.xlu0 %v1817_v54  ;;  %v3137_v54 = vrot.slane %v4896_v52, %v3136_v50 }
 0xbde   : > { %v2248_v3 = vpop.f32.mrf.mxu0 }
 0xbdf   : > { %3958 = vmatmul.mubr.msk.f32.vlgmr.msra.gmra.mxu1 %vm557_vm0, %v2248_v3 }
 0xbe0   : > { %3972 = vmatpush3.xpose.msk.msra.mxu1 %vm784_vm2, %v4942_v9  ;;  %v3923_v4 = vpop.f32.mrf.mxu0  ;;  %3975 = vmatprep.mubr.msk.f32.mxu1 %vm4397_vm1, %v4396_v10 }
 0xbe1   : > { %3973 = vmatprep.subr.mxu1 %v4396_v10 }
 0xbe4   : > { %3974 = vmatpush3.xpose.msk.msra.mxu1 %vm784_vm2, %v4948_v11 }
 0xbe5   : > { %3985 = vmatprep.subr.mxu1 %v4396_v10 }
 0xc46   : > { %v1819_v5 = vpop.xlane.xlu0 %1818 }
 0xc47   : > { %v1821_v6 = vmul.f32 0.03125, %v1819_v5 }
 0xc49   : > { %v1823_v7 = vadd.f32 1e-05, %v1821_v6 }
 0xc4b   : > { %4167 = vrsqrt.f32 %v1823_v7 }
 0xc51   : > { %v2422_v12 = vpop.f32.mrf.mxu0 }
 0xc52   : > { %3947 = vmatmul.mubr.msk.f32.vlgmr.msra.gmra.mxu0 %vm557_vm0, %v2422_v12 }
 0xc53   : > { %v3937_v13 = vpop.f32.mrf.mxu0  ;;  %3961 = vmatpush3.msra.mxu0 %v4899_v55  ;;  %3968 = vmatprep.mubr.msk.f32.mxu0 %vm4397_vm1, %v4396_v10 }
 0xc54   : > { %3962 = vmatprep.subr.mxu0 %v4396_v10 }
 0xc55   : > { %3963 = vmatpush3.msra.mxu0 %v4907_v58 }
 0xc56   : > { %3964 = vmatprep.subr.mxu0 %v4396_v10 }
 0xc57   : > { %3965 = vmatpush3.msra.mxu0 %v4913_v59 }
 0xc58   : > { %v4168_v9 = vpop.eup %4167  ;;  %3966 = vmatprep.subr.mxu0 %v4396_v10 }
 0xc59   : > { %v1827_v11 = vmul.f32 %v4168_v9, %v1811_v51  ;;  %3967 = vmatpush3.msra.mxu0 %v4921_v62 }
 0xc5a   : > { %3978 = vmatprep.subr.mxu0 %v4396_v10 }
 0xc5b   : > { %v1833_v55 = vmul.f32 %v4902_v56, %v1827_v11 }
 0xc5d   : > { %v5086_v18 = vadd.f32 %v4917_v61, %v1833_v55 }
 0xc5f   : > { %3969 = vmatmul.mubr.msk.f32.vlgmr.msra.gmra.mxu0 %vm557_vm0, %v5086_v18 }
 0xc60   : > { %3979 = vmatpush3.msra.mxu0 %v4960_v14  ;;  %3982 = vmatprep.mubr.msk.f32.mxu0 %vm4397_vm1, %v4396_v10 }
 0xc61   : > { %3980 = vmatprep.subr.mxu0 %v4396_v10 }
 0xc62   : > { %3981 = vmatpush3.msra.mxu0 %v4963_v15 }
 0xc63   : > { %3992 = vmatprep.subr.mxu0 %v4396_v10 }
 0xc9f   : > { %v2568_v58 = vpop.f32.mrf.mxu1 }
 0xca1   : > { %v3959_v59 = vpop.f32.mrf.mxu1 }
 0xd12   : > { %v2495_v56 = vpop.f32.mrf.mxu0 }
 0xd13   : > { %v2569_v30 = vadd.f32 %v2568_v58, %v2495_v56 }
 0xd14   : > { %v3948_v62 = vpop.f32.mrf.mxu0 }
 0xd15   : > { %v3106_v33 = vadd.f32 %v2569_v30, %v4926_v63  ;;  %v3153_v62 = vld [vmem:[#allocation10 + $0x18] sm:$0xff] }
 0xd17   : > { %v3108_v34 = vsel %vm557_vm0, %v3106_v33, 0.0 }
 0xd1f   : > { %v2641_v61 = vpop.f32.mrf.mxu0 }
 0xd20   : > { %2802 = vrot.lane.b32.xlu0 %v2641_v61, %s4398_s30  ;;  %3976 = vmatmul.mubr.msk.f32.vlgmr.msra.gmra.mxu1 %vm784_vm2, %v2641_v61  ;;  %v3152_v61 = vld [vmem:[#allocation10 + $0x10] sm:$0xff]  ;;  %s519_s30 = sand.u32 1, %s4379_s26  }
 0xd21   : > { %3986 = vmatpush3.xpose.msk.msra.mxu1 %vm784_vm2, %v4968_v16  ;;  %v3970_v14 = vpop.f32.mrf.mxu0  ;;  %3989 = vmatprep.mubr.msk.f32.mxu1 %vm4397_vm1, %v4396_v10  ;;  %s3520_s16 = sshll.u32 %s519_s30, 4  ;;  %s5180_s21 = scalar_lea.sflag [#allocation4], %s519_s30 }
 0xd22   : > { %3987 = vmatprep.subr.mxu1 %v4396_v10  ;;  %v3151_v14 = vld [vmem:[#allocation10 + $0x8] sm:$0xff]  ;;  %s521_s19 = scalar_lea.vmem [#allocation11], %s3520_s16 }
 0xd23   : > { %s3382_s24 = sshll.u32 %s521_s19, 4  ;;  %s5177_s24 = int_to_ptr.vmem [resolvable:$true] %s3382_s24 }
 0xd24   : > { %s4315_s29 = scalar_lea.vmem %s5177_s24, 256  ;;  %p4322_p7 = scmp.lt.s32.totalorder %s5177_s24, %s4320_s20 }
 0xd25   : > { %3988 = vmatpush3.xpose.msk.msra.mxu1 %vm784_vm2, %v4973_v17  ;;  %p4316_p4 = scmp.ne.s32.totalorder %s5177_s24, %s4315_s29  ;;  %p4323_p11 = scmp.lt.s32.totalorder %s4321_s15, %s4315_s29 }
 0xd26   : > { %4010 = vmatprep.subr.mxu1 %v4396_v10 }
 0xd27   : > { %p4317_p9 = pnand %p4316_p4, %p4511_p5  ;;  %p4324_p13 = por %p4323_p11, %p4322_p7 }
 0xd29   : > { %p4318_p8 = pneg %p4317_p9 }
 0xd2b   : > { %p4325_p0 = pnand %p4324_p13, %p4318_p8 }
 0xd92   : > { %v2803_v15 = vpop.permute.xlu0 %2802 }
 0xd93   : > { %3990 = vmatmul.mubr.msk.f32.vlgmr.msra.gmra.mxu1 %vm784_vm2, %v2803_v15  ;;  %v3150_v15 = vld [vmem:[#allocation10] sm:$0xff] }
 0xd94   : > { %4011 = vmatpush3.msra.mxu1 %v5003_v41  ;;  %4018 = vmatprep.mubr.msk.f32.mxu1 %vm4397_vm1, %v4396_v10 }
 0xd95   : > { %4012 = vmatprep.subr.mxu1 %v4396_v10 }
 0xd96   : > { %4013 = vmatpush3.msra.mxu1 %v5008_v42 }
 0xd97   : > { %4014 = vmatprep.subr.mxu1 %v4396_v10 }
 0xd98   : > { %4015 = vmatpush3.msra.mxu1 %v5015_v8 }
 0xd99   : > { %4016 = vmatprep.subr.mxu1 %v4396_v10 }
 0xd9a   : > { %4017 = vmatpush3.msra.mxu1 %v5022_v43 }
 0xde0   : > { %v2714_v16 = vpop.f32.mrf.mxu1 }
 0xde1   : > { %v2718_v17 = vsel %vm784_vm2, %v2714_v16, -inf }
 0xde2   : > { %2719 = vmax.xlane.f32.xlu1 %v2718_v17  ;;  %v3977_v19 = vpop.f32.mrf.mxu1 }
 0xe53   : > { %v2872_v20 = vpop.f32.mrf.mxu1 }
 0xe54   : > { %v2876_v21 = vsel %vm784_vm2, %v2872_v20, -inf }
 0xe55   : > { %2877 = vmax.xlane.f32.xlu1 %v2876_v21  ;;  %v3991_v22 = vpop.f32.mrf.mxu1 }
 0xe6b   : > { %v2720_v23 = vpop.xlane.xlu1 %2719 }
 0xe6c   : > { %v2721_v24 = vsub.f32 %v2714_v16, %v2720_v23  ;;  %v3149_v23 = vld [vmem:[#allocation8 + $0x18] sm:$0xff] }
 0xe6d   : > { %4032 = vmatprep.subr.mxu1 %v3149_v23 }
 0xe6e   : > { %v2722_v2 = vmul.f32 1.442695, %v2721_v24  ;;  %v3148_v24 = vld [vmem:[#allocation8 + $0x10] sm:$0xff] }
 0xe70   : > { %4169 = vpow2.f32 %v2722_v2  ;;  %v3147_v2 = vld [vmem:[#allocation8 + $0x8] sm:$0xff] }
 0xe7d   : > { %v4170_v25 = vpop.eup %4169 }
 0xe7e   : > { %v2724_v26 = vsel %vm784_vm2, %v4170_v25, 0.0 }
 0xe7f   : > { %2725 = vadd.xlane.f32.xlu1 %v2724_v26  ;;  %v3156_v26 = vsub.s32 1, %v4888_v44 }
 0xede   : > { %v2878_v27 = vpop.xlane.xlu1 %2877 }
 0xedf   : > { %v2879_v28 = vsub.f32 %v2872_v20, %v2878_v27  ;;  %v3157_v27 = vrot.slane %v4896_v52, %v3156_v26 }
 0xee1   : > { %v2880_v29 = vmul.f32 1.442695, %v2879_v28 }
 0xee3   : > { %4171 = vpow2.f32 %v2880_v29 }
 0xef0   : > { %v4172_v31 = vpop.eup %4171 }
 0xef1   : > { %v2882_v32 = vsel %vm784_vm2, %v4172_v31, 0.0 }
 0xef2   : > { %2883 = vadd.xlane.f32.xlu1 %v2882_v32 }
 0xef6   : > { %3109 = vadd.xlane.f32.xlu1 %v3108_v34  ;;  %v3243_v34 = vsub.s32 0, %v4888_v44 }
 0xf08   : > { %v2726_v35 = vpop.xlane.xlu1 %2725 }
 0xf09   : > { %4173 = vrcp.f32 %v2726_v35  ;;  %v3244_v35 = vrot.slane %v4896_v52, %v3243_v34 }
 0xf16   : > { %v4174_v36 = vpop.eup %4173 }
 0xf17   : > { %v2728_v38 = vmul.f32 %v4174_v36, %v4170_v25  ;;  %v3146_v25 = vld [vmem:[#allocation8] sm:$0xff] }
 0xf19   : > { %3983 = vmatmul.mubr.msk.f32.vlgmr.msra.gmra.mxu0 %vm784_vm2, %v2728_v38 }
 0xf1a   : > { %3993 = vmatpush3.msra.mxu0 %v4989_v37  ;;  %3996 = vmatprep.mubr.msk.f32.mxu0 %vm4397_vm1, %v4396_v10 }
 0xf1b   : > { %3994 = vmatprep.subr.mxu0 %v4396_v10 }
 0xf1c   : > { %3995 = vmatpush3.msra.mxu0 %v5028_v46 }
 0xf1d   : > { %3999 = vmatprep.subr.mxu0 %v4396_v10 }
 0xf7b   : > { %v2884_v63 = vpop.xlane.xlu1 %2883 }
 0xf7c   : > { %4175 = vrcp.f32 %v2884_v63 }
 0xf7f   : > { %v3110_v39 = vpop.xlane.xlu1 %3109 }
 0xf80   : > { %v3114_v40 = vmul.f32 0.03125, %v3110_v39 }
 0xf82   : > { %v3116_v41 = vsub.f32 %v3106_v33, %v3114_v40 }
 0xf84   : > { %v3118_v42 = vmul.f32 %v3116_v41, %v3116_v41 }
 0xf86   : > { %v3120_v8 = vsel %vm557_vm0, %v3118_v42, 0.0 }
 0xf87   : > { %3121 = vadd.xlane.f32.xlu0 %v3120_v8 }
 0xf89   : > { %v4176_v43 = vpop.eup %4175 }
 0xf8a   : > { %v2886_v37 = vmul.f32 %v4176_v43, %v4172_v31 }
 0xf8c   : > { %3997 = vmatmul.mubr.msk.f32.vlgmr.msra.gmra.mxu0 %vm784_vm2, %v2886_v37 }
 0xf8d   : > { %4000 = vmatpush3.msra.mxu0 %v5039_v57  ;;  %4007 = vmatprep.mubr.msk.f32.mxu0 %vm4397_vm1, %v4396_v10  ;;  %v3142_v57 = vsub.s32 5, %v4888_v44 }
 0xf8e   : > { %4001 = vmatprep.subr.mxu0 %v4396_v10 }
 0xf8f   : > { %4002 = vmatpush3.msra.mxu0 %v5046_v60 }
 0xf90   : > { %4003 = vmatprep.subr.mxu0 %v4396_v10 }
 0xf91   : > { %4004 = vmatpush3.msra.mxu0 %v5053_v0 }
 0xf92   : > { %4005 = vmatprep.subr.mxu0 %v4396_v10  ;;  %v3143_v10 = vrot.slane %v4896_v52, %v3142_v57 }
 0xf93   : > { %4006 = vmatpush3.msra.mxu0 %v5060_v1 }
 0xf94   : > { %4021 = vmatprep.subr.mxu0 %v3153_v62 }
 0xfd9   : > { %v2798_v45 = vpop.f32.mrf.mxu0 }
 0xfda   : > { %4019 = vmatmul.mubr.msk.f32.vlgmr.msra.gmra.mxu1 %vm557_vm0, %v2798_v45 }
 0xfdb   : > { %v3984_v46 = vpop.f32.mrf.mxu0  ;;  %4033 = vmatpush3.msra.mxu1 %v3149_v23 }
 0xfdc   : > { %4034 = vmatprep.subr.mxu1 %v3148_v24 }
 0xfdd   : > { %4035 = vmatpush3.msra.mxu1 %v3148_v24 }
 0xfde   : > { %4036 = vmatprep.subr.mxu1 %v3147_v2 }
 0xfdf   : > { %4037 = vmatpush3.msra.mxu1 %v3147_v2 }
 0xfe0   : > { %4038 = vmatprep.subr.mxu1 %v3146_v25 }
 0xfe1   : > { %4039 = vmatpush3.msra.mxu1 %v3146_v25 }
0x1010   : > { %v3122_v47 = vpop.xlane.xlu0 %3121 }
0x1011   : > { %v3126_v48 = vmul.f32 0.03125, %v3122_v47 }
0x1013   : > { %v3128_v49 = vadd.f32 1e-05, %v3126_v48 }
0x1015   : > { %4177 = vrsqrt.f32 %v3128_v49 }
0x1022   : > { %v4178_v51 = vpop.eup %4177 }
0x1023   : > { %v3132_v53 = vmul.f32 %v4178_v51, %v3116_v41 }
0x1025   : > { %v3138_v60 = vmul.f32 %v3137_v54, %v3132_v53 }
0x1027   : > { %v5145_v1 = vadd.f32 %v3143_v10, %v3138_v60 }
0x104c   : > { %v2956_v0 = vpop.f32.mrf.mxu0 }
0x104d   : > { %4008 = vmatmul.mubr.msk.f32.vlgmr.msra.gmra.mxu0 %vm557_vm0, %v2956_v0 }
0x104e   : > { %v3998_v3 = vpop.f32.mrf.mxu0  ;;  %4029 = vmatprep.mubr.msk.f32.mxu0 %vm557_vm0, %v5145_v1  ;;  %4022 = vmatpush3.msra.mxu0 %v3153_v62 }
0x104f   : > { %4023 = vmatprep.subr.mxu0 %v3152_v61  ;;  %v3356_v3 = vsub.s32 6, %v4888_v44 }
0x1050   : > { %4024 = vmatpush3.msra.mxu0 %v3152_v61 }
0x1051   : > { %4025 = vmatprep.subr.mxu0 %v3151_v14 }
0x1052   : > { %4026 = vmatpush3.msra.mxu0 %v3151_v14 }
0x1053   : > { %4027 = vmatprep.subr.mxu0 %v3150_v15 }
0x1054   : > { %4028 = vmatpush3.msra.mxu0 %v3150_v15 }
0x109a   : > { %v3102_v4 = vpop.f32.mrf.mxu1 }
0x109c   : > { %v4020_v5 = vpop.f32.mrf.mxu1 }
0x109d   : > { %v3357_v5 = vrot.slane %v4896_v52, %v3356_v3 }
0x110d   : > { %v3029_v6 = vpop.f32.mrf.mxu0 }
0x110e   : > { %v3103_v7 = vadd.f32 %v3102_v4, %v3029_v6  ;;  %v3362_v4 = vsub.s32 7, %v4888_v44 }
0x110f   : > { %v4009_v12 = vpop.f32.mrf.mxu0 }
0x1110   : > { %v3107_v13 = vadd.f32 %v3103_v7, %v5086_v18  ;;  %v3363_v7 = vrot.slane %v4896_v52, %v3362_v4 }
0x1112   : > { %v3111_v9 = vsel %vm557_vm0, %v3107_v13, 0.0 }
0x1113   : > { %3112 = vadd.xlane.f32.xlu1 %v3111_v9 }
0x119c   : > { %v3113_v11 = vpop.xlane.xlu1 %3112 }
0x119d   : > { %v3115_v55 = vmul.f32 0.03125, %v3113_v11 }
0x119f   : > { %v3117_v58 = vsub.f32 %v3107_v13, %v3115_v55 }
0x11a1   : > { %v3119_v59 = vmul.f32 %v3117_v58, %v3117_v58 }
0x11a3   : > { %v3123_v56 = vsel %vm557_vm0, %v3119_v59, 0.0 }
0x11a4   : > { %3124 = vadd.xlane.f32.xlu1 %v3123_v56 }
0x122d   : > { %v3125_v18 = vpop.xlane.xlu1 %3124 }
0x122e   : > { %v3127_v16 = vmul.f32 0.03125, %v3125_v18 }
0x1230   : > { %v3129_v17 = vadd.f32 1e-05, %v3127_v16 }
0x1232   : > { %4179 = vrsqrt.f32 %v3129_v17 }
0x123f   : > { %v4180_v19 = vpop.eup %4179 }
0x1240   : > { %v3133_v20 = vmul.f32 %v4180_v19, %v3117_v58 }
0x1242   : > { %v3139_v21 = vmul.f32 %v3137_v54, %v3133_v20 }
0x1244   : > { %v3145_v22 = vadd.f32 %v3143_v10, %v3139_v21 }
0x1246   : > { %4030 = vmatmul.mubr.msk.f32.vlgmr.msra.gmra.mxu0 %vm557_vm0, %v3145_v22 }
0x1306   : > { %v4031_v28 = vpop.f32.mrf.mxu0 }
0x1307   : > { %v3236_v29 = vadd.f32 %v4031_v28, %v3157_v27 }
0x1308   : > { %v3230_v30 = vpop.f32.mrf.mxu0 }
0x1309   : > { %v3231_v31 = vadd.f32 %v3230_v30, %v3157_v27  ;;  %v3240_v33 = vmax.f32 %v3236_v29, 0.0 }
0x130b   : > { %v3239_v32 = vmax.f32 %v3231_v31, 0.0 }
0x130d   : > { %4040 = vmatprep.mubr.msk.f32.mxu1 %vm557_vm0, %v3239_v32 }
0x130e   : > { %4041 = vmatmul.mubr.msk.f32.vlgmr.msra.gmra.mxu1 %vm557_vm0, %v3240_v33 }
0x13ce   : > { %v4042_v36 = vpop.f32.mrf.mxu1 }
0x13cf   : > { %v3323_v63 = vadd.f32 %v4042_v36, %v3244_v35 }
0x13d0   : > { %v3317_v38 = vpop.f32.mrf.mxu1 }
0x13d1   : > { %v3318_v39 = vadd.f32 %v3317_v38, %v3244_v35  ;;  %v3327_v42 = vadd.f32 %v3323_v63, %v3145_v22 }
0x13d3   : > { %v3326_v40 = vadd.f32 %v3318_v39, %v5145_v1  ;;  %v3331_v8 = vsel %vm557_vm0, %v3327_v42, 0.0 }
0x13d5   : > { %v3328_v41 = vsel %vm557_vm0, %v3326_v40, 0.0 }
0x13d6   : > { %3329 = vadd.xlane.f32.xlu1 %v3328_v41 }
0x13da   : > { %3332 = vadd.xlane.f32.xlu1 %v3331_v8 }
0x145f   : > { %v3330_v43 = vpop.xlane.xlu1 %3329 }
0x1460   : > { %v3334_v37 = vmul.f32 0.03125, %v3330_v43 }
0x1462   : > { %v3336_v45 = vsub.f32 %v3326_v40, %v3334_v37 }
0x1463   : > { %v3333_v46 = vpop.xlane.xlu1 %3332 }
0x1464   : > { %v3335_v47 = vmul.f32 0.03125, %v3333_v46  ;;  %v3338_v48 = vmul.f32 %v3336_v45, %v3336_v45 }
0x1466   : > { %v3337_v49 = vsub.f32 %v3327_v42, %v3335_v47  ;;  %v3340_v50 = vsel %vm557_vm0, %v3338_v48, 0.0 }
0x1467   : > { %3341 = vadd.xlane.f32.xlu1 %v3340_v50 }
0x1468   : > { %v3339_v51 = vmul.f32 %v3337_v49, %v3337_v49 }
0x146a   : > { %v3343_v53 = vsel %vm557_vm0, %v3339_v51, 0.0 }
0x146b   : > { %3344 = vadd.xlane.f32.xlu1 %v3343_v53 }
0x14f0   : > { %v3342_v54 = vpop.xlane.xlu1 %3341 }
0x14f1   : > { %v3346_v57 = vmul.f32 0.03125, %v3342_v54 }
0x14f3   : > { %v3348_v60 = vadd.f32 1e-05, %v3346_v57 }
0x14f4   : > { %v3345_v10 = vpop.xlane.xlu1 %3344 }
0x14f5   : > { %4181 = vrsqrt.f32 %v3348_v60  ;;  %v3347_v0 = vmul.f32 0.03125, %v3345_v10 }
0x14f7   : > { %v3349_v1 = vadd.f32 1e-05, %v3347_v0 }
0x14f9   : > { %4183 = vrsqrt.f32 %v3349_v1 }
0x1502   : > { %v4182_v6 = vpop.eup %4181 }
0x1503   : > { %v3352_v12 = vmul.f32 %v4182_v6, %v3336_v45 }
0x1505   : > { %v3358_v13 = vmul.f32 %v3357_v5, %v3352_v12 }
0x1506   : > { %v4184_v9 = vpop.eup %4183 }
0x1507   : > { %v3364_v11 = vadd.f32 %v3363_v7, %v3358_v13  ;;  %v3353_v55 = vmul.f32 %v4184_v9, %v3337_v49 }
0x1509   : > { %v3359_v58 = vmul.f32 %v3357_v5, %v3353_v55  ;;  %3366 = vst.msk [vmem:[%s521_s19] sm:$0xff] %vm557_vm0, %v3364_v11 }
0x150b   : > { %v3365_v44 = vadd.f32 %v3363_v7, %v3359_v58 }
0x150d   : > { %3367 = vst.msk [vmem:[%s521_s19 + $0x8] sm:$0xff] %vm557_vm0, %v3365_v44 }
0x150e   : > { %4328 = shalt.err (!%p4325_p0)
}
0x150f   : > { %s4329_s22 = scalar_lea.hbm %s5175_s23, 256  ;;  %s4333_s16 = scalar_lea.hbm %s5233_s13, 512 }
0x1510   : > { %p4330_p3 = scmp.ne.s32.totalorder %s5175_s23, %s4329_s22  ;;  %p4334_p12 = scmp.lt.s32.totalorder %s5175_s23, %s5233_s13 }
0x1511   : > { %p4335_p10 = scmp.lt.s32.totalorder %s4333_s16, %s4329_s22 }
0x1512   : > { %p4331_p1 = pnand %p4330_p3, %p4511_p5 }
0x1513   : > { %p4336_p4 = por %p4335_p10, %p4334_p12 }
0x1514   : > { %p4332_p2 = pneg %p4331_p1 }
0x1516   : > { %p4337_p9 = pnand %p4336_p4, %p4332_p2 }
0x1518   : > { %4340 = shalt.err (!%p4337_p9)
}
0x1519   : > { %s4401_s7 = smov 128   ;;  %s4402_s25 = smov 8  }
0x151a   : > { %4063 = dma.vmem_to_hbm [thread:$0]  (%p4511_p5), %s5177_s24, 256, %s5175_s23, %s5180_s21, %s4401_s7, %s4401_s7, %s4402_s25  }
0x151b PF: > { %s5258_s29 = sld [smem:[#allocation16_spill]]  ;;  %p4095_p8 = scmp.ge.s32.totalorder %s4387_s28, 2 }
0x151d   : > { %p4082_p7 = pnand %p4095_p8, %p4515_p6 }
0x151f   : > { %p4083_p11 = pneg %p4082_p7 }
0x1521   : > { %s3397_s20 = sand.u32 1, %s5258_s29  }
0x1522   : > { %s3398_s15 = scalar_lea.sflag [#allocation4], %s3397_s20 }
0x1523   : > { %4370 = dma.done.wait (%p4083_p11), %s3398_s15, 256  }
0x1524   : > { %4372 = vsyncadd (%p4083_p11), %s3398_s15, 4294967040  ;;  %s5260_s28 = sld [smem:[#allocation18_spill]]  ;;  %s5263_s25 = smov %s4379_s26 }
0x1525   : > { %s5261_s22 = sld [smem:[#allocation17_spill]] }
0x1526   : > { %s5262_s27 = sld [smem:[#allocation19_spill]] }
0x152a   : > { %p26_p13 = scmp.ge.s32.totalorder %s5260_s28, 4  }
0x152b   : > { %s5264_s26 = smov %s5261_s22 }
0x152c   :  { %28 = sbr.rel (!%p26_p13) target bundleno = 8 (0x8), region = 131 }
0x1531   :  { %3403 = vsyncpa [#allocation3], 1 }
0x1532   :  { %3405 = vsyncpa [#allocation3 + $0x1], 1 }
0x1533   :  { %3406 = vsyncpa [#allocation6], 1 }
0x1534   :  { %3407 = vsyncpa [#allocation9], 1 }
0x1535   :  { %3408 = vsyncpa [#allocation4], 1 }
0x1536   :  { %3410 = vsyncpa [#allocation4 + $0x1], 1 }

// kernel: tpu_custom_call.1
= control target key start
LH: loop header
LB: loop body
LE: loop exit
PB: predicated region body
PF: predicated region fallthrough
CT: control target
= control target key end

     0   :  { %s5220_s0 = inlined_call_operand.vmem [shape: f32[2,16,32], index: 0, kind: input, shape index: {}]   ;;  %s5221_s1 = inlined_call_operand.vmem [shape: f32[2,16,32], index: 1, kind: input, shape index: {}]   ;;  %s5222_s2 = inlined_call_operand.vmem [shape: f32[32,32], index: 2, kind: input, shape index: {}]   ;;  %s5223_s3 = inlined_call_operand.vmem [shape: f32[32,32], index: 3, kind: input, shape index: {}]   ;;  %s5224_s4 = inlined_call_operand.vmem [shape: f32[32,64], index: 4, kind: input, shape index: {}]   ;;  %s5225_s5 = inlined_call_operand.vmem [shape: f32[64,32], index: 5, kind: input, shape index: {}]   ;;  %s5226_s6 = inlined_call_operand.hbm [shape: f32[32,32], index: 6, kind: input, shape index: {}]   ;;  %s5227_s7 = inlined_call_operand.hbm [shape: f32[32,32], index: 7, kind: input, shape index: {}]   ;;  %s5228_s8 = inlined_call_operand.hbm [shape: f32[32,64], index: 8, kind: input, shape index: {}]   ;;  %s5229_s9 = inlined_call_operand.vmem [shape: f32[64,32], index: 9, kind: input, shape index: {}]   ;;  %s5230_s10 = inlined_call_operand.hbm [shape: f32[32,32], index: 10, kind: input, shape index: {}]   ;;  %s5231_s11 = inlined_call_operand.hbm [shape: f32[32,32], index: 11, kind: input, shape index: {}]   ;;  %s5232_s12 = inlined_call_operand.vmem [shape: f32[8,32], index: 12, kind: input, shape index: {}]   ;;  %s5233_s13 = inlined_call_operand.hbm [shape: f32[2,16,32], index: 13, kind: output, shape index: {}]  }
   0x1   :  { %5240 = sst [smem:[#allocation21_spill]] %s5227_s7 }
   0x2   :  { %18 = vsyncpa [#allocation3], 0 }
   0x3   :  { %19 = vsyncpa [#allocation6], 0 }
   0x4   :  { %20 = vsyncpa [#allocation9], 0 }
   0x5   :  { %21 = vsyncpa [#allocation4], 0 }
   0x6   :  { %23 = vsyncpa [#allocation4 + $0x1], 0  ;;  %s4473_s25 = smov 0   ;;  %s4475_s26 = smov 0  }
   0x7   :  { %s4477_s27 = smov 0   ;;  %s4479_s28 = smov 0  }
   0x8 LB: > { %5241 = sst [smem:[#allocation16_spill]] %s4375_s25  ;;  %s4494_s29 = sadd.s32 4294967295, %s4387_s28   ;;  %s4387_s28 = sphi %s4479_s28, %s5260_s28   ;;  %s4383_s27 = sphi %s4477_s27, %s5262_s27   ;;  %s4379_s26 = sphi %s4475_s26, %s5264_s26   ;;  %s4375_s25 = sphi %s4473_s25, %s5263_s25  }
   0x9   : > { %5242 = sst [smem:[#allocation17_spill]] %s4383_s27  ;;  %s3506_s30 = sadd.s32 4294967294, %s4387_s28  }
   0xa   : > { %s4498_s14 = sadd.s32 1, %s4387_s28   ;;  %s319_s15 = sadd.s32 1, %s4383_s27 }
   0xb   : > { %5243 = sst [smem:[#allocation18_spill]] %s4498_s14  ;;  %s316_s16 = ssub.s32 %s4387_s28, %s4498_s14 }
   0xc   : > { %p329_p0 = scmp.ne.s32.totalorder %s4383_s27, %s4379_s26  ;;  %p317_p1 = scmp.eq.s32.totalorder %s316_s16, 0 }
   0xd   : > { %p330_p2 = scmp.eq.s32.totalorder %s4494_s29, 1  ;;  %p335_p3 = scmp.ne.s32.totalorder %s4379_s26, %s4375_s25 }
   0xe   : > { %p336_p4 = scmp.eq.s32.totalorder %s3506_s30, 1  ;;  %p3507_p7 = scmp.ge.s32.totalorder %s4387_s28, 1 }
   0xf   : > { %s4509_s17 = scalar_select %p317_p1, %s4383_s27, %s319_s15  }
  0x10   : > { %p4511_p5 = por %p330_p2, %p329_p0  ;;  %p4515_p6 = por %p336_p4, %p335_p3 }
  0x11   : > { %5244 = sst [smem:[#allocation19_spill]] %s4509_s17  ;;  %p343_p8 = scmp.lt.s32.totalorder %s4387_s28, 3 }
  0x12   : > { %s5246_s19 = scalar_select %p4515_p6, 1, 0 }
  0x13   : > { %p5239_p9 = scmp.eq.s32.totalorder %s4494_s29, 0  ;;  %p4522_p10 = pnand %p3507_p7, %p343_p8 }
  0x14   : > { %5247 = sst [smem:[#allocation20_spill]] %s5246_s19  ;;  %s4389_s21 = smov [#allocation5]  }
  0x15   : > { %p4065_p11 = pneg %p4522_p10  ;;  %s380_s22 = sshll.u32 %s4389_s21, 4  ;;  %s381_s22 = int_to_ptr.vmem [resolvable:$true] %s380_s22 }
  0x16   : > { %s4390_s24 = smov [#allocation8]   ;;  %s4391_s15 = smov [#allocation2]  }
  0x17   : > { %p4530_p12 = pnand %p5239_p9, %p4065_p11  ;;  %s409_s30 = sshll.u32 %s4390_s24, 4  ;;  %s410_s30 = int_to_ptr.vmem [resolvable:$true] %s409_s30 }
  0x18   : > { %s367_s16 = sshll.u32 %s4391_s15, 4  ;;  %s4196_s27 = scalar_lea.vmem %s381_s22, 512  ;;  %s368_s16 = int_to_ptr.vmem [resolvable:$true] %s367_s16 }
  0x19   : > { %p4536_p13 = pneg %p4530_p12  ;;  %p4197_p0 = scmp.ne.s32.totalorder %s381_s22, %s4196_s27 }
  0x1a   : > { %p4204_p3 = scmp.lt.s32.totalorder %s381_s22, %s381_s22  ;;  %p4205_p4 = scmp.lt.s32.totalorder %s4196_s27, %s4196_s27 }
  0x1b   : > { %p4199_p1 = pnand %p4197_p0, %p4536_p13 }
  0x1c   : > { %p4206_p7 = por %p4205_p4, %p4204_p3 }
  0x1d   : > { %p4200_p2 = pneg %p4199_p1 }
  0x1f   : > { %p4207_p8 = pnand %p4206_p7, %p4200_p2 }
  0x21   : > { %4210 = shalt.err (!%p4207_p8)
}
  0x22   : > { %s4392_s21 = smov 128   ;;  %s4393_s24 = smov 8  }
  0x23   : > { %s5251_s7 = sld [smem:[#allocation21_spill]]  ;;  %s4222_s19 = scalar_lea.vmem %s410_s30, 512 }
  0x24   : > { %p4223_p11 = scmp.ne.s32.totalorder %s410_s30, %s4222_s19  ;;  %p4230_p3 = scmp.lt.s32.totalorder %s410_s30, %s410_s30 }
  0x25   : > { %p4231_p2 = scmp.lt.s32.totalorder %s4222_s19, %s4222_s19 }
  0x26   : > { %p4225_p0 = pnand %p4223_p11, %p4536_p13 }
  0x27   : > { %p4232_p4 = por %p4231_p2, %p4230_p3 }
  0x28   : > { %p4226_p1 = pneg %p4225_p0 }
  0x29   : > { %4071 = dma.hbm_to_vmem [thread:$0]  (!%p4530_p12), %s5251_s7, 512, %s381_s22, [#allocation6], %s4392_s21, %s4392_s21, %s4393_s24  }
  0x2a   : > { %p4233_p7 = pnand %p4232_p4, %p4226_p1 }
  0x2c   : > { %4236 = shalt.err (!%p4233_p7)
}
  0x2d   : > { %4077 = dma.hbm_to_vmem [thread:$0]  (!%p4530_p12), %s5230_s10, 512, %s410_s30, [#allocation9], %s4392_s21, %s4392_s21, %s4393_s24  }
  0x2e   : > { %s4248_s14 = scalar_lea.vmem %s368_s16, 512  ;;  %p4256_p9 = scmp.lt.s32.totalorder %s368_s16, %s368_s16 }
  0x2f   : > { %p4249_p8 = scmp.ne.s32.totalorder %s368_s16, %s4248_s14  ;;  %p4257_p3 = scmp.lt.s32.totalorder %s4248_s14, %s4248_s14 }
  0x31   : > { %p4251_p11 = pnand %p4249_p8, %p4536_p13  ;;  %p4258_p1 = por %p4257_p3, %p4256_p9 }
  0x33   : > { %p4252_p0 = pneg %p4251_p11 }
  0x35   : > { %p4259_p2 = pnand %p4258_p1, %p4252_p0 }
  0x37   : > { %4262 = shalt.err (!%p4259_p2)
}
  0x38   : > { %4068 = dma.hbm_to_vmem [thread:$0]  (!%p4530_p12), %s5226_s6, 512, %s368_s16, [#allocation3], %s4392_s21, %s4392_s21, %s4393_s24  }
  0x39   : > { %s4394_s22 = smov [#allocation7]   ;;  %s4395_s15 = smov [#allocation10]  }
  0x3a   : > { %s393_s30 = sshll.u32 %s4394_s22, 4  ;;  %s422_s27 = sshll.u32 %s4395_s15, 4  ;;  %s394_s30 = int_to_ptr.vmem [resolvable:$true] %s393_s30  ;;  %s423_s27 = int_to_ptr.vmem [resolvable:$true] %s422_s27 }
  0x3b   : > { %s4274_s7 = scalar_lea.vmem %s394_s30, 512  ;;  %p4282_p8 = scmp.lt.s32.totalorder %s394_s30, %s394_s30 }
  0x3c   : > { %p4275_p4 = scmp.ne.s32.totalorder %s394_s30, %s4274_s7  ;;  %p4283_p11 = scmp.lt.s32.totalorder %s4274_s7, %s4274_s7 }
  0x3e   : > { %p4277_p9 = pnand %p4275_p4, %p4536_p13  ;;  %p4284_p0 = por %p4283_p11, %p4282_p8 }
  0x40   : > { %p4278_p7 = pneg %p4277_p9 }
  0x42   : > { %p4285_p3 = pnand %p4284_p0, %p4278_p7 }
  0x44   : > { %4288 = shalt.err (!%p4285_p3)
}
  0x45   : > { %4074 = dma.hbm_to_vmem [thread:$0]  (!%p4530_p12), %s5228_s8, 512, %s394_s30, [#allocation6], %s4392_s21, %s4392_s21, %s4393_s24  }
  0x46   : > { %s4300_s19 = scalar_lea.vmem %s423_s27, 512  ;;  %p4308_p9 = scmp.lt.s32.totalorder %s423_s27, %s423_s27 }
  0x47   : > { %p4301_p1 = scmp.ne.s32.totalorder %s423_s27, %s4300_s19  ;;  %p4309_p8 = scmp.lt.s32.totalorder %s4300_s19, %s4300_s19 }
  0x49   : > { %p4303_p2 = pnand %p4301_p1, %p4536_p13  ;;  %p4310_p7 = por %p4309_p8, %p4308_p9 }
  0x4b   : > { %p4304_p4 = pneg %p4303_p2 }
  0x4d   : > { %p4311_p11 = pnand %p4310_p7, %p4304_p4 }
  0x4f   : > { %4314 = shalt.err (!%p4311_p11)
}
  0x50   : > { %4080 = dma.hbm_to_vmem [thread:$0]  (!%p4530_p12), %s5231_s11, 512, %s423_s27, [#allocation9], %s4392_s21, %s4392_s21, %s4393_s24  }
  0x51   : > { %457 = sbr.rel (%p4522_p10) target bundleno = 5403 (0x151b), region = 72  ;;  %p5252_p13 = scmp.eq.s32.totalorder (!%p4522_p10), %s4494_s29, 0 }
  0x56   : > { %4358 = dma.done.wait (%p5252_p13), [#allocation3], 512   ;;  %p5253_p0 = pmov %p5252_p13 }
  0x58   : > { %4360 = vsyncadd (%p5253_p0), [#allocation3], 4294966784  ;;  %p5254_p3 = pmov %p5253_p0 }
  0x59   : > { %p5255_p1 = pmov %p5253_p0 }
  0x5a   : > { %4362 = dma.done.wait (%p5254_p3), [#allocation6], 1024  }
  0x5b   : > { %4364 = vsyncadd (%p5255_p1), [#allocation6], 4294966272  ;;  %p5256_p2 = pmov %p5253_p0 }
  0x5c   : > { %p5257_p12 = pmov %p5253_p0 }
  0x5d   : > { %4366 = dma.done.wait (%p5256_p2), [#allocation9], 1024  }
  0x5e   : > { %4368 = vsyncadd (%p5257_p12), [#allocation9], 4294966272  ;;  %p522_p10 = scmp.lt.s32.totalorder %s4494_s29, 1  ;;  %vm557_vm0 = vcmask 261120   ;;  %v544_v0 = vld [vmem:[%s5223_s3 + $0x18] sm:$0xff]  ;;  %v543_v1 = vld [vmem:[%s5223_s3 + $0x10] sm:$0xff] }
  0x5f   : > { %3733 = vmatprep.subr.mxu0 %v544_v0  ;;  %v542_v3 = vld [vmem:[%s5223_s3 + $0x8] sm:$0xff]  ;;  %v548_v4 = vld [vmem:[%s5224_s4 + $0x18] sm:$0xff]  ;;  %v547_v5 = vld [vmem:[%s5224_s4 + $0x10] sm:$0xff]  ;;  %v4396_v10 = vmov 0.0   ;;  %vm4397_vm1 = vmmov 0   ;;  %vm784_vm2 = vcmask 130048  }
  0x60   : > { %s4606_s17 = scalar_select %p522_p10, %s4494_s29, 1  ;;  %3734 = vmatpush3.msra.mxu0 %v544_v0  ;;  %v541_v6 = vld [vmem:[%s5223_s3] sm:$0xff]  ;;  %3744 = vmatprep.subr.mxu1 %v548_v4  ;;  %v546_v7 = vld [vmem:[%s5224_s4 + $0x8] sm:$0xff]  ;;  %v4646_v9 = vld [vmem:[%s5222_s2 + $0x18] sm:$0xff] }
  0x61   : > { %3735 = vmatprep.subr.mxu0 %v543_v1  ;;  %3745 = vmatpush3.msra.mxu1 %v548_v4  ;;  %v4654_v11 = vld [vmem:[%s5222_s2 + $0x10] sm:$0xff]  ;;  %v545_v12 = vld [vmem:[%s5224_s4] sm:$0xff]  ;;  %v4666_v13 = vld [vmem:[%s5222_s2 + $0x8] sm:$0xff]  ;;  %s4398_s30 = smov 112   ;;  %s4399_s15 = smov 96  }
  0x62   : > { %s3586_s20 = sshll.u32 %s4606_s17, 4  ;;  %3736 = vmatpush3.msra.mxu0 %v543_v1  ;;  %3746 = vmatprep.subr.mxu1 %v547_v5  ;;  %v4673_v14 = vld [vmem:[%s5222_s2] sm:$0xff]  ;;  %v4738_v41 = vld [vmem:[%s5225_s5 + $0x18] sm:$0xff]  ;;  %v4743_v42 = vld [vmem:[%s5225_s5 + $0x10] sm:$0xff]  ;;  %s3588_s14 = sshll.u32 %s4494_s29, 8 }
  0x63   : > { %s526_s24 = scalar_lea.vmem %s5220_s0, %s3586_s20  ;;  %3737 = vmatprep.subr.mxu0 %v542_v3  ;;  %3747 = vmatpush3.msra.mxu1 %v547_v5  ;;  %v4750_v43 = vld [vmem:[%s5225_s5 + $0x8] sm:$0xff]  ;;  %v4757_v44 = vld [vmem:[%s5225_s5] sm:$0xff]  ;;  %v4777_v52 = vld [vmem:[%s5225_s5 + $0x38] sm:$0xff]  ;;  %s531_s21 = scalar_lea.vmem %s5221_s1, %s3586_s20 }
  0x64   : > { %v4620_v2 = vld [vmem:[%s526_s24] sm:$0xff]  ;;  %3738 = vmatpush3.msra.mxu0 %v542_v3  ;;  %v4641_v8 = vld [vmem:[%s526_s24 + $0x8] sm:$0xff]  ;;  %3748 = vmatprep.subr.mxu1 %v546_v7  ;;  %v4783_v53 = vld [vmem:[%s5225_s5 + $0x30] sm:$0xff]  ;;  %s5175_s23 = scalar_lea.hbm %s5233_s13, %s3588_s14  ;;  %s4400_s17 = smov [#allocation11]  }
  0x65   : > { %3741 = vmatprep.mubr.msk.f32.mxu0 %vm557_vm0, %v4620_v2  ;;  %3752 = vmatprep.mubr.msk.f32.mxu1 %vm557_vm0, %v4620_v2  ;;  %v4792_v54 = vld [vmem:[%s5225_s5 + $0x28] sm:$0xff]  ;;  %v4799_v55 = vld [vmem:[%s5225_s5 + $0x20] sm:$0xff]  ;;  %s4319_s20 = sshll.u32 %s4400_s17, 4  ;;  %s4320_s20 = int_to_ptr.vmem [resolvable:$false] %s4319_s20 }
  0x66   : > { %3739 = vmatprep.subr.mxu0 %v541_v6  ;;  %3749 = vmatpush3.msra.mxu1 %v546_v7 }
  0x67   : > { %3740 = vmatpush3.msra.mxu0 %v541_v6  ;;  %3750 = vmatprep.subr.mxu1 %v545_v12 }
  0x68   : > { %3742 = vmatmul.mubr.msk.f32.vlgmr.msra.gmra.mxu0 %vm557_vm0, %v4641_v8  ;;  %3755 = vmatprep.subr.mxu0 %v4396_v10 }
  0x69   : > { %3756 = vmatpush3.msra.mxu0 %v4646_v9  ;;  %3763 = vmatprep.mubr.msk.f32.mxu0 %vm4397_vm1, %v4396_v10 }
  0x6a   : > { %3757 = vmatprep.subr.mxu0 %v4396_v10  ;;  %3751 = vmatpush3.msra.mxu1 %v545_v12 }
  0x6b   : > { %3758 = vmatpush3.msra.mxu0 %v4654_v11  ;;  %3766 = vmatprep.subr.mxu1 %v4396_v10 }
  0x6c   : > { %3759 = vmatprep.subr.mxu0 %v4396_v10  ;;  %3753 = vmatmul.mubr.msk.f32.vlgmr.msra.gmra.mxu1 %vm557_vm0, %v4641_v8 }
  0x6d   : > { %3760 = vmatpush3.msra.mxu0 %v4666_v13  ;;  %3770 = vmatprep.mubr.msk.f32.mxu1 %vm4397_vm1, %v4396_v10 }
  0x6e   : > { %3761 = vmatprep.subr.mxu0 %v4396_v10 }
  0x6f   : > { %3762 = vmatpush3.msra.mxu0 %v4673_v14 }
  0x70   : > { %3764 = vmatmul.mubr.msk.f32.vlgmr.msra.gmra.mxu0 %vm557_vm0, %v4620_v2  ;;  %3773 = vmatprep.subr.mxu0 %v4396_v10 }
  0x71   : > { %3777 = vmatprep.mubr.msk.f32.mxu0 %vm4397_vm1, %v4396_v10 }
 0x128   : > { %v4688_v15 = vpop.f32.mrf.mxu0 }
 0x129   : > { %952 = vrot.lane.b32.xlu0 %v4688_v15, %s4398_s30  ;;  %3767 = vmatpush3.xpose.msk.msra.mxu1 %vm784_vm2, %v4688_v15 }
 0x12a   : > { %3768 = vmatprep.subr.mxu1 %v4396_v10  ;;  %v4695_v16 = vpop.f32.mrf.mxu0 }
 0x12c   : > { %v4702_v17 = vpop.f32.mrf.mxu1 }
 0x12d   : > { %950 = vrot.lane.b32.xlu0 %v4695_v16, %s4398_s30  ;;  %3769 = vmatpush3.xpose.msk.msra.mxu1 %vm784_vm2, %v4695_v16 }
 0x12e   : > { %3780 = vmatprep.subr.mxu1 %v4396_v10  ;;  %3774 = vmatpush3.msra.mxu0 %v4702_v17  ;;  %v4708_v19 = vpop.f32.mrf.mxu1 }
 0x12f   : > { %3775 = vmatprep.subr.mxu0 %v4396_v10 }
 0x130   : > { %v780_v18 = vpop.f32.mrf.mxu0  ;;  %3776 = vmatpush3.msra.mxu0 %v4708_v19 }
 0x131   : > { %948 = vrot.lane.b32.xlu1 %v780_v18, %s4398_s30  ;;  %3771 = vmatmul.mubr.msk.f32.vlgmr.msra.gmra.mxu1 %vm784_vm2, %v780_v18 }
 0x132   : > { %v3765_v20 = vpop.f32.mrf.mxu0  ;;  %3784 = vmatprep.mubr.msk.f32.mxu1 %vm4397_vm1, %v4396_v10  ;;  %3787 = vmatprep.subr.mxu0 %v4396_v10 }
 0x19b   : > { %v4714_v21 = vpop.permute.xlu0 %952 }
 0x19c   : > { %3781 = vmatpush3.xpose.msk.msra.mxu1 %vm784_vm2, %v4714_v21 }
 0x19d   : > { %3782 = vmatprep.subr.mxu1 %v4396_v10 }
 0x19f   : > { %v4719_v22 = vpop.permute.xlu0 %950 }
 0x1a0   : > { %3783 = vmatpush3.xpose.msk.msra.mxu1 %vm784_vm2, %v4719_v22 }
 0x1a1   : > { %3805 = vmatprep.subr.mxu1 %v4396_v10 }
 0x1a3   : > { %v949_v23 = vpop.permute.xlu1 %948 }
 0x1a4   : > { %3785 = vmatmul.mubr.msk.f32.vlgmr.msra.gmra.mxu1 %vm784_vm2, %v949_v23 }
 0x1a5   : > { %3813 = vmatprep.mubr.msk.f32.mxu1 %vm4397_vm1, %v4396_v10  ;;  %3806 = vmatpush3.msra.mxu1 %v4738_v41 }
 0x1a6   : > { %3807 = vmatprep.subr.mxu1 %v4396_v10 }
 0x1a7   : > { %3808 = vmatpush3.msra.mxu1 %v4743_v42 }
 0x1a8   : > { %3809 = vmatprep.subr.mxu1 %v4396_v10 }
 0x1a9   : > { %3810 = vmatpush3.msra.mxu1 %v4750_v43 }
 0x1aa   : > { %3811 = vmatprep.subr.mxu1 %v4396_v10 }
 0x1ab   : > { %3812 = vmatpush3.msra.mxu1 %v4757_v44 }
 0x1ac   : > { %3827 = vmatprep.subr.mxu1 %v4396_v10 }
 0x1f1   : > { %v860_v24 = vpop.f32.mrf.mxu1 }
 0x1f2   : > { %v864_v25 = vsel %vm784_vm2, %v860_v24, -inf }
 0x1f3   : > { %865 = vmax.xlane.f32.xlu1 %v864_v25  ;;  %v3772_v26 = vpop.f32.mrf.mxu1 }
 0x264   : > { %v1026_v27 = vpop.f32.mrf.mxu1 }
 0x265   : > { %v1030_v28 = vsel %vm784_vm2, %v1026_v27, -inf }
 0x266   : > { %1031 = vmax.xlane.f32.xlu0 %v1030_v28  ;;  %v3786_v29 = vpop.f32.mrf.mxu1 }
 0x27c   : > { %v866_v30 = vpop.xlane.xlu1 %865 }
 0x27d   : > { %v867_v31 = vsub.f32 %v860_v24, %v866_v30 }
 0x27f   : > { %v868_v32 = vmul.f32 1.442695, %v867_v31 }
 0x281   : > { %4141 = vpow2.f32 %v868_v32 }
 0x28e   : > { %v4142_v33 = vpop.eup %4141 }
 0x28f   : > { %v870_v34 = vsel %vm784_vm2, %v4142_v33, 0.0 }
 0x290   : > { %871 = vadd.xlane.f32.xlu0 %v870_v34 }
 0x2a6   : > { %1045 = vrot.lane.b32.xlu0 %v4702_v17, %s4399_s15 }
 0x2ef   : > { %v1032_v35 = vpop.xlane.xlu0 %1031 }
 0x2f0   : > { %v1033_v36 = vsub.f32 %v1026_v27, %v1032_v35  ;;  %v1847_v35 = vld [vmem:[#allocation5 + $0x18] sm:$0xff] }
 0x2f2   : > { %v1034_v37 = vmul.f32 1.442695, %v1033_v36 }
 0x2f4   : > { %4143 = vpow2.f32 %v1034_v37  ;;  %v534_v37 = vld [vmem:[%s531_s21] sm:$0xff] }
 0x301   : > { %v4144_v38 = vpop.eup %4143 }
 0x302   : > { %v1036_v39 = vsel %vm784_vm2, %v4144_v38, 0.0 }
 0x303   : > { %1037 = vadd.xlane.f32.xlu1 %v1036_v39  ;;  %v1851_v39 = vld [vmem:[#allocation7 + $0x18] sm:$0xff] }
 0x314   : > { %1043 = vrot.lane.b32.xlu1 %v4708_v19, %s4399_s15 }
 0x319   : > { %v872_v40 = vpop.xlane.xlu0 %871 }
 0x31a   : > { %4145 = vrcp.f32 %v872_v40 }
 0x31d   : > { %v4763_v47 = vpop.permute.xlu0 %1045 }
 0x327   : > { %v4146_v45 = vpop.eup %4145 }
 0x328   : > { %v874_v46 = vmul.f32 %v4146_v45, %v4142_v33 }
 0x32a   : > { %3778 = vmatmul.mubr.msk.f32.vlgmr.msra.gmra.mxu0 %vm784_vm2, %v874_v46  ;;  %v1846_v46 = vld [vmem:[#allocation5 + $0x10] sm:$0xff] }
 0x32b   : > { %3788 = vmatpush3.msra.mxu0 %v4763_v47  ;;  %3791 = vmatprep.mubr.msk.f32.mxu0 %vm4397_vm1, %v4396_v10 }
 0x32c   : > { %3789 = vmatprep.subr.mxu0 %v4396_v10 }
 0x38c   : > { %v1038_v48 = vpop.xlane.xlu1 %1037 }
 0x38d   : > { %4147 = vrcp.f32 %v1038_v48  ;;  %v1845_v48 = vld [vmem:[#allocation5 + $0x8] sm:$0xff] }
 0x390   : > { %v4770_v49 = vpop.permute.xlu1 %1043 }
 0x391   : > { %3790 = vmatpush3.msra.mxu0 %v4770_v49 }
 0x392   : > { %3794 = vmatprep.subr.mxu0 %v4396_v10 }
 0x39a   : > { %v4148_v50 = vpop.eup %4147 }
 0x39b   : > { %v1040_v51 = vmul.f32 %v4148_v50, %v4144_v38 }
 0x39d   : > { %3792 = vmatmul.mubr.msk.f32.vlgmr.msra.gmra.mxu0 %vm784_vm2, %v1040_v51  ;;  %v1844_v51 = vld [vmem:[#allocation5] sm:$0xff] }
 0x39e   : > { %3795 = vmatpush3.msra.mxu0 %v4777_v52  ;;  %3802 = vmatprep.mubr.msk.f32.mxu0 %vm4397_vm1, %v4396_v10 }
 0x39f   : > { %3796 = vmatprep.subr.mxu0 %v4396_v10 }
 0x3a0   : > { %3797 = vmatpush3.msra.mxu0 %v4783_v53 }
 0x3a1   : > { %3798 = vmatprep.subr.mxu0 %v4396_v10 }
 0x3a2   : > { %3799 = vmatpush3.msra.mxu0 %v4792_v54 }
 0x3a3   : > { %3800 = vmatprep.subr.mxu0 %v4396_v10 }
 0x3a4   : > { %3801 = vmatpush3.msra.mxu0 %v4799_v55 }
 0x3a5   : > { %3816 = vmatprep.subr.mxu0 %v4396_v10 }
 0x3ea   : > { %v944_v56 = vpop.f32.mrf.mxu0 }
 0x3eb   : > { %3814 = vmatmul.mubr.msk.f32.vlgmr.msra.gmra.mxu1 %vm557_vm0, %v944_v56 }
 0x3ec   : > { %3828 = vmatpush3.xpose.msk.msra.mxu1 %vm784_vm2, %v4688_v15  ;;  %v3779_v57 = vpop.f32.mrf.mxu0  ;;  %3831 = vmatprep.mubr.msk.f32.mxu1 %vm4397_vm1, %v4396_v10 }
 0x3ed   : > { %3829 = vmatprep.subr.mxu1 %v4396_v10 }
 0x3f0   : > { %3830 = vmatpush3.xpose.msk.msra.mxu1 %vm784_vm2, %v4695_v16 }
 0x3f1   : > { %3841 = vmatprep.subr.mxu1 %v4396_v10 }
 0x45d   : > { %v1118_v58 = vpop.f32.mrf.mxu0 }
 0x45e   : > { %3803 = vmatmul.mubr.msk.f32.vlgmr.msra.gmra.mxu0 %vm557_vm0, %v1118_v58  ;;  %v4907_v58 = vld [vmem:[#allocation2 + $0x10] sm:$0xff] }
 0x45f   : > { %3817 = vmatpush3.msra.mxu0 %v4646_v9  ;;  %v3793_v59 = vpop.f32.mrf.mxu0  ;;  %3824 = vmatprep.mubr.msk.f32.mxu0 %vm4397_vm1, %v4396_v10 }
 0x460   : > { %3818 = vmatprep.subr.mxu0 %v4396_v10  ;;  %v4913_v59 = vld [vmem:[#allocation2 + $0x8] sm:$0xff] }
 0x461   : > { %3819 = vmatpush3.msra.mxu0 %v4654_v11 }
 0x462   : > { %3820 = vmatprep.subr.mxu0 %v4396_v10 }
 0x463   : > { %3821 = vmatpush3.msra.mxu0 %v4666_v13 }
 0x464   : > { %3822 = vmatprep.subr.mxu0 %v4396_v10 }
 0x465   : > { %3823 = vmatpush3.msra.mxu0 %v4673_v14 }
 0x466   : > { %3825 = vmatmul.mubr.msk.f32.vlgmr.msra.gmra.mxu0 %vm557_vm0, %v4641_v8  ;;  %3834 = vmatprep.subr.mxu0 %v4396_v10 }
 0x467   : > { %3835 = vmatpush3.msra.mxu0 %v4702_v17  ;;  %3838 = vmatprep.mubr.msk.f32.mxu0 %vm4397_vm1, %v4396_v10 }
 0x468   : > { %3836 = vmatprep.subr.mxu0 %v4396_v10 }
 0x469   : > { %3837 = vmatpush3.msra.mxu0 %v4708_v19 }
 0x46a   : > { %3848 = vmatprep.subr.mxu0 %v4396_v10 }
 0x4ab   : > { %v1264_v60 = vpop.f32.mrf.mxu1 }
 0x4ad   : > { %v3815_v61 = vpop.f32.mrf.mxu1 }
 0x51e   : > { %v1191_v62 = vpop.f32.mrf.mxu0 }
 0x51f   : > { %v1265_v7 = vadd.f32 %v1264_v60, %v1191_v62  ;;  %v4921_v62 = vld [vmem:[#allocation2] sm:$0xff] }
 0x520   : > { %v3804_v63 = vpop.f32.mrf.mxu0 }
 0x521   : > { %v1799_v12 = vadd.f32 %v1265_v7, %v4620_v2 }
 0x523   : > { %v1801_v14 = vsel %vm557_vm0, %v1799_v12, 0.0 }
 0x526   : > { %v1334_v0 = vpop.f32.mrf.mxu0 }
 0x527   : > { %1495 = vrot.lane.b32.xlu1 %v1334_v0, %s4398_s30  ;;  %3832 = vmatmul.mubr.msk.f32.vlgmr.msra.gmra.mxu1 %vm784_vm2, %v1334_v0  ;;  %v1850_v0 = vld [vmem:[#allocation7 + $0x10] sm:$0xff] }
 0x528   : > { %3842 = vmatpush3.xpose.msk.msra.mxu1 %vm784_vm2, %v4714_v21  ;;  %v3826_v1 = vpop.f32.mrf.mxu0  ;;  %3845 = vmatprep.mubr.msk.f32.mxu1 %vm4397_vm1, %v4396_v10 }
 0x529   : > { %3843 = vmatprep.subr.mxu1 %v4396_v10  ;;  %v1849_v1 = vld [vmem:[#allocation7 + $0x8] sm:$0xff] }
 0x52c   : > { %3844 = vmatpush3.xpose.msk.msra.mxu1 %vm784_vm2, %v4719_v22 }
 0x52d   : > { %3866 = vmatprep.subr.mxu1 %v4396_v10 }
 0x599   : > { %v1496_v3 = vpop.permute.xlu1 %1495 }
 0x59a   : > { %3846 = vmatmul.mubr.msk.f32.vlgmr.msra.gmra.mxu1 %vm784_vm2, %v1496_v3  ;;  %v1848_v3 = vld [vmem:[#allocation7] sm:$0xff] }
 0x59b   : > { %3867 = vmatpush3.msra.mxu1 %v4738_v41  ;;  %3874 = vmatprep.mubr.msk.f32.mxu1 %vm4397_vm1, %v4396_v10 }
 0x59c   : > { %3868 = vmatprep.subr.mxu1 %v4396_v10 }
 0x59d   : > { %3869 = vmatpush3.msra.mxu1 %v4743_v42 }
 0x59e   : > { %3870 = vmatprep.subr.mxu1 %v4396_v10 }
 0x59f   : > { %3871 = vmatpush3.msra.mxu1 %v4750_v43  ;;  %v1828_v43 = vlaneseq }
 0x5a0   : > { %3872 = vmatprep.subr.mxu1 %v4396_v10 }
 0x5a1   : > { %3873 = vmatpush3.msra.mxu1 %v4757_v44  ;;  %v4888_v44 = vshrl.u32 %v1828_v43, 7  ;;  %v5022_v43 = vld [vmem:[%s5229_s9] sm:$0xff] }
 0x5a2   : > { %3888 = vmatprep.subr.mxu1 %v1851_v39 }
 0x5a3   : > { %v1836_v57 = vsub.s32 3, %v4888_v44 }
 0x5e7   : > { %v1407_v4 = vpop.f32.mrf.mxu1 }
 0x5e8   : > { %v1411_v5 = vsel %vm784_vm2, %v1407_v4, -inf }
 0x5e9   : > { %1412 = vmax.xlane.f32.xlu0 %v1411_v5  ;;  %v3833_v6 = vpop.f32.mrf.mxu1 }
 0x65a   : > { %v1565_v9 = vpop.f32.mrf.mxu1 }
 0x65b   : > { %v1569_v11 = vsel %vm784_vm2, %v1565_v9, -inf }
 0x65c   : > { %1570 = vmax.xlane.f32.xlu1 %v1569_v11  ;;  %v3847_v13 = vpop.f32.mrf.mxu1 }
 0x660   : > { %1802 = vadd.xlane.f32.xlu1 %v1801_v14 }
 0x672   : > { %v1413_v15 = vpop.xlane.xlu0 %1412 }
 0x673   : > { %v1414_v16 = vsub.f32 %v1407_v4, %v1413_v15 }
 0x675   : > { %v1415_v17 = vmul.f32 1.442695, %v1414_v16 }
 0x677   : > { %4149 = vpow2.f32 %v1415_v17 }
 0x684   : > { %v4150_v18 = vpop.eup %4149 }
 0x685   : > { %v1417_v19 = vsel %vm784_vm2, %v4150_v18, 0.0 }
 0x686   : > { %1418 = vadd.xlane.f32.xlu0 %v1417_v19 }
 0x6e5   : > { %v1571_v20 = vpop.xlane.xlu1 %1570 }
 0x6e6   : > { %v1572_v21 = vsub.f32 %v1565_v9, %v1571_v20 }
 0x6e8   : > { %v1573_v22 = vmul.f32 1.442695, %v1572_v21 }
 0x6e9   : > { %v1803_v23 = vpop.xlane.xlu1 %1802 }
 0x6ea   : > { %4151 = vpow2.f32 %v1573_v22  ;;  %v1808_v24 = vmul.f32 0.03125, %v1803_v23 }
 0x6ec   : > { %v4858_v2 = vsub.f32 %v1799_v12, %v1808_v24 }
 0x6ee   : > { %v1812_v27 = vmul.f32 %v4858_v2, %v4858_v2 }
 0x6f0   : > { %v1814_v28 = vsel %vm557_vm0, %v1812_v27, 0.0 }
 0x6f7   : > { %v4152_v25 = vpop.eup %4151 }
 0x6f8   : > { %v1575_v26 = vsel %vm784_vm2, %v4152_v25, 0.0 }
 0x6f9   : > { %1576 = vadd.xlane.f32.xlu0 %v1575_v26 }
 0x6fd   : > { %1815 = vadd.xlane.f32.xlu0 %v1814_v28 }
 0x70f   : > { %v1419_v29 = vpop.xlane.xlu0 %1418 }
 0x710   : > { %4153 = vrcp.f32 %v1419_v29 }
 0x71d   : > { %v4154_v30 = vpop.eup %4153 }
 0x71e   : > { %v1421_v31 = vmul.f32 %v4154_v30, %v4150_v18 }
 0x720   : > { %3839 = vmatmul.mubr.msk.f32.vlgmr.msra.gmra.mxu0 %vm784_vm2, %v1421_v31 }
 0x721   : > { %3849 = vmatpush3.msra.mxu0 %v4763_v47  ;;  %3852 = vmatprep.mubr.msk.f32.mxu0 %vm4397_vm1, %v4396_v10 }
 0x722   : > { %3850 = vmatprep.subr.mxu0 %v4396_v10 }
 0x723   : > { %3851 = vmatpush3.msra.mxu0 %v4770_v49  ;;  %v1830_v49 = vsub.s32 2, %v4888_v44 }
 0x724   : > { %3855 = vmatprep.subr.mxu0 %v4396_v10 }
 0x782   : > { %v1577_v32 = vpop.xlane.xlu0 %1576 }
 0x783   : > { %4155 = vrcp.f32 %v1577_v32 }
 0x786   : > { %v1816_v40 = vpop.xlane.xlu0 %1815 }
 0x787   : > { %v1820_v41 = vmul.f32 0.03125, %v1816_v40 }
 0x789   : > { %v1822_v42 = vadd.f32 1e-05, %v1820_v41  ;;  %v5003_v41 = vld [vmem:[%s5229_s9 + $0x18] sm:$0xff] }
 0x78b   : > { %4157 = vrsqrt.f32 %v1822_v42  ;;  %v5008_v42 = vld [vmem:[%s5229_s9 + $0x10] sm:$0xff] }
 0x790   : > { %v4156_v33 = vpop.eup %4155 }
 0x791   : > { %v1579_v34 = vmul.f32 %v4156_v33, %v4152_v25 }
 0x793   : > { %3853 = vmatmul.mubr.msk.f32.vlgmr.msra.gmra.mxu0 %vm784_vm2, %v1579_v34 }
 0x794   : > { %3856 = vmatpush3.msra.mxu0 %v4777_v52  ;;  %3863 = vmatprep.mubr.msk.f32.mxu0 %vm4397_vm1, %v4396_v10  ;;  %v4896_v52 = vld [vmem:[%s5232_s12] sm:$0xff] }
 0x795   : > { %3857 = vmatprep.subr.mxu0 %v4396_v10  ;;  %v4902_v56 = vrot.slane %v4896_v52, %v1830_v49  ;;  %v4917_v61 = vrot.slane %v4896_v52, %v1836_v57  ;;  %v5039_v57 = vld [vmem:[%s5229_s9 + $0x38] sm:$0xff] }
 0x796   : > { %3858 = vmatpush3.msra.mxu0 %v4783_v53  ;;  %v535_v53 = vld [vmem:[%s531_s21 + $0x8] sm:$0xff] }
 0x797   : > { %3859 = vmatprep.subr.mxu0 %v4396_v10 }
 0x798   : > { %3860 = vmatpush3.msra.mxu0 %v4792_v54  ;;  %v4158_v50 = vpop.eup %4157 }
 0x799   : > { %3861 = vmatprep.subr.mxu0 %v4396_v10  ;;  %v1826_v54 = vmul.f32 %v4158_v50, %v4858_v2 }
 0x79a   : > { %3862 = vmatpush3.msra.mxu0 %v4799_v55  ;;  %v4899_v55 = vld [vmem:[#allocation2 + $0x18] sm:$0xff] }
 0x79b   : > { %3877 = vmatprep.subr.mxu0 %v1847_v35  ;;  %v1832_v60 = vmul.f32 %v4902_v56, %v1826_v54 }
 0x79d   : > { %v4926_v63 = vadd.f32 %v4917_v61, %v1832_v60  ;;  %v5046_v60 = vld [vmem:[%s5229_s9 + $0x30] sm:$0xff] }
 0x7e0   : > { %v1491_v36 = vpop.f32.mrf.mxu0 }
 0x7e1   : > { %3875 = vmatmul.mubr.msk.f32.vlgmr.msra.gmra.mxu1 %vm557_vm0, %v1491_v36 }
 0x7e2   : > { %v3840_v38 = vpop.f32.mrf.mxu0  ;;  %3896 = vmatprep.mubr.msk.f32.mxu1 %vm557_vm0, %v534_v37  ;;  %3889 = vmatpush3.msra.mxu1 %v1851_v39 }
 0x7e3   : > { %3890 = vmatprep.subr.mxu1 %v1850_v0 }
 0x7e4   : > { %3891 = vmatpush3.msra.mxu1 %v1850_v0  ;;  %v5053_v0 = vld [vmem:[%s5229_s9 + $0x28] sm:$0xff] }
 0x7e5   : > { %3892 = vmatprep.subr.mxu1 %v1849_v1 }
 0x7e6   : > { %3893 = vmatpush3.msra.mxu1 %v1849_v1  ;;  %v5060_v1 = vld [vmem:[%s5229_s9 + $0x20] sm:$0xff] }
 0x7e7   : > { %3894 = vmatprep.subr.mxu1 %v1848_v3 }
 0x7e8   : > { %3895 = vmatpush3.msra.mxu1 %v1848_v3 }
 0x7e9   : > { %3910 = vmatprep.subr.mxu1 %v4396_v10  ;;  %3897 = vmatmul.mubr.msk.f32.vlgmr.msra.gmra.mxu1 %vm557_vm0, %v535_v53 }
 0x7ea   : > { %3914 = vmatprep.mubr.msk.f32.mxu1 %vm4397_vm1, %v4396_v10 }
 0x853   : > { %v1649_v45 = vpop.f32.mrf.mxu0 }
 0x854   : > { %3864 = vmatmul.mubr.msk.f32.vlgmr.msra.gmra.mxu0 %vm557_vm0, %v1649_v45 }
 0x855   : > { %3878 = vmatpush3.msra.mxu0 %v1847_v35  ;;  %v3854_v47 = vpop.f32.mrf.mxu0  ;;  %3885 = vmatprep.mubr.msk.f32.mxu0 %vm557_vm0, %v534_v37 }
 0x856   : > { %3879 = vmatprep.subr.mxu0 %v1846_v46 }
 0x857   : > { %3880 = vmatpush3.msra.mxu0 %v1846_v46 }
 0x858   : > { %3881 = vmatprep.subr.mxu0 %v1845_v48 }
 0x859   : > { %3882 = vmatpush3.msra.mxu0 %v1845_v48 }
 0x85a   : > { %3883 = vmatprep.subr.mxu0 %v1844_v51 }
 0x85b   : > { %3884 = vmatpush3.msra.mxu0 %v1844_v51 }
 0x85c   : > { %3886 = vmatmul.mubr.msk.f32.vlgmr.msra.gmra.mxu0 %vm557_vm0, %v535_v53  ;;  %3899 = vmatprep.subr.mxu0 %v4396_v10 }
 0x85d   : > { %3900 = vmatpush3.msra.mxu0 %v4899_v55  ;;  %3907 = vmatprep.mubr.msk.f32.mxu0 %vm4397_vm1, %v4396_v10 }
 0x85e   : > { %3901 = vmatprep.subr.mxu0 %v4396_v10 }
 0x85f   : > { %3902 = vmatpush3.msra.mxu0 %v4907_v58 }
 0x860   : > { %3903 = vmatprep.subr.mxu0 %v4396_v10 }
 0x861   : > { %3904 = vmatpush3.msra.mxu0 %v4913_v59 }
 0x862   : > { %3905 = vmatprep.subr.mxu0 %v4396_v10 }
 0x863   : > { %3906 = vmatpush3.msra.mxu0 %v4921_v62 }
 0x864   : > { %3908 = vmatmul.mubr.msk.f32.vlgmr.msra.gmra.mxu0 %vm557_vm0, %v4926_v63  ;;  %3917 = vmatprep.subr.mxu0 %v4396_v10 }
 0x865   : > { %3921 = vmatprep.mubr.msk.f32.mxu0 %vm4397_vm1, %v4396_v10 }
 0x8a1   : > { %v4938_v4 = vpop.f32.mrf.mxu1 }
 0x8a3   : > { %v3876_v5 = vpop.f32.mrf.mxu1 }
 0x8a9   : > { %v4960_v14 = vpop.f32.mrf.mxu1 }
 0x8aa   : > { %3918 = vmatpush3.msra.mxu0 %v4960_v14 }
 0x8ab   : > { %v4963_v15 = vpop.f32.mrf.mxu1  ;;  %3919 = vmatprep.subr.mxu0 %v4396_v10 }
 0x8ac   : > { %3920 = vmatpush3.msra.mxu0 %v4963_v15 }
 0x8ad   : > { %3931 = vmatprep.subr.mxu0 %v4396_v10 }
 0x914   : > { %v4940_v6 = vpop.f32.mrf.mxu0 }
 0x915   : > { %v1796_v38 = vadd.f32 %v4938_v4, %v4940_v6 }
 0x916   : > { %v3865_v7 = vpop.f32.mrf.mxu0 }
 0x917   : > { %v1800_v39 = vadd.f32 %v1796_v38, %v4641_v8  ;;  %v5015_v8 = vld [vmem:[%s5229_s9 + $0x8] sm:$0xff] }
 0x919   : > { %v1804_v40 = vsel %vm557_vm0, %v1800_v39, 0.0 }
 0x91c   : > { %v4942_v9 = vpop.f32.mrf.mxu0 }
 0x91d   : > { %2256 = vrot.lane.b32.xlu1 %v4942_v9, %s4398_s30  ;;  %3911 = vmatpush3.xpose.msk.msra.mxu1 %vm784_vm2, %v4942_v9 }
 0x91e   : > { %v4948_v11 = vpop.f32.mrf.mxu0  ;;  %3912 = vmatprep.subr.mxu1 %v4396_v10 }
 0x91f   : > { %2254 = vrot.lane.b32.xlu0 %v4948_v11, %s4398_s30 }
 0x921   : > { %3913 = vmatpush3.xpose.msk.msra.mxu1 %vm784_vm2, %v4948_v11 }
 0x922   : > { %3924 = vmatprep.subr.mxu1 %v4396_v10 }
 0x924   : > { %v2085_v12 = vpop.f32.mrf.mxu0 }
 0x925   : > { %2252 = vrot.lane.b32.xlu1 %v2085_v12, %s4398_s30  ;;  %3915 = vmatmul.mubr.msk.f32.vlgmr.msra.gmra.mxu1 %vm784_vm2, %v2085_v12 }
 0x926   : > { %v3909_v13 = vpop.f32.mrf.mxu0  ;;  %3928 = vmatprep.mubr.msk.f32.mxu1 %vm4397_vm1, %v4396_v10 }
 0x98f   : > { %v4968_v16 = vpop.permute.xlu1 %2256 }
 0x990   : > { %3925 = vmatpush3.xpose.msk.msra.mxu1 %vm784_vm2, %v4968_v16 }
 0x991   : > { %3926 = vmatprep.subr.mxu1 %v4396_v10  ;;  %v4973_v17 = vpop.permute.xlu0 %2254 }
 0x994   : > { %3927 = vmatpush3.xpose.msk.msra.mxu1 %vm784_vm2, %v4973_v17 }
 0x995   : > { %3949 = vmatprep.subr.mxu1 %v4396_v10 }
 0x997   : > { %v2253_v18 = vpop.permute.xlu1 %2252 }
 0x998   : > { %3929 = vmatmul.mubr.msk.f32.vlgmr.msra.gmra.mxu1 %vm784_vm2, %v2253_v18 }
 0x999   : > { %3957 = vmatprep.mubr.msk.f32.mxu1 %vm4397_vm1, %v4396_v10  ;;  %3950 = vmatpush3.msra.mxu1 %v5003_v41 }
 0x99a   : > { %3951 = vmatprep.subr.mxu1 %v4396_v10 }
 0x99b   : > { %3952 = vmatpush3.msra.mxu1 %v5008_v42 }
 0x99c   : > { %3953 = vmatprep.subr.mxu1 %v4396_v10 }
 0x99d   : > { %3954 = vmatpush3.msra.mxu1 %v5015_v8 }
 0x99e   : > { %3955 = vmatprep.subr.mxu1 %v4396_v10 }
 0x99f   : > { %3956 = vmatpush3.msra.mxu1 %v5022_v43 }
 0x9a0   : > { %3971 = vmatprep.subr.mxu1 %v4396_v10 }
 0x9e5   : > { %v2164_v19 = vpop.f32.mrf.mxu1 }
 0x9e6   : > { %v2168_v20 = vsel %vm784_vm2, %v2164_v19, -inf }
 0x9e7   : > { %2169 = vmax.xlane.f32.xlu1 %v2168_v20  ;;  %v3916_v21 = vpop.f32.mrf.mxu1 }
 0xa58   : > { %v2330_v22 = vpop.f32.mrf.mxu1 }
 0xa59   : > { %v2334_v23 = vsel %vm784_vm2, %v2330_v22, -inf }
 0xa5a   : > { %2335 = vmax.xlane.f32.xlu0 %v2334_v23  ;;  %v3930_v24 = vpop.f32.mrf.mxu1 }
 0xa70   : > { %v2170_v2 = vpop.xlane.xlu1 %2169 }
 0xa71   : > { %v2171_v25 = vsub.f32 %v2164_v19, %v2170_v2 }
 0xa73   : > { %v2172_v26 = vmul.f32 1.442695, %v2171_v25 }
 0xa75   : > { %4159 = vpow2.f32 %v2172_v26 }
 0xa82   : > { %v4160_v27 = vpop.eup %4159 }
 0xa83   : > { %v2174_v28 = vsel %vm784_vm2, %v4160_v27, 0.0 }
 0xa84   : > { %2175 = vadd.xlane.f32.xlu0 %v2174_v28 }
 0xa9a   : > { %2349 = vrot.lane.b32.xlu0 %v4960_v14, %s4399_s15 }
 0xae3   : > { %v2336_v29 = vpop.xlane.xlu0 %2335 }
 0xae4   : > { %v2337_v30 = vsub.f32 %v2330_v22, %v2336_v29 }
 0xae6   : > { %v2338_v31 = vmul.f32 1.442695, %v2337_v30 }
 0xae8   : > { %4161 = vpow2.f32 %v2338_v31 }
 0xaf5   : > { %v4162_v32 = vpop.eup %4161 }
 0xaf6   : > { %v2340_v33 = vsel %vm784_vm2, %v4162_v32, 0.0 }
 0xaf7   : > { %2341 = vadd.xlane.f32.xlu1 %v2340_v33 }
 0xb08   : > { %2347 = vrot.lane.b32.xlu1 %v4963_v15, %s4399_s15  ;;  %s4321_s15 = scalar_lea.vmem %s4320_s20, 512 }
 0xb0d   : > { %v2176_v34 = vpop.xlane.xlu0 %2175 }
 0xb0e   : > { %4163 = vrcp.f32 %v2176_v34 }
 0xb11   : > { %v4989_v37 = vpop.permute.xlu0 %2349 }
 0xb1b   : > { %v4164_v35 = vpop.eup %4163 }
 0xb1c   : > { %v2178_v36 = vmul.f32 %v4164_v35, %v4160_v27 }
 0xb1e   : > { %3922 = vmatmul.mubr.msk.f32.vlgmr.msra.gmra.mxu0 %vm784_vm2, %v2178_v36 }
 0xb1f   : > { %3932 = vmatpush3.msra.mxu0 %v4989_v37  ;;  %3935 = vmatprep.mubr.msk.f32.mxu0 %vm4397_vm1, %v4396_v10 }
 0xb20   : > { %3933 = vmatprep.subr.mxu0 %v4396_v10 }
 0xb2c   : > { %1805 = vadd.xlane.f32.xlu1 %v1804_v40 }
 0xb80   : > { %v2342_v45 = vpop.xlane.xlu1 %2341 }
 0xb81   : > { %4165 = vrcp.f32 %v2342_v45 }
 0xb84   : > { %v5028_v46 = vpop.permute.xlu1 %2347 }
 0xb85   : > { %3934 = vmatpush3.msra.mxu0 %v5028_v46 }
 0xb86   : > { %3938 = vmatprep.subr.mxu0 %v4396_v10 }
 0xb8e   : > { %v4166_v47 = vpop.eup %4165 }
 0xb8f   : > { %v2344_v48 = vmul.f32 %v4166_v47, %v4162_v32 }
 0xb91   : > { %3936 = vmatmul.mubr.msk.f32.vlgmr.msra.gmra.mxu0 %vm784_vm2, %v2344_v48 }
 0xb92   : > { %3946 = vmatprep.mubr.msk.f32.mxu0 %vm4397_vm1, %v4396_v10  ;;  %3939 = vmatpush3.msra.mxu0 %v5039_v57 }
 0xb93   : > { %3940 = vmatprep.subr.mxu0 %v4396_v10 }
 0xb94   : > { %3941 = vmatpush3.msra.mxu0 %v5046_v60 }
 0xb95   : > { %3942 = vmatprep.subr.mxu0 %v4396_v10 }
 0xb96   : > { %3943 = vmatpush3.msra.mxu0 %v5053_v0 }
 0xb97   : > { %3944 = vmatprep.subr.mxu0 %v4396_v10 }
 0xb98   : > { %3945 = vmatpush3.msra.mxu0 %v5060_v1 }
 0xb99   : > { %3960 = vmatprep.subr.mxu0 %v4396_v10 }
 0xbb5   : > { %v1806_v49 = vpop.xlane.xlu1 %1805 }
 0xbb6   : > { %v1809_v50 = vmul.f32 0.03125, %v1806_v49 }
 0xbb8   : > { %v1811_v51 = vsub.f32 %v1800_v39, %v1809_v50  ;;  %v3136_v50 = vsub.s32 4, %v4888_v44 }
 0xbba   : > { %v1813_v53 = vmul.f32 %v1811_v51, %v1811_v51 }
 0xbbc   : > { %v1817_v54 = vsel %vm557_vm0, %v1813_v53, 0.0 }
 0xbbd   : > { %1818 = vadd.xlane.f32.xlu0 %v1817_v54  ;;  %v3137_v54 = vrot.slane %v4896_v52, %v3136_v50 }
 0xbde   : > { %v2248_v3 = vpop.f32.mrf.mxu0 }
 0xbdf   : > { %3958 = vmatmul.mubr.msk.f32.vlgmr.msra.gmra.mxu1 %vm557_vm0, %v2248_v3 }
 0xbe0   : > { %3972 = vmatpush3.xpose.msk.msra.mxu1 %vm784_vm2, %v4942_v9  ;;  %v3923_v4 = vpop.f32.mrf.mxu0  ;;  %3975 = vmatprep.mubr.msk.f32.mxu1 %vm4397_vm1, %v4396_v10 }
 0xbe1   : > { %3973 = vmatprep.subr.mxu1 %v4396_v10 }
 0xbe4   : > { %3974 = vmatpush3.xpose.msk.msra.mxu1 %vm784_vm2, %v4948_v11 }
 0xbe5   : > { %3985 = vmatprep.subr.mxu1 %v4396_v10 }
 0xc46   : > { %v1819_v5 = vpop.xlane.xlu0 %1818 }
 0xc47   : > { %v1821_v6 = vmul.f32 0.03125, %v1819_v5 }
 0xc49   : > { %v1823_v7 = vadd.f32 1e-05, %v1821_v6 }
 0xc4b   : > { %4167 = vrsqrt.f32 %v1823_v7 }
 0xc51   : > { %v2422_v12 = vpop.f32.mrf.mxu0 }
 0xc52   : > { %3947 = vmatmul.mubr.msk.f32.vlgmr.msra.gmra.mxu0 %vm557_vm0, %v2422_v12 }
 0xc53   : > { %v3937_v13 = vpop.f32.mrf.mxu0  ;;  %3961 = vmatpush3.msra.mxu0 %v4899_v55  ;;  %3968 = vmatprep.mubr.msk.f32.mxu0 %vm4397_vm1, %v4396_v10 }
 0xc54   : > { %3962 = vmatprep.subr.mxu0 %v4396_v10 }
 0xc55   : > { %3963 = vmatpush3.msra.mxu0 %v4907_v58 }
 0xc56   : > { %3964 = vmatprep.subr.mxu0 %v4396_v10 }
 0xc57   : > { %3965 = vmatpush3.msra.mxu0 %v4913_v59 }
 0xc58   : > { %v4168_v9 = vpop.eup %4167  ;;  %3966 = vmatprep.subr.mxu0 %v4396_v10 }
 0xc59   : > { %v1827_v11 = vmul.f32 %v4168_v9, %v1811_v51  ;;  %3967 = vmatpush3.msra.mxu0 %v4921_v62 }
 0xc5a   : > { %3978 = vmatprep.subr.mxu0 %v4396_v10 }
 0xc5b   : > { %v1833_v55 = vmul.f32 %v4902_v56, %v1827_v11 }
 0xc5d   : > { %v5086_v18 = vadd.f32 %v4917_v61, %v1833_v55 }
 0xc5f   : > { %3969 = vmatmul.mubr.msk.f32.vlgmr.msra.gmra.mxu0 %vm557_vm0, %v5086_v18 }
 0xc60   : > { %3979 = vmatpush3.msra.mxu0 %v4960_v14  ;;  %3982 = vmatprep.mubr.msk.f32.mxu0 %vm4397_vm1, %v4396_v10 }
 0xc61   : > { %3980 = vmatprep.subr.mxu0 %v4396_v10 }
 0xc62   : > { %3981 = vmatpush3.msra.mxu0 %v4963_v15 }
 0xc63   : > { %3992 = vmatprep.subr.mxu0 %v4396_v10 }
 0xc9f   : > { %v2568_v58 = vpop.f32.mrf.mxu1 }
 0xca1   : > { %v3959_v59 = vpop.f32.mrf.mxu1 }
 0xd12   : > { %v2495_v56 = vpop.f32.mrf.mxu0 }
 0xd13   : > { %v2569_v30 = vadd.f32 %v2568_v58, %v2495_v56 }
 0xd14   : > { %v3948_v62 = vpop.f32.mrf.mxu0 }
 0xd15   : > { %v3106_v33 = vadd.f32 %v2569_v30, %v4926_v63  ;;  %v3153_v62 = vld [vmem:[#allocation10 + $0x18] sm:$0xff] }
 0xd17   : > { %v3108_v34 = vsel %vm557_vm0, %v3106_v33, 0.0 }
 0xd1f   : > { %v2641_v61 = vpop.f32.mrf.mxu0 }
 0xd20   : > { %2802 = vrot.lane.b32.xlu0 %v2641_v61, %s4398_s30  ;;  %3976 = vmatmul.mubr.msk.f32.vlgmr.msra.gmra.mxu1 %vm784_vm2, %v2641_v61  ;;  %v3152_v61 = vld [vmem:[#allocation10 + $0x10] sm:$0xff]  ;;  %s519_s30 = sand.u32 1, %s4379_s26  }
 0xd21   : > { %3986 = vmatpush3.xpose.msk.msra.mxu1 %vm784_vm2, %v4968_v16  ;;  %v3970_v14 = vpop.f32.mrf.mxu0  ;;  %3989 = vmatprep.mubr.msk.f32.mxu1 %vm4397_vm1, %v4396_v10  ;;  %s3520_s16 = sshll.u32 %s519_s30, 4  ;;  %s5180_s21 = scalar_lea.sflag [#allocation4], %s519_s30 }
 0xd22   : > { %3987 = vmatprep.subr.mxu1 %v4396_v10  ;;  %v3151_v14 = vld [vmem:[#allocation10 + $0x8] sm:$0xff]  ;;  %s521_s19 = scalar_lea.vmem [#allocation11], %s3520_s16 }
 0xd23   : > { %s3382_s24 = sshll.u32 %s521_s19, 4  ;;  %s5177_s24 = int_to_ptr.vmem [resolvable:$true] %s3382_s24 }
 0xd24   : > { %s4315_s29 = scalar_lea.vmem %s5177_s24, 256  ;;  %p4322_p7 = scmp.lt.s32.totalorder %s5177_s24, %s4320_s20 }
 0xd25   : > { %3988 = vmatpush3.xpose.msk.msra.mxu1 %vm784_vm2, %v4973_v17  ;;  %p4316_p4 = scmp.ne.s32.totalorder %s5177_s24, %s4315_s29  ;;  %p4323_p11 = scmp.lt.s32.totalorder %s4321_s15, %s4315_s29 }
 0xd26   : > { %4010 = vmatprep.subr.mxu1 %v4396_v10 }
 0xd27   : > { %p4317_p9 = pnand %p4316_p4, %p4511_p5  ;;  %p4324_p13 = por %p4323_p11, %p4322_p7 }
 0xd29   : > { %p4318_p8 = pneg %p4317_p9 }
 0xd2b   : > { %p4325_p0 = pnand %p4324_p13, %p4318_p8 }
 0xd92   : > { %v2803_v15 = vpop.permute.xlu0 %2802 }
 0xd93   : > { %3990 = vmatmul.mubr.msk.f32.vlgmr.msra.gmra.mxu1 %vm784_vm2, %v2803_v15  ;;  %v3150_v15 = vld [vmem:[#allocation10] sm:$0xff] }
 0xd94   : > { %4011 = vmatpush3.msra.mxu1 %v5003_v41  ;;  %4018 = vmatprep.mubr.msk.f32.mxu1 %vm4397_vm1, %v4396_v10 }
 0xd95   : > { %4012 = vmatprep.subr.mxu1 %v4396_v10 }
 0xd96   : > { %4013 = vmatpush3.msra.mxu1 %v5008_v42 }
 0xd97   : > { %4014 = vmatprep.subr.mxu1 %v4396_v10 }
 0xd98   : > { %4015 = vmatpush3.msra.mxu1 %v5015_v8 }
 0xd99   : > { %4016 = vmatprep.subr.mxu1 %v4396_v10 }
 0xd9a   : > { %4017 = vmatpush3.msra.mxu1 %v5022_v43 }
 0xde0   : > { %v2714_v16 = vpop.f32.mrf.mxu1 }
 0xde1   : > { %v2718_v17 = vsel %vm784_vm2, %v2714_v16, -inf }
 0xde2   : > { %2719 = vmax.xlane.f32.xlu1 %v2718_v17  ;;  %v3977_v19 = vpop.f32.mrf.mxu1 }
 0xe53   : > { %v2872_v20 = vpop.f32.mrf.mxu1 }
 0xe54   : > { %v2876_v21 = vsel %vm784_vm2, %v2872_v20, -inf }
 0xe55   : > { %2877 = vmax.xlane.f32.xlu1 %v2876_v21  ;;  %v3991_v22 = vpop.f32.mrf.mxu1 }
 0xe6b   : > { %v2720_v23 = vpop.xlane.xlu1 %2719 }
 0xe6c   : > { %v2721_v24 = vsub.f32 %v2714_v16, %v2720_v23  ;;  %v3149_v23 = vld [vmem:[#allocation8 + $0x18] sm:$0xff] }
 0xe6d   : > { %4032 = vmatprep.subr.mxu1 %v3149_v23 }
 0xe6e   : > { %v2722_v2 = vmul.f32 1.442695, %v2721_v24  ;;  %v3148_v24 = vld [vmem:[#allocation8 + $0x10] sm:$0xff] }
 0xe70   : > { %4169 = vpow2.f32 %v2722_v2  ;;  %v3147_v2 = vld [vmem:[#allocation8 + $0x8] sm:$0xff] }
 0xe7d   : > { %v4170_v25 = vpop.eup %4169 }
 0xe7e   : > { %v2724_v26 = vsel %vm784_vm2, %v4170_v25, 0.0 }
 0xe7f   : > { %2725 = vadd.xlane.f32.xlu1 %v2724_v26  ;;  %v3156_v26 = vsub.s32 1, %v4888_v44 }
 0xede   : > { %v2878_v27 = vpop.xlane.xlu1 %2877 }
 0xedf   : > { %v2879_v28 = vsub.f32 %v2872_v20, %v2878_v27  ;;  %v3157_v27 = vrot.slane %v4896_v52, %v3156_v26 }
 0xee1   : > { %v2880_v29 = vmul.f32 1.442695, %v2879_v28 }
 0xee3   : > { %4171 = vpow2.f32 %v2880_v29 }
 0xef0   : > { %v4172_v31 = vpop.eup %4171 }
 0xef1   : > { %v2882_v32 = vsel %vm784_vm2, %v4172_v31, 0.0 }
 0xef2   : > { %2883 = vadd.xlane.f32.xlu1 %v2882_v32 }
 0xef6   : > { %3109 = vadd.xlane.f32.xlu1 %v3108_v34  ;;  %v3243_v34 = vsub.s32 0, %v4888_v44 }
 0xf08   : > { %v2726_v35 = vpop.xlane.xlu1 %2725 }
 0xf09   : > { %4173 = vrcp.f32 %v2726_v35  ;;  %v3244_v35 = vrot.slane %v4896_v52, %v3243_v34 }
 0xf16   : > { %v4174_v36 = vpop.eup %4173 }
 0xf17   : > { %v2728_v38 = vmul.f32 %v4174_v36, %v4170_v25  ;;  %v3146_v25 = vld [vmem:[#allocation8] sm:$0xff] }
 0xf19   : > { %3983 = vmatmul.mubr.msk.f32.vlgmr.msra.gmra.mxu0 %vm784_vm2, %v2728_v38 }
 0xf1a   : > { %3993 = vmatpush3.msra.mxu0 %v4989_v37  ;;  %3996 = vmatprep.mubr.msk.f32.mxu0 %vm4397_vm1, %v4396_v10 }
 0xf1b   : > { %3994 = vmatprep.subr.mxu0 %v4396_v10 }
 0xf1c   : > { %3995 = vmatpush3.msra.mxu0 %v5028_v46 }
 0xf1d   : > { %3999 = vmatprep.subr.mxu0 %v4396_v10 }
 0xf7b   : > { %v2884_v63 = vpop.xlane.xlu1 %2883 }
 0xf7c   : > { %4175 = vrcp.f32 %v2884_v63 }
 0xf7f   : > { %v3110_v39 = vpop.xlane.xlu1 %3109 }
 0xf80   : > { %v3114_v40 = vmul.f32 0.03125, %v3110_v39 }
 0xf82   : > { %v3116_v41 = vsub.f32 %v3106_v33, %v3114_v40 }
 0xf84   : > { %v3118_v42 = vmul.f32 %v3116_v41, %v3116_v41 }
 0xf86   : > { %v3120_v8 = vsel %vm557_vm0, %v3118_v42, 0.0 }
 0xf87   : > { %3121 = vadd.xlane.f32.xlu0 %v3120_v8 }
 0xf89   : > { %v4176_v43 = vpop.eup %4175 }
 0xf8a   : > { %v2886_v37 = vmul.f32 %v4176_v43, %v4172_v31 }
 0xf8c   : > { %3997 = vmatmul.mubr.msk.f32.vlgmr.msra.gmra.mxu0 %vm784_vm2, %v2886_v37 }
 0xf8d   : > { %4000 = vmatpush3.msra.mxu0 %v5039_v57  ;;  %4007 = vmatprep.mubr.msk.f32.mxu0 %vm4397_vm1, %v4396_v10  ;;  %v3142_v57 = vsub.s32 5, %v4888_v44 }
 0xf8e   : > { %4001 = vmatprep.subr.mxu0 %v4396_v10 }
 0xf8f   : > { %4002 = vmatpush3.msra.mxu0 %v5046_v60 }
 0xf90   : > { %4003 = vmatprep.subr.mxu0 %v4396_v10 }
 0xf91   : > { %4004 = vmatpush3.msra.mxu0 %v5053_v0 }
 0xf92   : > { %4005 = vmatprep.subr.mxu0 %v4396_v10  ;;  %v3143_v10 = vrot.slane %v4896_v52, %v3142_v57 }
 0xf93   : > { %4006 = vmatpush3.msra.mxu0 %v5060_v1 }
 0xf94   : > { %4021 = vmatprep.subr.mxu0 %v3153_v62 }
 0xfd9   : > { %v2798_v45 = vpop.f32.mrf.mxu0 }
 0xfda   : > { %4019 = vmatmul.mubr.msk.f32.vlgmr.msra.gmra.mxu1 %vm557_vm0, %v2798_v45 }
 0xfdb   : > { %v3984_v46 = vpop.f32.mrf.mxu0  ;;  %4033 = vmatpush3.msra.mxu1 %v3149_v23 }
 0xfdc   : > { %4034 = vmatprep.subr.mxu1 %v3148_v24 }
 0xfdd   : > { %4035 = vmatpush3.msra.mxu1 %v3148_v24 }
 0xfde   : > { %4036 = vmatprep.subr.mxu1 %v3147_v2 }
 0xfdf   : > { %4037 = vmatpush3.msra.mxu1 %v3147_v2 }
 0xfe0   : > { %4038 = vmatprep.subr.mxu1 %v3146_v25 }
 0xfe1   : > { %4039 = vmatpush3.msra.mxu1 %v3146_v25 }
0x1010   : > { %v3122_v47 = vpop.xlane.xlu0 %3121 }
0x1011   : > { %v3126_v48 = vmul.f32 0.03125, %v3122_v47 }
0x1013   : > { %v3128_v49 = vadd.f32 1e-05, %v3126_v48 }
0x1015   : > { %4177 = vrsqrt.f32 %v3128_v49 }
0x1022   : > { %v4178_v51 = vpop.eup %4177 }
0x1023   : > { %v3132_v53 = vmul.f32 %v4178_v51, %v3116_v41 }
0x1025   : > { %v3138_v60 = vmul.f32 %v3137_v54, %v3132_v53 }
0x1027   : > { %v5145_v1 = vadd.f32 %v3143_v10, %v3138_v60 }
0x104c   : > { %v2956_v0 = vpop.f32.mrf.mxu0 }
0x104d   : > { %4008 = vmatmul.mubr.msk.f32.vlgmr.msra.gmra.mxu0 %vm557_vm0, %v2956_v0 }
0x104e   : > { %v3998_v3 = vpop.f32.mrf.mxu0  ;;  %4029 = vmatprep.mubr.msk.f32.mxu0 %vm557_vm0, %v5145_v1  ;;  %4022 = vmatpush3.msra.mxu0 %v3153_v62 }
0x104f   : > { %4023 = vmatprep.subr.mxu0 %v3152_v61  ;;  %v3356_v3 = vsub.s32 6, %v4888_v44 }
0x1050   : > { %4024 = vmatpush3.msra.mxu0 %v3152_v61 }
0x1051   : > { %4025 = vmatprep.subr.mxu0 %v3151_v14 }
0x1052   : > { %4026 = vmatpush3.msra.mxu0 %v3151_v14 }
0x1053   : > { %4027 = vmatprep.subr.mxu0 %v3150_v15 }
0x1054   : > { %4028 = vmatpush3.msra.mxu0 %v3150_v15 }
0x109a   : > { %v3102_v4 = vpop.f32.mrf.mxu1 }
0x109c   : > { %v4020_v5 = vpop.f32.mrf.mxu1 }
0x109d   : > { %v3357_v5 = vrot.slane %v4896_v52, %v3356_v3 }
0x110d   : > { %v3029_v6 = vpop.f32.mrf.mxu0 }
0x110e   : > { %v3103_v7 = vadd.f32 %v3102_v4, %v3029_v6  ;;  %v3362_v4 = vsub.s32 7, %v4888_v44 }
0x110f   : > { %v4009_v12 = vpop.f32.mrf.mxu0 }
0x1110   : > { %v3107_v13 = vadd.f32 %v3103_v7, %v5086_v18  ;;  %v3363_v7 = vrot.slane %v4896_v52, %v3362_v4 }
0x1112   : > { %v3111_v9 = vsel %vm557_vm0, %v3107_v13, 0.0 }
0x1113   : > { %3112 = vadd.xlane.f32.xlu1 %v3111_v9 }
0x119c   : > { %v3113_v11 = vpop.xlane.xlu1 %3112 }
0x119d   : > { %v3115_v55 = vmul.f32 0.03125, %v3113_v11 }
0x119f   : > { %v3117_v58 = vsub.f32 %v3107_v13, %v3115_v55 }
0x11a1   : > { %v3119_v59 = vmul.f32 %v3117_v58, %v3117_v58 }
0x11a3   : > { %v3123_v56 = vsel %vm557_vm0, %v3119_v59, 0.0 }
0x11a4   : > { %3124 = vadd.xlane.f32.xlu1 %v3123_v56 }
0x122d   : > { %v3125_v18 = vpop.xlane.xlu1 %3124 }
0x122e   : > { %v3127_v16 = vmul.f32 0.03125, %v3125_v18 }
0x1230   : > { %v3129_v17 = vadd.f32 1e-05, %v3127_v16 }
0x1232   : > { %4179 = vrsqrt.f32 %v3129_v17 }
0x123f   : > { %v4180_v19 = vpop.eup %4179 }
0x1240   : > { %v3133_v20 = vmul.f32 %v4180_v19, %v3117_v58 }
0x1242   : > { %v3139_v21 = vmul.f32 %v3137_v54, %v3133_v20 }
0x1244   : > { %v3145_v22 = vadd.f32 %v3143_v10, %v3139_v21 }
0x1246   : > { %4030 = vmatmul.mubr.msk.f32.vlgmr.msra.gmra.mxu0 %vm557_vm0, %v3145_v22 }
0x1306   : > { %v4031_v28 = vpop.f32.mrf.mxu0 }
0x1307   : > { %v3236_v29 = vadd.f32 %v4031_v28, %v3157_v27 }
0x1308   : > { %v3230_v30 = vpop.f32.mrf.mxu0 }
0x1309   : > { %v3231_v31 = vadd.f32 %v3230_v30, %v3157_v27  ;;  %v3240_v33 = vmax.f32 %v3236_v29, 0.0 }
0x130b   : > { %v3239_v32 = vmax.f32 %v3231_v31, 0.0 }
0x130d   : > { %4040 = vmatprep.mubr.msk.f32.mxu1 %vm557_vm0, %v3239_v32 }
0x130e   : > { %4041 = vmatmul.mubr.msk.f32.vlgmr.msra.gmra.mxu1 %vm557_vm0, %v3240_v33 }
0x13ce   : > { %v4042_v36 = vpop.f32.mrf.mxu1 }
0x13cf   : > { %v3323_v63 = vadd.f32 %v4042_v36, %v3244_v35 }
0x13d0   : > { %v3317_v38 = vpop.f32.mrf.mxu1 }
0x13d1   : > { %v3318_v39 = vadd.f32 %v3317_v38, %v3244_v35  ;;  %v3327_v42 = vadd.f32 %v3323_v63, %v3145_v22 }
0x13d3   : > { %v3326_v40 = vadd.f32 %v3318_v39, %v5145_v1  ;;  %v3331_v8 = vsel %vm557_vm0, %v3327_v42, 0.0 }
0x13d5   : > { %v3328_v41 = vsel %vm557_vm0, %v3326_v40, 0.0 }
0x13d6   : > { %3329 = vadd.xlane.f32.xlu1 %v3328_v41 }
0x13da   : > { %3332 = vadd.xlane.f32.xlu1 %v3331_v8 }
0x145f   : > { %v3330_v43 = vpop.xlane.xlu1 %3329 }
0x1460   : > { %v3334_v37 = vmul.f32 0.03125, %v3330_v43 }
0x1462   : > { %v3336_v45 = vsub.f32 %v3326_v40, %v3334_v37 }
0x1463   : > { %v3333_v46 = vpop.xlane.xlu1 %3332 }
0x1464   : > { %v3335_v47 = vmul.f32 0.03125, %v3333_v46  ;;  %v3338_v48 = vmul.f32 %v3336_v45, %v3336_v45 }
0x1466   : > { %v3337_v49 = vsub.f32 %v3327_v42, %v3335_v47  ;;  %v3340_v50 = vsel %vm557_vm0, %v3338_v48, 0.0 }
0x1467   : > { %3341 = vadd.xlane.f32.xlu1 %v3340_v50 }
0x1468   : > { %v3339_v51 = vmul.f32 %v3337_v49, %v3337_v49 }
0x146a   : > { %v3343_v53 = vsel %vm557_vm0, %v3339_v51, 0.0 }
0x146b   : > { %3344 = vadd.xlane.f32.xlu1 %v3343_v53 }
0x14f0   : > { %v3342_v54 = vpop.xlane.xlu1 %3341 }
0x14f1   : > { %v3346_v57 = vmul.f32 0.03125, %v3342_v54 }
0x14f3   : > { %v3348_v60 = vadd.f32 1e-05, %v3346_v57 }
0x14f4   : > { %v3345_v10 = vpop.xlane.xlu1 %3344 }
0x14f5   : > { %4181 = vrsqrt.f32 %v3348_v60  ;;  %v3347_v0 = vmul.f32 0.03125, %v3345_v10 }
0x14f7   : > { %v3349_v1 = vadd.f32 1e-05, %v3347_v0 }
0x14f9   : > { %4183 = vrsqrt.f32 %v3349_v1 }
0x1502   : > { %v4182_v6 = vpop.eup %4181 }
0x1503   : > { %v3352_v12 = vmul.f32 %v4182_v6, %v3336_v45 }
0x1505   : > { %v3358_v13 = vmul.f32 %v3357_v5, %v3352_v12 }
0x1506   : > { %v4184_v9 = vpop.eup %4183 }
0x1507   : > { %v3364_v11 = vadd.f32 %v3363_v7, %v3358_v13  ;;  %v3353_v55 = vmul.f32 %v4184_v9, %v3337_v49 }
0x1509   : > { %v3359_v58 = vmul.f32 %v3357_v5, %v3353_v55  ;;  %3366 = vst.msk [vmem:[%s521_s19] sm:$0xff] %vm557_vm0, %v3364_v11 }
0x150b   : > { %v3365_v44 = vadd.f32 %v3363_v7, %v3359_v58 }
0x150d   : > { %3367 = vst.msk [vmem:[%s521_s19 + $0x8] sm:$0xff] %vm557_vm0, %v3365_v44 }
0x150e   : > { %4328 = shalt.err (!%p4325_p0)
}
0x150f   : > { %s4329_s22 = scalar_lea.hbm %s5175_s23, 256  ;;  %s4333_s16 = scalar_lea.hbm %s5233_s13, 512 }
0x1510   : > { %p4330_p3 = scmp.ne.s32.totalorder %s5175_s23, %s4329_s22  ;;  %p4334_p12 = scmp.lt.s32.totalorder %s5175_s23, %s5233_s13 }
0x1511   : > { %p4335_p10 = scmp.lt.s32.totalorder %s4333_s16, %s4329_s22 }
0x1512   : > { %p4331_p1 = pnand %p4330_p3, %p4511_p5 }
0x1513   : > { %p4336_p4 = por %p4335_p10, %p4334_p12 }
0x1514   : > { %p4332_p2 = pneg %p4331_p1 }
0x1516   : > { %p4337_p9 = pnand %p4336_p4, %p4332_p2 }
0x1518   : > { %4340 = shalt.err (!%p4337_p9)
}
0x1519   : > { %s4401_s7 = smov 128   ;;  %s4402_s25 = smov 8  }
0x151a   : > { %4063 = dma.vmem_to_hbm [thread:$0]  (%p4511_p5), %s5177_s24, 256, %s5175_s23, %s5180_s21, %s4401_s7, %s4401_s7, %s4402_s25  }
0x151b PF: > { %s5258_s29 = sld [smem:[#allocation16_spill]]  ;;  %p4095_p8 = scmp.ge.s32.totalorder %s4387_s28, 2 }
0x151d   : > { %p4082_p7 = pnand %p4095_p8, %p4515_p6 }
0x151f   : > { %p4083_p11 = pneg %p4082_p7 }
0x1521   : > { %s3397_s20 = sand.u32 1, %s5258_s29  }
0x1522   : > { %s3398_s15 = scalar_lea.sflag [#allocation4], %s3397_s20 }
0x1523   : > { %4370 = dma.done.wait (%p4083_p11), %s3398_s15, 256  }
0x1524   : > { %4372 = vsyncadd (%p4083_p11), %s3398_s15, 4294967040  ;;  %s5260_s28 = sld [smem:[#allocation18_spill]]  ;;  %s5263_s25 = smov %s4379_s26 }
0x1525   : > { %s5261_s22 = sld [smem:[#allocation17_spill]] }
0x1526   : > { %s5262_s27 = sld [smem:[#allocation19_spill]] }
0x152a   : > { %p26_p13 = scmp.ge.s32.totalorder %s5260_s28, 4  }
0x152b   : > { %s5264_s26 = smov %s5261_s22 }
0x152c   :  { %28 = sbr.rel (!%p26_p13) target bundleno = 8 (0x8), region = 131 }
0x1531   :  { %3403 = vsyncpa [#allocation3], 1 }
0x1532   :  { %3405 = vsyncpa [#allocation3 + $0x1], 1 }
0x1533   :  { %3406 = vsyncpa [#allocation6], 1 }
0x1534   :  { %3407 = vsyncpa [#allocation9], 1 }
0x1535   :  { %3408 = vsyncpa [#allocation4], 1 }
0x1536   :  { %3410 = vsyncpa [#allocation4 + $0x1], 1 }

</bundles_post_ra>
